<compile_context>
chip_gen: v6e
topology: v6e:2x2x1
jax: 0.10.0
libtpu: 0.0.40
codegen_flags: <defaults>
</compile_context>

<pallas_src>
import math
import functools

import jax
import jax.numpy as jnp
from jax import lax
from jax.experimental import pallas as pl
from jax.experimental.pallas import tpu as pltpu


def _round_up(n, m):
    return ((n + m - 1) // m) * m


def _layer_norm(v, w, b, eps=1e-5):
    mu = jnp.mean(v, axis=-1, keepdims=True)
    var = jnp.mean((v - mu) ** 2, axis=-1, keepdims=True)
    return (v - mu) * lax.rsqrt(var + eps) * w + b


# ----------------------------------------------------------------------------
# Pallas kernel: one (batch block, encoder layer) pair per grid step.
# ----------------------------------------------------------------------------
def transformer_kernel(x_ref, kbias_ref, mcol_ref,
                       wqkv_ref, bqkv_ref, wo_ref, bo_ref,
                       ln1w_ref, ln1b_ref,
                       w1_ref, b1_ref, w2_ref, b2_ref,
                       ln2w_ref, ln2b_ref,
                       wlin_ref, blin_ref, wtag_ref, btag_ref,
                       wrel_ref, brel_ref,
                       tag_out_ref, rel_out_ref,
                       xres_ref,
                       *, num_heads, scale):
    l = pl.program_id(1)
    n_layers = pl.num_programs(1)

    bb, S, D = x_ref.shape
    dh = D // num_heads
    M = bb * S
    bf = jnp.bfloat16

    # first layer step of this batch block: load residual stream (f32) once
    @pl.when(l == 0)
    def _():
        xres_ref[...] = x_ref[...].astype(jnp.float32).reshape(M, D)

    x = xres_ref[...]                     # (M, D) f32 residual stream
    kbias = kbias_ref[...]                # (bb, 1, S): 0.0 real key, -1e30 pad key

    # ---- fused QKV: one (M, D) @ (D, 3D) bf16 MXU pass ----------------------
    qkv = jnp.dot(x.astype(bf), wqkv_ref[0],
                  preferred_element_type=jnp.float32) + bqkv_ref[0]
    # 1/sqrt(dh) applied to (q + bias) in f32 -> matches the reference exactly
    q3 = (qkv[:, 0 * D:1 * D] * scale).reshape(bb, S, D).astype(bf)
    k3 = qkv[:, 1 * D:2 * D].reshape(bb, S, D).astype(bf)
    v3 = qkv[:, 2 * D:3 * D].reshape(bb, S, D).astype(bf)

    # ---- multi-head attention: true per-head dh-width contractions ---------
    ctx_heads = []
    for h in range(num_heads):
        hs = slice(h * dh, (h + 1) * dh)
        s = jnp.einsum('bqd,bkd->bqk', q3[:, :, hs], k3[:, :, hs],
                       preferred_element_type=jnp.float32) + kbias
        # keep max-subtraction before exp (guards the -1e30 key bias)
        s = s - jnp.max(s, axis=-1, keepdims=True)
        p = jnp.exp(s)
        p = p * pl.reciprocal(jnp.sum(p, axis=-1, keepdims=True), approx=True)
        ctx_heads.append(
            jnp.einsum('bqk,bkd->bqd', p.astype(bf), v3[:, :, hs],
                       preferred_element_type=jnp.float32))
    ctx = jnp.concatenate(ctx_heads, axis=-1)          # (bb, S, D) f32

    # single dense out-projection over all heads
    attn = jnp.dot(ctx.reshape(M, D).astype(bf), wo_ref[0],
                   preferred_element_type=jnp.float32) + bo_ref[0]
    x = _layer_norm(x + attn, ln1w_ref[0], ln1b_ref[0])

    # ---- feed-forward -------------------------------------------------------
    h1 = jnp.maximum(jnp.dot(x.astype(bf), w1_ref[0],
                             preferred_element_type=jnp.float32) + b1_ref[0], 0.0)
    ff = jnp.dot(h1.astype(bf), w2_ref[0],
                 preferred_element_type=jnp.float32) + b2_ref[0]
    x = _layer_norm(x + ff, ln2w_ref[0], ln2b_ref[0])

    xres_ref[...] = x                                  # carry to next layer step

    # ---- heads (last layer step only; lane-dense 128-padded outputs) -------
    @pl.when(l == n_layers - 1)
    def _():
        hid = wlin_ref.shape[1]                        # 128
        tp = wtag_ref.shape[1]                         # padded tag width
        s128 = jnp.dot(x.astype(bf), wlin_ref[...],
                       preferred_element_type=jnp.float32) + blin_ref[...]
        tag = jnp.dot(s128.astype(bf), wtag_ref[...],
                      preferred_element_type=jnp.float32) + btag_ref[...]
        tag_out_ref[...] = tag.reshape(bb, S, tp)

        m3 = mcol_ref[...]                             # (bb, S, 1) non-pad mask
        denom = jnp.maximum(jnp.sum(m3, axis=1), 1.0)  # (bb, 1) guard /0
        rel_avg = jnp.sum(s128.reshape(bb, S, hid) * m3, axis=1) / denom
        rel = jax.nn.sigmoid(
            jnp.dot(rel_avg.astype(bf), wrel_ref[...],
                    preferred_element_type=jnp.float32) + brel_ref[...])
        rel_out_ref[:, 0, :] = rel


# ----------------------------------------------------------------------------
# Wrapper (glue: embedding gather, pos-enc, mask building, weight packing)
# ----------------------------------------------------------------------------
def run_pallas(src, params, cfg):
    B, S = src.shape
    D, L, H = cfg["d_model"], cfg["num_layers"], cfg["num_heads"]
    F, T, R = cfg["ff_hid_dim"], cfg["num_tags"], cfg["num_rels"]
    TP, RP = _round_up(T, 128), _round_up(R, 128)
    dh = D // H
    scale = 1.0 / math.sqrt(dh)
    bf = jnp.bfloat16

    # sequence padded to a lane-dense multiple of 128 (padded keys get the
    # -1e30 bias; padded query positions are sliced off / mask-zeroed).
    Sp = _round_up(S, 128)

    # glue: embedding lookup (gather), * sqrt(d_model), positional encoding
    # (pe[:B] broadcast over the sequence axis, as in the PyTorch module).
    # TODO(synk): embedding gather stays in the XLA wrapper; an in-kernel DMA
    # gather only pays off once the vocab table is streamed explicitly.
    emb = params["embedding"][src] * math.sqrt(D)
    x = (emb + params["pe"][:B]).astype(bf)                # dropout = identity
    nonpad = (src != cfg["pad_id"]).astype(jnp.float32)    # [B, S]
    if Sp != S:
        x = jnp.pad(x, ((0, 0), (0, Sp - S), (0, 0)))
        nonpad = jnp.pad(nonpad, ((0, 0), (0, Sp - S)))
    mcol = nonpad[:, :, None]                              # [B, Sp, 1]
    kbias = jnp.where(nonpad > 0.0, 0.0, -1e30).astype(jnp.float32)[:, None, :]

    # pack weights: fused QKV, bf16 matmul weights, lane-dense head weights.
    wqkv = jnp.concatenate([params["wq"], params["wk"], params["wv"]],
                           axis=-1).astype(bf)                               # [L,D,3D]
    bqkv = jnp.concatenate([params["bq"], params["bk"], params["bv"]],
                           axis=-1)[:, None, :].astype(jnp.float32)          # [L,1,3D]
    wo, bo = params["wo"].astype(bf), params["bo"][:, None, :]
    ln1w, ln1b = params["ln1w"][:, None, :], params["ln1b"][:, None, :]
    w1, b1 = params["w1"].astype(bf), params["b1"][:, None, :]
    w2, b2 = params["w2"].astype(bf), params["b2"][:, None, :]
    ln2w, ln2b = params["ln2w"][:, None, :], params["ln2b"][:, None, :]
    wlin, blin = params["wlin"].astype(bf), params["blin"]
    wtag = jnp.zeros((128, TP), bf).at[:, :T].set(params["wtag"].astype(bf))
    btag = jnp.zeros((1, TP), jnp.float32).at[:, :T].set(params["btag"])
    wrel = jnp.zeros((128, RP), bf).at[:, :R].set(params["wrel"].astype(bf))
    brel = jnp.zeros((1, RP), jnp.float32).at[:, :R].set(params["brel"])

    # batch block: target M = bb*Sp >= 512 (multiple of 128 by construction),
    # but cap bb so nblk >= 2 whenever B > 1 (both v7x TensorCores get work on
    # the "parallel" batch-block axis).
    bb_cap = B if B == 1 else max(1, B // 2)
    bb_target = max(1, pl.cdiv(512, Sp))
    bb = 1
    for cand in range(min(bb_cap, bb_target), 0, -1):
        if B % cand == 0:
            bb = cand
            break
    nblk = B // bb

    kernel = functools.partial(transformer_kernel, num_heads=H, scale=scale)

    def xspec(tail):                       # per-batch-block activation
        n = len(tail)
        return pl.BlockSpec((bb,) + tail, lambda i, l, _n=n: (i,) + (0,) * _n)

    def wspec(tail):                       # per-layer streamed weight block
        n = len(tail)
        return pl.BlockSpec((1,) + tail, lambda i, l, _n=n: (l,) + (0,) * _n)

    def cspec(shape):                      # layer-invariant (head) weights
        n = len(shape)
        return pl.BlockSpec(shape, lambda i, l, _n=n: (0,) * _n)

    in_specs = [
        xspec((Sp, D)),                    # x (bf16 activations)
        xspec((1, Sp)),                    # key-padding bias
        xspec((Sp, 1)),                    # non-pad mask (column form)
        wspec((D, 3 * D)), wspec((1, 3 * D)),   # fused qkv
        wspec((D, D)), wspec((1, D)),           # out_proj
        wspec((1, D)), wspec((1, D)),           # layernorm1
        wspec((D, F)), wspec((1, F)),           # ffn linear1
        wspec((F, D)), wspec((1, D)),           # ffn linear2
        wspec((1, D)), wspec((1, D)),           # layernorm2
        cspec((D, 128)), cspec((1, 128)),       # self.linear
        cspec((128, TP)), cspec((1, TP)),       # tag_linear (padded)
        cspec((128, RP)), cspec((1, RP)),       # rel_linear (padded)
    ]
    out_specs = [
        pl.BlockSpec((bb, Sp, TP), lambda i, l: (i, 0, 0)),
        pl.BlockSpec((bb, 1, RP), lambda i, l: (i, 0, 0)),
    ]
    out_shape = (jax.ShapeDtypeStruct((B, Sp, TP), jnp.float32),
                 jax.ShapeDtypeStruct((B, 1, RP), jnp.float32))

    tag_pad, rel_pad = pl.pallas_call(
        kernel,
        out_shape=out_shape,
        grid_spec=pltpu.PrefetchScalarGridSpec(
            num_scalar_prefetch=0,
            grid=(nblk, L),                # layer axis innermost ("arbitrary")
            in_specs=in_specs,
            out_specs=out_specs,
            scratch_shapes=[pltpu.VMEM((bb * Sp, D), jnp.float32)]),
        compiler_params=pltpu.CompilerParams(
            dimension_semantics=("parallel", "arbitrary"),
            # headroom for 2x-buffered per-layer weights + the activation block;
            # can be raised toward ~100 MiB on v5e/v6e for a larger bb.
            vmem_limit_bytes=64 * 1024 * 1024),
    )(x, kbias, mcol,
      wqkv, bqkv, wo, bo, ln1w, ln1b,
      w1, b1, w2, b2, ln2w, ln2b,
      wlin, blin, wtag, btag, wrel, brel)

    return tag_pad[:, :S, :T], rel_pad[:, 0, :R]


# ----------------------------------------------------------------------------
# Deterministic parameter init (synthetic, not a checkpoint)
# ----------------------------------------------------------------------------
def make_pe(max_len, d_model):
    position = jnp.arange(max_len, dtype=jnp.float32)[:, None]
    div_term = jnp.exp(jnp.arange(0, d_model, 2, dtype=jnp.float32)
                       * (-math.log(10000.0) / d_model))
    pe = jnp.zeros((max_len, 1, d_model), jnp.float32)
    pe = pe.at[:, 0, 0::2].set(jnp.sin(position * div_term))
    pe = pe.at[:, 0, 1::2].set(jnp.cos(position * div_term))
    return pe


def init_params(key, cfg):
    V, D = cfg["vocab_size"], cfg["d_model"]
    L, F = cfg["num_layers"], cfg["ff_hid_dim"]
    T, R = cfg["num_tags"], cfg["num_rels"]
    keys = iter(jax.random.split(key, 32))

    def dense(shape, fan_in):
        w = jax.random.normal(next(keys), shape, jnp.float32) / math.sqrt(fan_in)
        # keep matmul weights exactly bf16-representable so the bf16 kernel and
        # the f32 reference see identical weight values
        return w.astype(jnp.bfloat16).astype(jnp.float32)

    def bias(shape):
        return 0.01 * jax.random.normal(next(keys), shape, jnp.float32)

    return dict(
        embedding=jax.random.normal(next(keys), (V, D), jnp.float32) / math.sqrt(D),
        pe=make_pe(cfg["max_len"], D),
        wq=dense((L, D, D), D), bq=bias((L, D)),
        wk=dense((L, D, D), D), bk=bias((L, D)),
        wv=dense((L, D, D), D), bv=bias((L, D)),
        wo=dense((L, D, D), D), bo=bias((L, D)),
        ln1w=jnp.ones((L, D), jnp.float32), ln1b=jnp.zeros((L, D), jnp.float32),
        w1=dense((L, D, F), D), b1=bias((L, F)),
        w2=dense((L, F, D), F), b2=bias((L, D)),
        ln2w=jnp.ones((L, D), jnp.float32), ln2b=jnp.zeros((L, D), jnp.float32),
        wlin=dense((D, 128), D), blin=bias((1, 128)),
        wtag=dense((128, T), 128), btag=bias((1, T)),
        wrel=dense((128, R), 128), brel=bias((1, R)),
    )


# ----------------------------------------------------------------------------
# Pure-JAX f32 reference (mirrors the PyTorch forward) for a sanity check
# ----------------------------------------------------------------------------
def ref_forward(src, params, cfg):
    B, S = src.shape
    D, L, H = cfg["d_model"], cfg["num_layers"], cfg["num_heads"]
    Dh = D // H

    def ln(v, w, b):
        mu = v.mean(-1, keepdims=True)
        var = ((v - mu) ** 2).mean(-1, keepdims=True)
        return (v - mu) / jnp.sqrt(var + 1e-5) * w + b

    x = params["embedding"][src] * math.sqrt(D) + params["pe"][:B]
    nonpad = (src != cfg["pad_id"]).astype(jnp.float32)               # [B, S]
    key_bias = jnp.where(nonpad[:, None, None, :] > 0, 0.0, -1e30)    # [B,1,1,S]

    for l in range(L):
        q = x @ params["wq"][l] + params["bq"][l]
        k = x @ params["wk"][l] + params["bk"][l]
        v = x @ params["wv"][l] + params["bv"][l]
        qh = q.reshape(B, S, H, Dh).transpose(0, 2, 1, 3)
        kh = k.reshape(B, S, H, Dh).transpose(0, 2, 1, 3)
        vh = v.reshape(B, S, H, Dh).transpose(0, 2, 1, 3)
        scores = (qh @ kh.transpose(0, 1, 3, 2)) / math.sqrt(Dh) + key_bias
        p = jax.nn.softmax(scores, axis=-1)
        oh = (p @ vh).transpose(0, 2, 1, 3).reshape(B, S, D)
        attn = oh @ params["wo"][l] + params["bo"][l]
        x = ln(x + attn, params["ln1w"][l], params["ln1b"][l])
        ff = jnp.maximum(x @ params["w1"][l] + params["b1"][l], 0.0) @ params["w2"][l] \
            + params["b2"][l]
        x = ln(x + ff, params["ln2w"][l], params["ln2b"][l])

    s128 = x @ params["wlin"] + params["blin"]
    tag = s128 @ params["wtag"] + params["btag"]
    denom = jnp.maximum(nonpad.sum(1, keepdims=True), 1.0)
    rel_avg = (s128 * nonpad[:, :, None]).sum(1) / denom
    rel = jax.nn.sigmoid(rel_avg @ params["wrel"] + params["brel"])
    return tag, rel


# ----------------------------------------------------------------------------
if __name__ == "__main__":
    cfg = dict(vocab_size=16, num_tags=8, num_rels=4, d_model=32, num_heads=4,
               ff_hid_dim=64, num_layers=2, pad_id=0, max_len=64)
    B, S = 2, 8

    key = jax.random.PRNGKey(0)
    k_tok, k_par = jax.random.split(key)
    src = jax.random.randint(k_tok, (B, S), 1, cfg["vocab_size"], dtype=jnp.int32)
    src = src.at[1, 6:].set(cfg["pad_id"])    # introduce some <pad> tokens

    params = init_params(k_par, cfg)

    tag_logits, rel_logits = run_pallas(src, params, cfg)
    jax.block_until_ready((tag_logits, rel_logits))

    tag_ref, rel_ref = ref_forward(src, params, cfg)
    assert tag_logits.shape == (B, S, cfg["num_tags"])
    assert rel_logits.shape == (B, cfg["num_rels"])
    # bf16 matmul/activation path vs f32 reference -> relaxed tolerance
    assert jnp.allclose(tag_logits, tag_ref, atol=5e-2, rtol=5e-2), \
        float(jnp.max(jnp.abs(tag_logits - tag_ref)))
    assert jnp.allclose(rel_logits, rel_ref, atol=5e-2, rtol=5e-2), \
        float(jnp.max(jnp.abs(rel_logits - rel_ref)))

    print("KERNEL_OK")
</pallas_src>

<mosaic_0001>
module attributes {stable_mosaic.version = 11 : i64} {
  func.func @transformer_kernel(%arg0: i32, %arg1: i32, %arg2: memref<1x128x32xbf16, #tpu.memory_space<vmem>>, %arg3: memref<1x1x128xf32, #tpu.memory_space<vmem>>, %arg4: memref<1x128x1xf32, #tpu.memory_space<vmem>>, %arg5: memref<1x32x96xbf16, #tpu.memory_space<vmem>>, %arg6: memref<1x1x96xf32, #tpu.memory_space<vmem>>, %arg7: memref<1x32x32xbf16, #tpu.memory_space<vmem>>, %arg8: memref<1x1x32xf32, #tpu.memory_space<vmem>>, %arg9: memref<1x1x32xf32, #tpu.memory_space<vmem>>, %arg10: memref<1x1x32xf32, #tpu.memory_space<vmem>>, %arg11: memref<1x32x64xbf16, #tpu.memory_space<vmem>>, %arg12: memref<1x1x64xf32, #tpu.memory_space<vmem>>, %arg13: memref<1x64x32xbf16, #tpu.memory_space<vmem>>, %arg14: memref<1x1x32xf32, #tpu.memory_space<vmem>>, %arg15: memref<1x1x32xf32, #tpu.memory_space<vmem>>, %arg16: memref<1x1x32xf32, #tpu.memory_space<vmem>>, %arg17: memref<32x128xbf16, #tpu.memory_space<vmem>>, %arg18: memref<1x128xf32, #tpu.memory_space<vmem>>, %arg19: memref<128x128xbf16, #tpu.memory_space<vmem>>, %arg20: memref<1x128xf32, #tpu.memory_space<vmem>>, %arg21: memref<128x128xbf16, #tpu.memory_space<vmem>>, %arg22: memref<1x128xf32, #tpu.memory_space<vmem>>, %arg23: memref<1x128x128xf32, #tpu.memory_space<vmem>>, %arg24: memref<1x1x128xf32, #tpu.memory_space<vmem>>, %arg25: memref<128x32xf32, #tpu.memory_space<vmem>>) attributes {dimension_semantics = [#tpu.dimension_semantics<parallel>, #tpu.dimension_semantics<arbitrary>], iteration_bounds = array<i64: 2, 2>, scalar_prefetch = 0 : i64, scratch_operands = 1 : i64, tpu.core_type = #tpu.core_type<tc>, window_params = [{transform_indices = @transform_0, window_bounds = array<i64: 1, 128, 32>}, {transform_indices = @transform_1, window_bounds = array<i64: 1, 1, 128>}, {transform_indices = @transform_2, window_bounds = array<i64: 1, 128, 1>}, {transform_indices = @transform_3, window_bounds = array<i64: 1, 32, 96>}, {transform_indices = @transform_4, window_bounds = array<i64: 1, 1, 96>}, {transform_indices = @transform_5, window_bounds = array<i64: 1, 32, 32>}, {transform_indices = @transform_6, window_bounds = array<i64: 1, 1, 32>}, {transform_indices = @transform_7, window_bounds = array<i64: 1, 1, 32>}, {transform_indices = @transform_8, window_bounds = array<i64: 1, 1, 32>}, {transform_indices = @transform_9, window_bounds = array<i64: 1, 32, 64>}, {transform_indices = @transform_10, window_bounds = array<i64: 1, 1, 64>}, {transform_indices = @transform_11, window_bounds = array<i64: 1, 64, 32>}, {transform_indices = @transform_12, window_bounds = array<i64: 1, 1, 32>}, {transform_indices = @transform_13, window_bounds = array<i64: 1, 1, 32>}, {transform_indices = @transform_14, window_bounds = array<i64: 1, 1, 32>}, {pipeline_mode = #tpu.pipeline_mode<synchronous>, transform_indices = @transform_15, window_bounds = array<i64: 32, 128>}, {pipeline_mode = #tpu.pipeline_mode<synchronous>, transform_indices = @transform_16, window_bounds = array<i64: 1, 128>}, {pipeline_mode = #tpu.pipeline_mode<synchronous>, transform_indices = @transform_17, window_bounds = array<i64: 128, 128>}, {pipeline_mode = #tpu.pipeline_mode<synchronous>, transform_indices = @transform_18, window_bounds = array<i64: 1, 128>}, {pipeline_mode = #tpu.pipeline_mode<synchronous>, transform_indices = @transform_19, window_bounds = array<i64: 128, 128>}, {pipeline_mode = #tpu.pipeline_mode<synchronous>, transform_indices = @transform_20, window_bounds = array<i64: 1, 128>}, {transform_indices = @transform_21, window_bounds = array<i64: 1, 128, 128>}, {transform_indices = @transform_22, window_bounds = array<i64: 1, 1, 128>}]} {
    %c0_i32 = arith.constant 0 : i32
    %0 = arith.cmpi eq, %arg1, %c0_i32 : i32
    %1 = arith.extui %0 : i1 to i32
    %c0_i32_0 = arith.constant 0 : i32
    %2 = arith.cmpi ne, %1, %c0_i32_0 : i32
    scf.if %2 {
      %c0_75 = arith.constant 0 : index
      %c0_76 = arith.constant 0 : index
      %c0_77 = arith.constant 0 : index
      %182 = vector.load %arg2[%c0_75, %c0_76, %c0_77] : memref<1x128x32xbf16, #tpu.memory_space<vmem>>, vector<1x128x32xbf16>
      %183 = arith.extf %182 : vector<1x128x32xbf16> to vector<1x128x32xf32>
      %184 = vector.shape_cast %183 : vector<1x128x32xf32> to vector<128x32xf32>
      %c0_78 = arith.constant 0 : index
      %c0_79 = arith.constant 0 : index
      %185 = vector.load %arg25[%c0_78, %c0_79] : memref<128x32xf32, #tpu.memory_space<vmem>>, vector<128x32xf32>
      tpu.vector_store %arg25[%c0_78, %c0_79], %184 {strides = array<i32>} : memref<128x32xf32, #tpu.memory_space<vmem>>, vector<128x32xf32>,
    } else {
    }
    %c0 = arith.constant 0 : index
    %c0_1 = arith.constant 0 : index
    %3 = vector.load %arg25[%c0, %c0_1] : memref<128x32xf32, #tpu.memory_space<vmem>>, vector<128x32xf32>
    %c0_2 = arith.constant 0 : index
    %c0_3 = arith.constant 0 : index
    %c0_4 = arith.constant 0 : index
    %4 = vector.load %arg3[%c0_2, %c0_3, %c0_4] : memref<1x1x128xf32, #tpu.memory_space<vmem>>, vector<1x1x128xf32>
    %5 = arith.truncf %3 : vector<128x32xf32> to vector<128x32xbf16>
    %c0_5 = arith.constant 0 : index
    %c0_6 = arith.constant 0 : index
    %c0_7 = arith.constant 0 : index
    %6 = vector.load %arg5[%c0_5, %c0_6, %c0_7] : memref<1x32x96xbf16, #tpu.memory_space<vmem>>, vector<1x32x96xbf16>
    %7 = vector.shape_cast %6 : vector<1x32x96xbf16> to vector<32x96xbf16>
    %cst = arith.constant dense<0.000000e+00> : vector<128x96xf32>
    %8 = tpu.matmul %5, %7, %cst {dimension_numbers = #tpu.dot_dimension_numbers<[1], [0], [0], [1], [0, 0, 1, 1], [], []>} : vector<128x32xbf16>, vector<32x96xbf16>, vector<128x96xf32> -> vector<128x96xf32>
    %c0_8 = arith.constant 0 : index
    %c0_9 = arith.constant 0 : index
    %c0_10 = arith.constant 0 : index
    %9 = vector.load %arg6[%c0_8, %c0_9, %c0_10] : memref<1x1x96xf32, #tpu.memory_space<vmem>>, vector<1x1x96xf32>
    %10 = vector.shape_cast %9 : vector<1x1x96xf32> to vector<1x96xf32>
    %11 = vector.broadcast %10 : vector<1x96xf32> to vector<128x96xf32>
    %12 = arith.addf %8, %11 : vector<128x96xf32>
    %13 = vector.extract_strided_slice %12 {offsets = [0, 0], sizes = [128, 32], strides = [1, 1]} : vector<128x96xf32> to vector<128x32xf32>
    %cst_11 = arith.constant 0.353553385 : f32
    %14 = vector.broadcast %cst_11 : f32 to vector<128x32xf32>
    %15 = arith.mulf %13, %14 : vector<128x32xf32>
    %16 = vector.shape_cast %15 : vector<128x32xf32> to vector<1x128x32xf32>
    %17 = arith.truncf %16 : vector<1x128x32xf32> to vector<1x128x32xbf16>
    %18 = vector.extract_strided_slice %12 {offsets = [0, 32], sizes = [128, 32], strides = [1, 1]} : vector<128x96xf32> to vector<128x32xf32>
    %19 = vector.shape_cast %18 : vector<128x32xf32> to vector<1x128x32xf32>
    %20 = arith.truncf %19 : vector<1x128x32xf32> to vector<1x128x32xbf16>
    %21 = vector.extract_strided_slice %12 {offsets = [0, 64], sizes = [128, 32], strides = [1, 1]} : vector<128x96xf32> to vector<128x32xf32>
    %22 = vector.shape_cast %21 : vector<128x32xf32> to vector<1x128x32xf32>
    %23 = arith.truncf %22 : vector<1x128x32xf32> to vector<1x128x32xbf16>
    %24 = vector.extract_strided_slice %17 {offsets = [0, 0, 0], sizes = [1, 128, 8], strides = [1, 1, 1]} : vector<1x128x32xbf16> to vector<1x128x8xbf16>
    %25 = vector.extract_strided_slice %20 {offsets = [0, 0, 0], sizes = [1, 128, 8], strides = [1, 1, 1]} : vector<1x128x32xbf16> to vector<1x128x8xbf16>
    "tpu.trace_start"() <{level = 10 : i32, message = "bqd,bkd->bqk"}> : () -> ()
    %cst_12 = arith.constant dense<0.000000e+00> : vector<1x128x128xf32>
    %26 = tpu.matmul %24, %25, %cst_12 {dimension_numbers = #tpu.dot_dimension_numbers<[2], [2], [1], [1], [0, 0, 0, 1, 1, 1], [0], [0]>} : vector<1x128x8xbf16>, vector<1x128x8xbf16>, vector<1x128x128xf32> -> vector<1x128x128xf32>
    "tpu.trace_stop"() : () -> ()
    %27 = vector.broadcast %4 : vector<1x1x128xf32> to vector<1x128x128xf32>
    %28 = arith.addf %26, %27 : vector<1x128x128xf32>
    %cst_13 = arith.constant dense<0xFF800000> : vector<1x128xf32>
    %29 = vector.multi_reduction <maximumf>, %28, %cst_13 [2] : vector<1x128x128xf32> to vector<1x128xf32>
    %30 = vector.shape_cast %29 : vector<1x128xf32> to vector<1x128x1xf32>
    %31 = vector.broadcast %30 : vector<1x128x1xf32> to vector<1x128x128xf32>
    %32 = arith.subf %28, %31 : vector<1x128x128xf32>
    %33 = math.exp %32 : vector<1x128x128xf32>
    %cst_14 = arith.constant dense<0.000000e+00> : vector<1x128xf32>
    %34 = vector.multi_reduction <add>, %33, %cst_14 [2] : vector<1x128x128xf32> to vector<1x128xf32>
    %35 = vector.shape_cast %34 : vector<1x128xf32> to vector<1x128x1xf32>
    %36 = tpu.reciprocal %35 {approx = true} : vector<1x128x1xf32> -> vector<1x128x1xf32>
    %37 = vector.broadcast %36 : vector<1x128x1xf32> to vector<1x128x128xf32>
    %38 = arith.mulf %33, %37 : vector<1x128x128xf32>
    %39 = arith.truncf %38 : vector<1x128x128xf32> to vector<1x128x128xbf16>
    %40 = vector.extract_strided_slice %23 {offsets = [0, 0, 0], sizes = [1, 128, 8], strides = [1, 1, 1]} : vector<1x128x32xbf16> to vector<1x128x8xbf16>
    "tpu.trace_start"() <{level = 10 : i32, message = "bqk,bkd->bqd"}> : () -> ()
    %cst_15 = arith.constant dense<0.000000e+00> : vector<1x128x8xf32>
    %41 = tpu.matmul %39, %40, %cst_15 {dimension_numbers = #tpu.dot_dimension_numbers<[2], [1], [1], [2], [0, 0, 0, 1, 1, 2], [0], [0]>} : vector<1x128x128xbf16>, vector<1x128x8xbf16>, vector<1x128x8xf32> -> vector<1x128x8xf32>
    "tpu.trace_stop"() : () -> ()
    %42 = vector.extract_strided_slice %17 {offsets = [0, 0, 8], sizes = [1, 128, 8], strides = [1, 1, 1]} : vector<1x128x32xbf16> to vector<1x128x8xbf16>
    %43 = vector.extract_strided_slice %20 {offsets = [0, 0, 8], sizes = [1, 128, 8], strides = [1, 1, 1]} : vector<1x128x32xbf16> to vector<1x128x8xbf16>
    "tpu.trace_start"() <{level = 10 : i32, message = "bqd,bkd->bqk"}> : () -> ()
    %cst_16 = arith.constant dense<0.000000e+00> : vector<1x128x128xf32>
    %44 = tpu.matmul %42, %43, %cst_16 {dimension_numbers = #tpu.dot_dimension_numbers<[2], [2], [1], [1], [0, 0, 0, 1, 1, 1], [0], [0]>} : vector<1x128x8xbf16>, vector<1x128x8xbf16>, vector<1x128x128xf32> -> vector<1x128x128xf32>
    "tpu.trace_stop"() : () -> ()
    %45 = vector.broadcast %4 : vector<1x1x128xf32> to vector<1x128x128xf32>
    %46 = arith.addf %44, %45 : vector<1x128x128xf32>
    %cst_17 = arith.constant dense<0xFF800000> : vector<1x128xf32>
    %47 = vector.multi_reduction <maximumf>, %46, %cst_17 [2] : vector<1x128x128xf32> to vector<1x128xf32>
    %48 = vector.shape_cast %47 : vector<1x128xf32> to vector<1x128x1xf32>
    %49 = vector.broadcast %48 : vector<1x128x1xf32> to vector<1x128x128xf32>
    %50 = arith.subf %46, %49 : vector<1x128x128xf32>
    %51 = math.exp %50 : vector<1x128x128xf32>
    %cst_18 = arith.constant dense<0.000000e+00> : vector<1x128xf32>
    %52 = vector.multi_reduction <add>, %51, %cst_18 [2] : vector<1x128x128xf32> to vector<1x128xf32>
    %53 = vector.shape_cast %52 : vector<1x128xf32> to vector<1x128x1xf32>
    %54 = tpu.reciprocal %53 {approx = true} : vector<1x128x1xf32> -> vector<1x128x1xf32>
    %55 = vector.broadcast %54 : vector<1x128x1xf32> to vector<1x128x128xf32>
    %56 = arith.mulf %51, %55 : vector<1x128x128xf32>
    %57 = arith.truncf %56 : vector<1x128x128xf32> to vector<1x128x128xbf16>
    %58 = vector.extract_strided_slice %23 {offsets = [0, 0, 8], sizes = [1, 128, 8], strides = [1, 1, 1]} : vector<1x128x32xbf16> to vector<1x128x8xbf16>
    "tpu.trace_start"() <{level = 10 : i32, message = "bqk,bkd->bqd"}> : () -> ()
    %cst_19 = arith.constant dense<0.000000e+00> : vector<1x128x8xf32>
    %59 = tpu.matmul %57, %58, %cst_19 {dimension_numbers = #tpu.dot_dimension_numbers<[2], [1], [1], [2], [0, 0, 0, 1, 1, 2], [0], [0]>} : vector<1x128x128xbf16>, vector<1x128x8xbf16>, vector<1x128x8xf32> -> vector<1x128x8xf32>
    "tpu.trace_stop"() : () -> ()
    %60 = vector.extract_strided_slice %17 {offsets = [0, 0, 16], sizes = [1, 128, 8], strides = [1, 1, 1]} : vector<1x128x32xbf16> to vector<1x128x8xbf16>
    %61 = vector.extract_strided_slice %20 {offsets = [0, 0, 16], sizes = [1, 128, 8], strides = [1, 1, 1]} : vector<1x128x32xbf16> to vector<1x128x8xbf16>
    "tpu.trace_start"() <{level = 10 : i32, message = "bqd,bkd->bqk"}> : () -> ()
    %cst_20 = arith.constant dense<0.000000e+00> : vector<1x128x128xf32>
    %62 = tpu.matmul %60, %61, %cst_20 {dimension_numbers = #tpu.dot_dimension_numbers<[2], [2], [1], [1], [0, 0, 0, 1, 1, 1], [0], [0]>} : vector<1x128x8xbf16>, vector<1x128x8xbf16>, vector<1x128x128xf32> -> vector<1x128x128xf32>
    "tpu.trace_stop"() : () -> ()
    %63 = vector.broadcast %4 : vector<1x1x128xf32> to vector<1x128x128xf32>
    %64 = arith.addf %62, %63 : vector<1x128x128xf32>
    %cst_21 = arith.constant dense<0xFF800000> : vector<1x128xf32>
    %65 = vector.multi_reduction <maximumf>, %64, %cst_21 [2] : vector<1x128x128xf32> to vector<1x128xf32>
    %66 = vector.shape_cast %65 : vector<1x128xf32> to vector<1x128x1xf32>
    %67 = vector.broadcast %66 : vector<1x128x1xf32> to vector<1x128x128xf32>
    %68 = arith.subf %64, %67 : vector<1x128x128xf32>
    %69 = math.exp %68 : vector<1x128x128xf32>
    %cst_22 = arith.constant dense<0.000000e+00> : vector<1x128xf32>
    %70 = vector.multi_reduction <add>, %69, %cst_22 [2] : vector<1x128x128xf32> to vector<1x128xf32>
    %71 = vector.shape_cast %70 : vector<1x128xf32> to vector<1x128x1xf32>
    %72 = tpu.reciprocal %71 {approx = true} : vector<1x128x1xf32> -> vector<1x128x1xf32>
    %73 = vector.broadcast %72 : vector<1x128x1xf32> to vector<1x128x128xf32>
    %74 = arith.mulf %69, %73 : vector<1x128x128xf32>
    %75 = arith.truncf %74 : vector<1x128x128xf32> to vector<1x128x128xbf16>
    %76 = vector.extract_strided_slice %23 {offsets = [0, 0, 16], sizes = [1, 128, 8], strides = [1, 1, 1]} : vector<1x128x32xbf16> to vector<1x128x8xbf16>
    "tpu.trace_start"() <{level = 10 : i32, message = "bqk,bkd->bqd"}> : () -> ()
    %cst_23 = arith.constant dense<0.000000e+00> : vector<1x128x8xf32>
    %77 = tpu.matmul %75, %76, %cst_23 {dimension_numbers = #tpu.dot_dimension_numbers<[2], [1], [1], [2], [0, 0, 0, 1, 1, 2], [0], [0]>} : vector<1x128x128xbf16>, vector<1x128x8xbf16>, vector<1x128x8xf32> -> vector<1x128x8xf32>
    "tpu.trace_stop"() : () -> ()
    %78 = vector.extract_strided_slice %17 {offsets = [0, 0, 24], sizes = [1, 128, 8], strides = [1, 1, 1]} : vector<1x128x32xbf16> to vector<1x128x8xbf16>
    %79 = vector.extract_strided_slice %20 {offsets = [0, 0, 24], sizes = [1, 128, 8], strides = [1, 1, 1]} : vector<1x128x32xbf16> to vector<1x128x8xbf16>
    "tpu.trace_start"() <{level = 10 : i32, message = "bqd,bkd->bqk"}> : () -> ()
    %cst_24 = arith.constant dense<0.000000e+00> : vector<1x128x128xf32>
    %80 = tpu.matmul %78, %79, %cst_24 {dimension_numbers = #tpu.dot_dimension_numbers<[2], [2], [1], [1], [0, 0, 0, 1, 1, 1], [0], [0]>} : vector<1x128x8xbf16>, vector<1x128x8xbf16>, vector<1x128x128xf32> -> vector<1x128x128xf32>
    "tpu.trace_stop"() : () -> ()
    %81 = vector.broadcast %4 : vector<1x1x128xf32> to vector<1x128x128xf32>
    %82 = arith.addf %80, %81 : vector<1x128x128xf32>
    %cst_25 = arith.constant dense<0xFF800000> : vector<1x128xf32>
    %83 = vector.multi_reduction <maximumf>, %82, %cst_25 [2] : vector<1x128x128xf32> to vector<1x128xf32>
    %84 = vector.shape_cast %83 : vector<1x128xf32> to vector<1x128x1xf32>
    %85 = vector.broadcast %84 : vector<1x128x1xf32> to vector<1x128x128xf32>
    %86 = arith.subf %82, %85 : vector<1x128x128xf32>
    %87 = math.exp %86 : vector<1x128x128xf32>
    %cst_26 = arith.constant dense<0.000000e+00> : vector<1x128xf32>
    %88 = vector.multi_reduction <add>, %87, %cst_26 [2] : vector<1x128x128xf32> to vector<1x128xf32>
    %89 = vector.shape_cast %88 : vector<1x128xf32> to vector<1x128x1xf32>
    %90 = tpu.reciprocal %89 {approx = true} : vector<1x128x1xf32> -> vector<1x128x1xf32>
    %91 = vector.broadcast %90 : vector<1x128x1xf32> to vector<1x128x128xf32>
    %92 = arith.mulf %87, %91 : vector<1x128x128xf32>
    %93 = arith.truncf %92 : vector<1x128x128xf32> to vector<1x128x128xbf16>
    %94 = vector.extract_strided_slice %23 {offsets = [0, 0, 24], sizes = [1, 128, 8], strides = [1, 1, 1]} : vector<1x128x32xbf16> to vector<1x128x8xbf16>
    "tpu.trace_start"() <{level = 10 : i32, message = "bqk,bkd->bqd"}> : () -> ()
    %cst_27 = arith.constant dense<0.000000e+00> : vector<1x128x8xf32>
    %95 = tpu.matmul %93, %94, %cst_27 {dimension_numbers = #tpu.dot_dimension_numbers<[2], [1], [1], [2], [0, 0, 0, 1, 1, 2], [0], [0]>} : vector<1x128x128xbf16>, vector<1x128x8xbf16>, vector<1x128x8xf32> -> vector<1x128x8xf32>
    "tpu.trace_stop"() : () -> ()
    %96 = tpu.concatenate %41, %59, %77, %95 in 2 : vector<1x128x8xf32>, vector<1x128x8xf32>, vector<1x128x8xf32>, vector<1x128x8xf32> -> vector<1x128x32xf32>
    %97 = vector.shape_cast %96 : vector<1x128x32xf32> to vector<128x32xf32>
    %98 = arith.truncf %97 : vector<128x32xf32> to vector<128x32xbf16>
    %c0_28 = arith.constant 0 : index
    %c0_29 = arith.constant 0 : index
    %c0_30 = arith.constant 0 : index
    %99 = vector.load %arg7[%c0_28, %c0_29, %c0_30] : memref<1x32x32xbf16, #tpu.memory_space<vmem>>, vector<1x32x32xbf16>
    %100 = vector.shape_cast %99 : vector<1x32x32xbf16> to vector<32x32xbf16>
    %cst_31 = arith.constant dense<0.000000e+00> : vector<128x32xf32>
    %101 = tpu.matmul %98, %100, %cst_31 {dimension_numbers = #tpu.dot_dimension_numbers<[1], [0], [0], [1], [0, 0, 1, 1], [], []>} : vector<128x32xbf16>, vector<32x32xbf16>, vector<128x32xf32> -> vector<128x32xf32>
    %c0_32 = arith.constant 0 : index
    %c0_33 = arith.constant 0 : index
    %c0_34 = arith.constant 0 : index
    %102 = vector.load %arg8[%c0_32, %c0_33, %c0_34] : memref<1x1x32xf32, #tpu.memory_space<vmem>>, vector<1x1x32xf32>
    %103 = vector.shape_cast %102 : vector<1x1x32xf32> to vector<1x32xf32>
    %104 = vector.broadcast %103 : vector<1x32xf32> to vector<128x32xf32>
    %105 = arith.addf %101, %104 : vector<128x32xf32>
    %106 = arith.addf %3, %105 : vector<128x32xf32>
    %c0_35 = arith.constant 0 : index
    %c0_36 = arith.constant 0 : index
    %c0_37 = arith.constant 0 : index
    %107 = vector.load %arg9[%c0_35, %c0_36, %c0_37] : memref<1x1x32xf32, #tpu.memory_space<vmem>>, vector<1x1x32xf32>
    %108 = vector.shape_cast %107 : vector<1x1x32xf32> to vector<1x32xf32>
    %c0_38 = arith.constant 0 : index
    %c0_39 = arith.constant 0 : index
    %c0_40 = arith.constant 0 : index
    %109 = vector.load %arg10[%c0_38, %c0_39, %c0_40] : memref<1x1x32xf32, #tpu.memory_space<vmem>>, vector<1x1x32xf32>
    %110 = vector.shape_cast %109 : vector<1x1x32xf32> to vector<1x32xf32>
    %cst_41 = arith.constant dense<0.000000e+00> : vector<128xf32>
    %111 = vector.multi_reduction <add>, %106, %cst_41 [1] : vector<128x32xf32> to vector<128xf32>
    %112 = vector.shape_cast %111 : vector<128xf32> to vector<128x1xf32>
    %cst_42 = arith.constant 3.200000e+01 : f32
    %113 = vector.broadcast %cst_42 : f32 to vector<128x1xf32>
    %114 = arith.divf %112, %113 : vector<128x1xf32>
    %115 = vector.broadcast %114 : vector<128x1xf32> to vector<128x32xf32>
    %116 = arith.subf %106, %115 : vector<128x32xf32>
    %117 = arith.mulf %116, %116 : vector<128x32xf32>
    %cst_43 = arith.constant dense<0.000000e+00> : vector<128xf32>
    %118 = vector.multi_reduction <add>, %117, %cst_43 [1] : vector<128x32xf32> to vector<128xf32>
    %119 = vector.shape_cast %118 : vector<128xf32> to vector<128x1xf32>
    %cst_44 = arith.constant 3.200000e+01 : f32
    %120 = vector.broadcast %cst_44 : f32 to vector<128x1xf32>
    %121 = arith.divf %119, %120 : vector<128x1xf32>
    %122 = vector.broadcast %114 : vector<128x1xf32> to vector<128x32xf32>
    %123 = arith.subf %106, %122 : vector<128x32xf32>
    %cst_45 = arith.constant 9.99999974E-6 : f32
    %124 = vector.broadcast %cst_45 : f32 to vector<128x1xf32>
    %125 = arith.addf %121, %124 : vector<128x1xf32>
    %126 = math.rsqrt %125 : vector<128x1xf32>
    %127 = vector.broadcast %126 : vector<128x1xf32> to vector<128x32xf32>
    %128 = arith.mulf %123, %127 : vector<128x32xf32>
    %129 = vector.broadcast %108 : vector<1x32xf32> to vector<128x32xf32>
    %130 = arith.mulf %128, %129 : vector<128x32xf32>
    %131 = vector.broadcast %110 : vector<1x32xf32> to vector<128x32xf32>
    %132 = arith.addf %130, %131 : vector<128x32xf32>
    %133 = arith.truncf %132 : vector<128x32xf32> to vector<128x32xbf16>
    %c0_46 = arith.constant 0 : index
    %c0_47 = arith.constant 0 : index
    %c0_48 = arith.constant 0 : index
    %134 = vector.load %arg11[%c0_46, %c0_47, %c0_48] : memref<1x32x64xbf16, #tpu.memory_space<vmem>>, vector<1x32x64xbf16>
    %135 = vector.shape_cast %134 : vector<1x32x64xbf16> to vector<32x64xbf16>
    %cst_49 = arith.constant dense<0.000000e+00> : vector<128x64xf32>
    %136 = tpu.matmul %133, %135, %cst_49 {dimension_numbers = #tpu.dot_dimension_numbers<[1], [0], [0], [1], [0, 0, 1, 1], [], []>} : vector<128x32xbf16>, vector<32x64xbf16>, vector<128x64xf32> -> vector<128x64xf32>
    %c0_50 = arith.constant 0 : index
    %c0_51 = arith.constant 0 : index
    %c0_52 = arith.constant 0 : index
    %137 = vector.load %arg12[%c0_50, %c0_51, %c0_52] : memref<1x1x64xf32, #tpu.memory_space<vmem>>, vector<1x1x64xf32>
    %138 = vector.shape_cast %137 : vector<1x1x64xf32> to vector<1x64xf32>
    %139 = vector.broadcast %138 : vector<1x64xf32> to vector<128x64xf32>
    %140 = arith.addf %136, %139 : vector<128x64xf32>
    %cst_53 = arith.constant 0.000000e+00 : f32
    %141 = vector.broadcast %cst_53 : f32 to vector<128x64xf32>
    %142 = arith.maximumf %140, %141 : vector<128x64xf32>
    %143 = arith.truncf %142 : vector<128x64xf32> to vector<128x64xbf16>
    %c0_54 = arith.constant 0 : index
    %c0_55 = arith.constant 0 : index
    %c0_56 = arith.constant 0 : index
    %144 = vector.load %arg13[%c0_54, %c0_55, %c0_56] : memref<1x64x32xbf16, #tpu.memory_space<vmem>>, vector<1x64x32xbf16>
    %145 = vector.shape_cast %144 : vector<1x64x32xbf16> to vector<64x32xbf16>
    %cst_57 = arith.constant dense<0.000000e+00> : vector<128x32xf32>
    %146 = tpu.matmul %143, %145, %cst_57 {dimension_numbers = #tpu.dot_dimension_numbers<[1], [0], [0], [1], [0, 0, 1, 1], [], []>} : vector<128x64xbf16>, vector<64x32xbf16>, vector<128x32xf32> -> vector<128x32xf32>
    %c0_58 = arith.constant 0 : index
    %c0_59 = arith.constant 0 : index
    %c0_60 = arith.constant 0 : index
    %147 = vector.load %arg14[%c0_58, %c0_59, %c0_60] : memref<1x1x32xf32, #tpu.memory_space<vmem>>, vector<1x1x32xf32>
    %148 = vector.shape_cast %147 : vector<1x1x32xf32> to vector<1x32xf32>
    %149 = vector.broadcast %148 : vector<1x32xf32> to vector<128x32xf32>
    %150 = arith.addf %146, %149 : vector<128x32xf32>
    %151 = arith.addf %132, %150 : vector<128x32xf32>
    %c0_61 = arith.constant 0 : index
    %c0_62 = arith.constant 0 : index
    %c0_63 = arith.constant 0 : index
    %152 = vector.load %arg15[%c0_61, %c0_62, %c0_63] : memref<1x1x32xf32, #tpu.memory_space<vmem>>, vector<1x1x32xf32>
    %153 = vector.shape_cast %152 : vector<1x1x32xf32> to vector<1x32xf32>
    %c0_64 = arith.constant 0 : index
    %c0_65 = arith.constant 0 : index
    %c0_66 = arith.constant 0 : index
    %154 = vector.load %arg16[%c0_64, %c0_65, %c0_66] : memref<1x1x32xf32, #tpu.memory_space<vmem>>, vector<1x1x32xf32>
    %155 = vector.shape_cast %154 : vector<1x1x32xf32> to vector<1x32xf32>
    %cst_67 = arith.constant dense<0.000000e+00> : vector<128xf32>
    %156 = vector.multi_reduction <add>, %151, %cst_67 [1] : vector<128x32xf32> to vector<128xf32>
    %157 = vector.shape_cast %156 : vector<128xf32> to vector<128x1xf32>
    %cst_68 = arith.constant 3.200000e+01 : f32
    %158 = vector.broadcast %cst_68 : f32 to vector<128x1xf32>
    %159 = arith.divf %157, %158 : vector<128x1xf32>
    %160 = vector.broadcast %159 : vector<128x1xf32> to vector<128x32xf32>
    %161 = arith.subf %151, %160 : vector<128x32xf32>
    %162 = arith.mulf %161, %161 : vector<128x32xf32>
    %cst_69 = arith.constant dense<0.000000e+00> : vector<128xf32>
    %163 = vector.multi_reduction <add>, %162, %cst_69 [1] : vector<128x32xf32> to vector<128xf32>
    %164 = vector.shape_cast %163 : vector<128xf32> to vector<128x1xf32>
    %cst_70 = arith.constant 3.200000e+01 : f32
    %165 = vector.broadcast %cst_70 : f32 to vector<128x1xf32>
    %166 = arith.divf %164, %165 : vector<128x1xf32>
    %167 = vector.broadcast %159 : vector<128x1xf32> to vector<128x32xf32>
    %168 = arith.subf %151, %167 : vector<128x32xf32>
    %cst_71 = arith.constant 9.99999974E-6 : f32
    %169 = vector.broadcast %cst_71 : f32 to vector<128x1xf32>
    %170 = arith.addf %166, %169 : vector<128x1xf32>
    %171 = math.rsqrt %170 : vector<128x1xf32>
    %172 = vector.broadcast %171 : vector<128x1xf32> to vector<128x32xf32>
    %173 = arith.mulf %168, %172 : vector<128x32xf32>
    %174 = vector.broadcast %153 : vector<1x32xf32> to vector<128x32xf32>
    %175 = arith.mulf %173, %174 : vector<128x32xf32>
    %176 = vector.broadcast %155 : vector<1x32xf32> to vector<128x32xf32>
    %177 = arith.addf %175, %176 : vector<128x32xf32>
    %c0_72 = arith.constant 0 : index
    %c0_73 = arith.constant 0 : index
    %178 = vector.load %arg25[%c0_72, %c0_73] : memref<128x32xf32, #tpu.memory_space<vmem>>, vector<128x32xf32>
    tpu.vector_store %arg25[%c0_72, %c0_73], %177 {strides = array<i32>} : memref<128x32xf32, #tpu.memory_space<vmem>>, vector<128x32xf32>,
    %c1_i32 = arith.constant 1 : i32
    %179 = arith.cmpi eq, %arg1, %c1_i32 : i32
    %180 = arith.extui %179 : i1 to i32
    %c0_i32_74 = arith.constant 0 : i32
    %181 = arith.cmpi ne, %180, %c0_i32_74 : i32
    scf.if %181 {
      %182 = arith.truncf %177 : vector<128x32xf32> to vector<128x32xbf16>
      %c0_75 = arith.constant 0 : index
      %c0_76 = arith.constant 0 : index
      %183 = vector.load %arg17[%c0_75, %c0_76] : memref<32x128xbf16, #tpu.memory_space<vmem>>, vector<32x128xbf16>
      %cst_77 = arith.constant dense<0.000000e+00> : vector<128x128xf32>
      %184 = tpu.matmul %182, %183, %cst_77 {dimension_numbers = #tpu.dot_dimension_numbers<[1], [0], [0], [1], [0, 0, 1, 1], [], []>} : vector<128x32xbf16>, vector<32x128xbf16>, vector<128x128xf32> -> vector<128x128xf32>
      %c0_78 = arith.constant 0 : index
      %c0_79 = arith.constant 0 : index
      %185 = vector.load %arg18[%c0_78, %c0_79] : memref<1x128xf32, #tpu.memory_space<vmem>>, vector<1x128xf32>
      %186 = vector.broadcast %185 : vector<1x128xf32> to vector<128x128xf32>
      %187 = arith.addf %184, %186 : vector<128x128xf32>
      %188 = arith.truncf %187 : vector<128x128xf32> to vector<128x128xbf16>
      %c0_80 = arith.constant 0 : index
      %c0_81 = arith.constant 0 : index
      %189 = vector.load %arg19[%c0_80, %c0_81] : memref<128x128xbf16, #tpu.memory_space<vmem>>, vector<128x128xbf16>
      %cst_82 = arith.constant dense<0.000000e+00> : vector<128x128xf32>
      %190 = tpu.matmul %188, %189, %cst_82 {dimension_numbers = #tpu.dot_dimension_numbers<[1], [0], [0], [1], [0, 0, 1, 1], [], []>} : vector<128x128xbf16>, vector<128x128xbf16>, vector<128x128xf32> -> vector<128x128xf32>
      %c0_83 = arith.constant 0 : index
      %c0_84 = arith.constant 0 : index
      %191 = vector.load %arg20[%c0_83, %c0_84] : memref<1x128xf32, #tpu.memory_space<vmem>>, vector<1x128xf32>
      %192 = vector.broadcast %191 : vector<1x128xf32> to vector<128x128xf32>
      %193 = arith.addf %190, %192 : vector<128x128xf32>
      %194 = vector.shape_cast %193 : vector<128x128xf32> to vector<1x128x128xf32>
      %c0_85 = arith.constant 0 : index
      %c0_86 = arith.constant 0 : index
      %c0_87 = arith.constant 0 : index
      %195 = vector.load %arg23[%c0_85, %c0_86, %c0_87] : memref<1x128x128xf32, #tpu.memory_space<vmem>>, vector<1x128x128xf32>
      tpu.vector_store %arg23[%c0_85, %c0_86, %c0_87], %194 {strides = array<i32>} : memref<1x128x128xf32, #tpu.memory_space<vmem>>, vector<1x128x128xf32>,
      %c0_88 = arith.constant 0 : index
      %c0_89 = arith.constant 0 : index
      %c0_90 = arith.constant 0 : index
      %196 = vector.load %arg4[%c0_88, %c0_89, %c0_90] : memref<1x128x1xf32, #tpu.memory_space<vmem>>, vector<1x128x1xf32>
      %cst_91 = arith.constant dense<0.000000e+00> : vector<1x1xf32>
      %197 = vector.multi_reduction <add>, %196, %cst_91 [1] : vector<1x128x1xf32> to vector<1x1xf32>
      %cst_92 = arith.constant 1.000000e+00 : f32
      %198 = vector.broadcast %cst_92 : f32 to vector<1x1xf32>
      %199 = arith.maximumf %197, %198 : vector<1x1xf32>
      %200 = vector.shape_cast %187 : vector<128x128xf32> to vector<1x128x128xf32>
      %201 = vector.broadcast %196 : vector<1x128x1xf32> to vector<1x128x128xf32>
      %202 = arith.mulf %200, %201 : vector<1x128x128xf32>
      %cst_93 = arith.constant dense<0.000000e+00> : vector<1x128xf32>
      %203 = vector.multi_reduction <add>, %202, %cst_93 [1] : vector<1x128x128xf32> to vector<1x128xf32>
      %204 = vector.broadcast %199 : vector<1x1xf32> to vector<1x128xf32>
      %205 = arith.divf %203, %204 : vector<1x128xf32>
      %206 = arith.truncf %205 : vector<1x128xf32> to vector<1x128xbf16>
      %c0_94 = arith.constant 0 : index
      %c0_95 = arith.constant 0 : index
      %207 = vector.load %arg21[%c0_94, %c0_95] : memref<128x128xbf16, #tpu.memory_space<vmem>>, vector<128x128xbf16>
      %cst_96 = arith.constant dense<0.000000e+00> : vector<1x128xf32>
      %208 = tpu.matmul %206, %207, %cst_96 {dimension_numbers = #tpu.dot_dimension_numbers<[1], [0], [0], [1], [0, 0, 1, 1], [], []>} : vector<1x128xbf16>, vector<128x128xbf16>, vector<1x128xf32> -> vector<1x128xf32>
      %c0_97 = arith.constant 0 : index
      %c0_98 = arith.constant 0 : index
      %209 = vector.load %arg22[%c0_97, %c0_98] : memref<1x128xf32, #tpu.memory_space<vmem>>, vector<1x128xf32>
      %210 = arith.addf %208, %209 : vector<1x128xf32>
      %211 = arith.negf %210 : vector<1x128xf32>
      %212 = math.exp %211 : vector<1x128xf32>
      %cst_99 = arith.constant 1.000000e+00 : f32
      %213 = vector.broadcast %cst_99 : f32 to vector<1x128xf32>
      %214 = arith.addf %213, %212 : vector<1x128xf32>
      %215 = arith.divf %213, %214 : vector<1x128xf32>
      %c0_100 = arith.constant 0 : index
      %c0_101 = arith.constant 0 : index
      %c0_102 = arith.constant 0 : index
      %216 = vector.load %arg24[%c0_100, %c0_101, %c0_102] : memref<1x1x128xf32, #tpu.memory_space<vmem>>, vector<1x1x128xf32>
      %217 = vector.shape_cast %216 : vector<1x1x128xf32> to vector<1x128xf32>
      %218 = vector.shape_cast %215 : vector<1x128xf32> to vector<1x1x128xf32>
      tpu.vector_store %arg24[%c0_100, %c0_101, %c0_102], %218 {strides = array<i32>} : memref<1x1x128xf32, #tpu.memory_space<vmem>>, vector<1x1x128xf32>,
    } else {
    }
    return
  }
  func.func @transform_0(%arg0: i32, %arg1: i32) -> (i32, i32, i32) {
    %c0_i32 = arith.constant 0 : i32
    %c0_i32_0 = arith.constant 0 : i32
    %c0_i32_1 = arith.constant 0 : i32
    return %arg0, %c0_i32, %c0_i32_0 : i32, i32, i32
  }
  func.func @transform_1(%arg0: i32, %arg1: i32) -> (i32, i32, i32) {
    %c0_i32 = arith.constant 0 : i32
    %c0_i32_0 = arith.constant 0 : i32
    %c0_i32_1 = arith.constant 0 : i32
    return %arg0, %c0_i32, %c0_i32_0 : i32, i32, i32
  }
  func.func @transform_2(%arg0: i32, %arg1: i32) -> (i32, i32, i32) {
    %c0_i32 = arith.constant 0 : i32
    %c0_i32_0 = arith.constant 0 : i32
    %c0_i32_1 = arith.constant 0 : i32
    return %arg0, %c0_i32, %c0_i32_0 : i32, i32, i32
  }
  func.func @transform_3(%arg0: i32, %arg1: i32) -> (i32, i32, i32) {
    %c0_i32 = arith.constant 0 : i32
    %c0_i32_0 = arith.constant 0 : i32
    %c0_i32_1 = arith.constant 0 : i32
    return %arg1, %c0_i32, %c0_i32_0 : i32, i32, i32
  }
  func.func @transform_4(%arg0: i32, %arg1: i32) -> (i32, i32, i32) {
    %c0_i32 = arith.constant 0 : i32
    %c0_i32_0 = arith.constant 0 : i32
    %c0_i32_1 = arith.constant 0 : i32
    return %arg1, %c0_i32, %c0_i32_0 : i32, i32, i32
  }
  func.func @transform_5(%arg0: i32, %arg1: i32) -> (i32, i32, i32) {
    %c0_i32 = arith.constant 0 : i32
    %c0_i32_0 = arith.constant 0 : i32
    %c0_i32_1 = arith.constant 0 : i32
    return %arg1, %c0_i32, %c0_i32_0 : i32, i32, i32
  }
  func.func @transform_6(%arg0: i32, %arg1: i32) -> (i32, i32, i32) {
    %c0_i32 = arith.constant 0 : i32
    %c0_i32_0 = arith.constant 0 : i32
    %c0_i32_1 = arith.constant 0 : i32
    return %arg1, %c0_i32, %c0_i32_0 : i32, i32, i32
  }
  func.func @transform_7(%arg0: i32, %arg1: i32) -> (i32, i32, i32) {
    %c0_i32 = arith.constant 0 : i32
    %c0_i32_0 = arith.constant 0 : i32
    %c0_i32_1 = arith.constant 0 : i32
    return %arg1, %c0_i32, %c0_i32_0 : i32, i32, i32
  }
  func.func @transform_8(%arg0: i32, %arg1: i32) -> (i32, i32, i32) {
    %c0_i32 = arith.constant 0 : i32
    %c0_i32_0 = arith.constant 0 : i32
    %c0_i32_1 = arith.constant 0 : i32
    return %arg1, %c0_i32, %c0_i32_0 : i32, i32, i32
  }
  func.func @transform_9(%arg0: i32, %arg1: i32) -> (i32, i32, i32) {
    %c0_i32 = arith.constant 0 : i32
    %c0_i32_0 = arith.constant 0 : i32
    %c0_i32_1 = arith.constant 0 : i32
    return %arg1, %c0_i32, %c0_i32_0 : i32, i32, i32
  }
  func.func @transform_10(%arg0: i32, %arg1: i32) -> (i32, i32, i32) {
    %c0_i32 = arith.constant 0 : i32
    %c0_i32_0 = arith.constant 0 : i32
    %c0_i32_1 = arith.constant 0 : i32
    return %arg1, %c0_i32, %c0_i32_0 : i32, i32, i32
  }
  func.func @transform_11(%arg0: i32, %arg1: i32) -> (i32, i32, i32) {
    %c0_i32 = arith.constant 0 : i32
    %c0_i32_0 = arith.constant 0 : i32
    %c0_i32_1 = arith.constant 0 : i32
    return %arg1, %c0_i32, %c0_i32_0 : i32, i32, i32
  }
  func.func @transform_12(%arg0: i32, %arg1: i32) -> (i32, i32, i32) {
    %c0_i32 = arith.constant 0 : i32
    %c0_i32_0 = arith.constant 0 : i32
    %c0_i32_1 = arith.constant 0 : i32
    return %arg1, %c0_i32, %c0_i32_0 : i32, i32, i32
  }
  func.func @transform_13(%arg0: i32, %arg1: i32) -> (i32, i32, i32) {
    %c0_i32 = arith.constant 0 : i32
    %c0_i32_0 = arith.constant 0 : i32
    %c0_i32_1 = arith.constant 0 : i32
    return %arg1, %c0_i32, %c0_i32_0 : i32, i32, i32
  }
  func.func @transform_14(%arg0: i32, %arg1: i32) -> (i32, i32, i32) {
    %c0_i32 = arith.constant 0 : i32
    %c0_i32_0 = arith.constant 0 : i32
    %c0_i32_1 = arith.constant 0 : i32
    return %arg1, %c0_i32, %c0_i32_0 : i32, i32, i32
  }
  func.func @transform_15(%arg0: i32, %arg1: i32) -> (i32, i32) {
    %c0_i32 = arith.constant 0 : i32
    %c0_i32_0 = arith.constant 0 : i32
    %c0_i32_1 = arith.constant 0 : i32
    return %c0_i32, %c0_i32_0 : i32, i32
  }
  func.func @transform_16(%arg0: i32, %arg1: i32) -> (i32, i32) {
    %c0_i32 = arith.constant 0 : i32
    %c0_i32_0 = arith.constant 0 : i32
    %c0_i32_1 = arith.constant 0 : i32
    return %c0_i32, %c0_i32_0 : i32, i32
  }
  func.func @transform_17(%arg0: i32, %arg1: i32) -> (i32, i32) {
    %c0_i32 = arith.constant 0 : i32
    %c0_i32_0 = arith.constant 0 : i32
    %c0_i32_1 = arith.constant 0 : i32
    return %c0_i32, %c0_i32_0 : i32, i32
  }
  func.func @transform_18(%arg0: i32, %arg1: i32) -> (i32, i32) {
    %c0_i32 = arith.constant 0 : i32
    %c0_i32_0 = arith.constant 0 : i32
    %c0_i32_1 = arith.constant 0 : i32
    return %c0_i32, %c0_i32_0 : i32, i32
  }
  func.func @transform_19(%arg0: i32, %arg1: i32) -> (i32, i32) {
    %c0_i32 = arith.constant 0 : i32
    %c0_i32_0 = arith.constant 0 : i32
    %c0_i32_1 = arith.constant 0 : i32
    return %c0_i32, %c0_i32_0 : i32, i32
  }
  func.func @transform_20(%arg0: i32, %arg1: i32) -> (i32, i32) {
    %c0_i32 = arith.constant 0 : i32
    %c0_i32_0 = arith.constant 0 : i32
    %c0_i32_1 = arith.constant 0 : i32
    return %c0_i32, %c0_i32_0 : i32, i32
  }
  func.func @transform_21(%arg0: i32, %arg1: i32) -> (i32, i32, i32) {
    %c0_i32 = arith.constant 0 : i32
    %c0_i32_0 = arith.constant 0 : i32
    %c0_i32_1 = arith.constant 0 : i32
    return %arg0, %c0_i32, %c0_i32_0 : i32, i32, i32
  }
  func.func @transform_22(%arg0: i32, %arg1: i32) -> (i32, i32, i32) {
    %c0_i32 = arith.constant 0 : i32
    %c0_i32_0 = arith.constant 0 : i32
    %c0_i32_1 = arith.constant 0 : i32
    return %arg0, %c0_i32, %c0_i32_0 : i32, i32, i32
  }
}

</mosaic_0001>

<bundles_post_ra>
// kernel: tpu_custom_call.1
= control target key start
LH: loop header
LB: loop body
LE: loop exit
PB: predicated region body
PF: predicated region fallthrough
CT: control target
= control target key end

     0   :  { %s9053_s0 = inlined_call_operand.vmem [shape: bf16[2,128,32], index: 0, kind: input, shape index: {}]   ;;  %s9054_s1 = inlined_call_operand.vmem [shape: f32[2,1,128], index: 1, kind: input, shape index: {}]   ;;  %s9055_s2 = inlined_call_operand.vmem [shape: f32[2,128,1], index: 2, kind: input, shape index: {}]   ;;  %s9056_s3 = inlined_call_operand.vmem [shape: bf16[2,32,96], index: 3, kind: input, shape index: {}]   ;;  %s9057_s4 = inlined_call_operand.vmem [shape: f32[2,1,96], index: 4, kind: input, shape index: {}]   ;;  %s9058_s5 = inlined_call_operand.vmem [shape: bf16[2,32,32], index: 5, kind: input, shape index: {}]   ;;  %s9059_s6 = inlined_call_operand.vmem [shape: f32[2,1,32], index: 6, kind: input, shape index: {}]   ;;  %s9060_s7 = inlined_call_operand.vmem [shape: f32[2,1,32], index: 7, kind: input, shape index: {}]   ;;  %s9061_s8 = inlined_call_operand.vmem [shape: f32[2,1,32], index: 8, kind: input, shape index: {}]   ;;  %s9062_s9 = inlined_call_operand.vmem [shape: bf16[2,32,64], index: 9, kind: input, shape index: {}]   ;;  %s9063_s10 = inlined_call_operand.vmem [shape: f32[2,1,64], index: 10, kind: input, shape index: {}]   ;;  %s9064_s11 = inlined_call_operand.vmem [shape: bf16[2,64,32], index: 11, kind: input, shape index: {}]   ;;  %s9065_s12 = inlined_call_operand.vmem [shape: f32[2,1,32], index: 12, kind: input, shape index: {}]   ;;  %s9066_s13 = inlined_call_operand.vmem [shape: f32[2,1,32], index: 13, kind: input, shape index: {}]   ;;  %s9067_s14 = inlined_call_operand.vmem [shape: f32[2,1,32], index: 14, kind: input, shape index: {}]   ;;  %s9068_s15 = inlined_call_operand.vmem [shape: bf16[32,128], index: 15, kind: input, shape index: {}]   ;;  %s9069_s16 = inlined_call_operand.vmem [shape: f32[1,128], index: 16, kind: input, shape index: {}]   ;;  %s9070_s17 = inlined_call_operand.vmem [shape: bf16[128,128], index: 17, kind: input, shape index: {}]   ;;  %s9071_s18 = inlined_call_operand.vmem [shape: f32[1,128], index: 18, kind: input, shape index: {}]   ;;  %s9072_s19 = inlined_call_operand.vmem [shape: bf16[128,128], index: 19, kind: input, shape index: {}]   ;;  %s9073_s20 = inlined_call_operand.vmem [shape: f32[1,128], index: 20, kind: input, shape index: {}]   ;;  %s9074_s21 = inlined_call_operand.hbm [shape: f32[2,128,128], index: 21, kind: output, shape index: {0}]   ;;  %s9075_s22 = inlined_call_operand.hbm [shape: f32[2,1,128], index: 22, kind: output, shape index: {1}]  }
   0x1   :  { %9101 = sst [smem:[#allocation44_spill]] %s9053_s0 }
   0x2   :  { %9102 = sst [smem:[#allocation45_spill]] %s9054_s1 }
   0x3   :  { %9103 = sst [smem:[#allocation46_spill]] %s9055_s2 }
   0x4   :  { %9104 = sst [smem:[#allocation47_spill]] %s9056_s3 }
   0x5   :  { %9105 = sst [smem:[#allocation48_spill]] %s9057_s4 }
   0x6   :  { %9106 = sst [smem:[#allocation49_spill]] %s9058_s5 }
   0x7   :  { %9107 = sst [smem:[#allocation50_spill]] %s9059_s6 }
   0x8   :  { %9108 = sst [smem:[#allocation51_spill]] %s9060_s7 }
   0x9   :  { %9109 = sst [smem:[#allocation52_spill]] %s9068_s15 }
   0xa   :  { %9110 = sst [smem:[#allocation53_spill]] %s9069_s16 }
   0xb   :  { %9111 = sst [smem:[#allocation54_spill]] %s9070_s17 }
   0xc   :  { %9112 = sst [smem:[#allocation55_spill]] %s9071_s18 }
   0xd   :  { %9113 = sst [smem:[#allocation56_spill]] %s9072_s19 }
   0xe   :  { %9114 = sst [smem:[#allocation57_spill]] %s9073_s20 }
   0xf   :  { %9115 = sst [smem:[#allocation58_spill]] %s9074_s21 }
  0x10   :  { %9116 = sst [smem:[#allocation59_spill]] %s9075_s22 }
  0x11   :  { %28 = vsyncpa [#allocation4], 0 }
  0x12   :  { %30 = vsyncpa [#allocation4 + $0x1], 0 }
  0x13   :  { %31 = vsyncpa [#allocation6], 0 }
  0x14   :  { %33 = vsyncpa [#allocation6 + $0x1], 0  ;;  %s6889_s3 = smov 0   ;;  %s6891_s28 = smov 0  }
  0x15   :  { %s6893_s29 = smov 0   ;;  %s6895_s30 = smov 0  }
  0x16   :  { %s6897_s4 = smov 0   ;;  %s6899_s0 = smov 0  }
  0x17   :  { %s6901_s23 = smov 0   ;;  %s6903_s1 = smov 0  }
  0x18 LB: > { %9117 = sst [smem:[#allocation9_spill]] %s6724_s3  ;;  %s5194_s5 = sadd.s32 4294967295, %s6752_s1   ;;  %s6752_s1 = sphi %s6903_s1, %s39_s1   ;;  %s6748_s23 = sphi %s6901_s23, %s9229_s23   ;;  %s6744_s0 = sphi %s6899_s0, %s9228_s0   ;;  %s6740_s4 = sphi %s6897_s4, %s9227_s4   ;;  %s6736_s30 = sphi %s6895_s30, %s9226_s30   ;;  %s6732_s29 = sphi %s6893_s29, %s9225_s29   ;;  %s6728_s28 = sphi %s6891_s28, %s9224_s28   ;;  %s6724_s3 = sphi %s6889_s3, %s9223_s3  }
  0x19   : > { %9118 = sst [smem:[#allocation10_spill]] %s6728_s28  ;;  %s5195_s24 = sadd.s32 4294967294, %s6752_s1  }
  0x1a   : > { %9119 = sst [smem:[#allocation11_spill]] %s6732_s29  ;;  %s48_s6 = sadd.s32 1, %s6744_s0 }
  0x1b   : > { %9120 = sst [smem:[#allocation12_spill]] %s6736_s30  ;;  %p49_p0 = scmp.ge.s32.totalorder %s48_s6, 2 }
  0x1c   : > { %9121 = sst [smem:[#allocation13_spill]] %s6740_s4  ;;  %s51_s25 = sadd.s32 1, %s6748_s23 }
  0x1d   : > { %9122 = sst [smem:[#allocation14_spill]] %s6744_s0  ;;  %p584_p1 = scmp.ne.s32.totalorder %s6732_s29, %s6728_s28 }
  0x1e   : > { %9123 = sst [smem:[#allocation15_spill]] %s6748_s23  ;;  %p585_p2 = scmp.eq.s32.totalorder %s5194_s5, 3 }
  0x1f   : > { %9124 = sst [smem:[#allocation16_spill]] %s6752_s1  ;;  %s9231_s6 = smov (%p49_p0, %s48_s6), 0 }
  0x20   : > { %9125 = sst [smem:[#allocation17_spill]] %s9231_s6  ;;  %s9233_s25 = smov (!%p49_p0, %s51_s25), %s6748_s23 }
  0x21   : > { %p6938_p3 = por %p585_p2, %p584_p1  ;;  %p590_p4 = scmp.ne.s32.totalorder %s6728_s28, %s6724_s3 }
  0x22   : > { %p53_p5 = scmp.ge.s32.totalorder %s9233_s25, 2  ;;  %p591_p6 = scmp.eq.s32.totalorder %s5195_s24, 3 }
  0x23   : > { %s9126_s26 = scalar_select %p6938_p3, 1, 0 }
  0x24   : > { %p5198_p7 = scmp.ge.s32.totalorder %s6752_s1, 1  ;;  %p755_p8 = scmp.lt.s32.totalorder %s6752_s1, 5 }
  0x25   : > { %9127 = sst [smem:[#allocation18_spill]] %s9126_s26  ;;  %s9235_s25 = smov (%p53_p5, %s9233_s25), 0 }
  0x26   : > { %9128 = sst [smem:[#allocation19_spill]] %s9235_s25  ;;  %p6948_p9 = por %p591_p6, %p590_p4 }
  0x27   : > { %p756_p10 = pnand %p5198_p7, %p755_p8  ;;  %s571_s27 = ssub.s32 %s6748_s23, %s9235_s25 }
  0x28   : > { %s9129_s2 = scalar_select %p6948_p9, 1, 0 }
  0x29   : > { %s574_s5 = sadd.s32 1, %s6732_s29  ;;  %p572_p11 = scmp.eq.s32.totalorder %s571_s27, 0 }
  0x2a   : > { %9130 = sst [smem:[#allocation20_spill]] %s9129_s2  ;;  %759 = sbr.rel (%p756_p10) target bundleno = 5148 (0x141c), region = 104 }
  0x2b   : > { %s6956_s6 = scalar_select %p572_p11, %s6732_s29, %s574_s5  }
  0x2d   : > { %9131 = sst [smem:[#allocation21_spill]] %s6956_s6 }
  0x2f   : > { %s6959_s24 = sand.u32 1, %s6728_s28   ;;  %p873_p12 = scmp.lt.s32.totalorder %s6740_s4, 1 }
  0x30   : > { %s5199_s0 = sshll.u32 %s6959_s24, 7  ;;  %p886_p13 = scmp.lt.s32.totalorder %s6736_s30, 1 }
  0x31   : > { %s874_s3 = scalar_select %p873_p12, %s6740_s4, 1 }
  0x32   : > { %s6966_s2 = scalar_select %p886_p13, %s6736_s30, 1 }
  0x33   : > { %s5332_s27 = sshll.u32 %s874_s3, 6  ;;  %s9132_s23 = sld [smem:[#allocation45_spill]] }
  0x34   : > { %s9134_s1 = sld [smem:[#allocation44_spill]]  ;;  %s5333_s21 = sshll.u32 %s874_s3, 7 }
  0x35   : > { %s9136_s20 = sld [smem:[#allocation46_spill]]  ;;  %s5334_s16 = sshll.u32 %s6966_s2, 4 }
  0x36   : > { %s9138_s25 = sld [smem:[#allocation47_spill]]  ;;  %s7013_s5 = scalar_lea.vmem %s9062_s9, %s5334_s16 }
  0x37   : > { %s9140_s28 = sld [smem:[#allocation48_spill]] }
  0x39   : > { %s6971_s6 = scalar_lea.vmem %s9132_s23, %s874_s3 }
  0x3a   : > { %9133 = sst [smem:[#allocation22_spill]] %s6971_s6  ;;  %s6976_s22 = scalar_lea.vmem %s9134_s1, %s5332_s27 }
  0x3b   : > { %9135 = sst [smem:[#allocation23_spill]] %s6976_s22  ;;  %s6981_s18 = scalar_lea.vmem %s9136_s20, %s5333_s21 }
  0x3c   : > { %9137 = sst [smem:[#allocation24_spill]] %s6981_s18  ;;  %s6987_s23 = scalar_lea.vmem %s9138_s25, %s5334_s16 }
  0x3d   : > { %9139 = sst [smem:[#allocation25_spill]] %s6987_s23  ;;  %s893_s29 = scalar_lea.vmem %s9140_s28, %s6966_s2 }
  0x3e   : > { %s9141_s6 = sld [smem:[#allocation49_spill]]  ;;  %s5337_s27 = sshll.u32 %s6966_s2, 5 }
  0x3f   : > { %s9142_s20 = sld [smem:[#allocation50_spill]]  ;;  %s7027_s30 = scalar_lea.vmem %s9064_s11, %s5337_s27 }
  0x40   : > { %s926_s23 = scalar_lea.vmem %s9066_s13, %s6966_s2  ;;  %s929_s25 = scalar_lea.vmem %s9067_s14, %s6966_s2 }
  0x41   : > { %s7037_s28 = scalar_lea.vmem [#allocation3], %s5199_s0  ;;  %s9144_s1 = sld [smem:[#allocation12_spill]] }
  0x44   : > { %s6996_s3 = scalar_lea.vmem %s9141_s6, %s5334_s16  ;;  %s872_s6 = scalar_lea.vmem [#allocation5], %s6959_s24 }
  0x45   : > { %s901_s21 = scalar_lea.vmem %s9142_s20, %s6966_s2  ;;  %s923_s20 = scalar_lea.vmem %s9065_s12, %s6966_s2 }
  0x47   : > { %p5212_p0 = scmp.ne.s32.totalorder %s9144_s1, 0 }
  0x48   : > { %s9145_s22 = sld [smem:[#allocation23_spill]] (!%p5212_p0) }
  0x49   : > { %934 = sbr.rel (%p5212_p0) target bundleno = 89 (0x59), region = 108 }
  0x4e   : > { %v5340_v0 = vld [vmem:[%s9145_s22] sm:$0xff]   ;;  %vm967_vm0 = vcmask 261120   ;;  %v5371_v1 = vld [vmem:[%s9145_s22 + $0x8] sm:$0xff]   ;;  %v5372_v2 = vld [vmem:[%s9145_s22 + $0x10] sm:$0xff]  }
  0x4f   : > { %v5341_v3 = vunpack.c.l.bf16 %v5340_v0  ;;  %v5342_v4 = vunpack.c.h.bf16 %v5340_v0  ;;  %v5345_v5 = vunpack.c.l.bf16 %v5371_v1  ;;  %v5346_v6 = vunpack.c.h.bf16 %v5371_v1  ;;  %v5373_v7 = vld [vmem:[%s9145_s22 + $0x18] sm:$0xff]   ;;  %v5374_v8 = vld [vmem:[%s9145_s22 + $0x20] sm:$0xff]   ;;  %v5375_v9 = vld [vmem:[%s9145_s22 + $0x28] sm:$0xff]  }
  0x50   : > { %v5349_v10 = vunpack.c.l.bf16 %v5372_v2  ;;  %v5350_v11 = vunpack.c.h.bf16 %v5372_v2  ;;  %v5353_v12 = vunpack.c.l.bf16 %v5373_v7  ;;  %v5354_v13 = vunpack.c.h.bf16 %v5373_v7  ;;  %v5376_v14 = vld [vmem:[%s9145_s22 + $0x30] sm:$0xff]   ;;  %v5377_v15 = vld [vmem:[%s9145_s22 + $0x38] sm:$0xff]  }
  0x51   : > { %968 = vst.msk [vmem:[#allocation2] sm:$0xff] %vm967_vm0, %v5341_v3  ;;  %969 = vst.msk [vmem:[#allocation2 + $0x8] sm:$0xff] %vm967_vm0, %v5342_v4  ;;  %v5357_v16 = vunpack.c.l.bf16 %v5374_v8  ;;  %v5358_v17 = vunpack.c.h.bf16 %v5374_v8  ;;  %v5361_v18 = vunpack.c.l.bf16 %v5375_v9  ;;  %v5362_v19 = vunpack.c.h.bf16 %v5375_v9 }
  0x52   : > { %970 = vst.msk [vmem:[#allocation2 + $0x10] sm:$0xff] %vm967_vm0, %v5345_v5  ;;  %971 = vst.msk [vmem:[#allocation2 + $0x18] sm:$0xff] %vm967_vm0, %v5346_v6  ;;  %v5365_v20 = vunpack.c.l.bf16 %v5376_v14  ;;  %v5366_v21 = vunpack.c.h.bf16 %v5376_v14  ;;  %v5369_v22 = vunpack.c.l.bf16 %v5377_v15  ;;  %v5370_v23 = vunpack.c.h.bf16 %v5377_v15 }
  0x53   : > { %972 = vst.msk [vmem:[#allocation2 + $0x20] sm:$0xff] %vm967_vm0, %v5349_v10  ;;  %973 = vst.msk [vmem:[#allocation2 + $0x28] sm:$0xff] %vm967_vm0, %v5350_v11 }
  0x54   : > { %974 = vst.msk [vmem:[#allocation2 + $0x30] sm:$0xff] %vm967_vm0, %v5353_v12  ;;  %975 = vst.msk [vmem:[#allocation2 + $0x38] sm:$0xff] %vm967_vm0, %v5354_v13 }
  0x55   : > { %976 = vst.msk [vmem:[#allocation2 + $0x40] sm:$0xff] %vm967_vm0, %v5357_v16  ;;  %977 = vst.msk [vmem:[#allocation2 + $0x48] sm:$0xff] %vm967_vm0, %v5358_v17 }
  0x56   : > { %978 = vst.msk [vmem:[#allocation2 + $0x50] sm:$0xff] %vm967_vm0, %v5361_v18  ;;  %979 = vst.msk [vmem:[#allocation2 + $0x58] sm:$0xff] %vm967_vm0, %v5362_v19 }
  0x57   : > { %980 = vst.msk [vmem:[#allocation2 + $0x60] sm:$0xff] %vm967_vm0, %v5365_v20  ;;  %981 = vst.msk [vmem:[#allocation2 + $0x68] sm:$0xff] %vm967_vm0, %v5366_v21 }
  0x58   : > { %982 = vst.msk [vmem:[#allocation2 + $0x70] sm:$0xff] %vm967_vm0, %v5369_v22  ;;  %983 = vst.msk [vmem:[#allocation2 + $0x78] sm:$0xff] %vm967_vm0, %v5370_v23 }
  0x59 PF: > { %s9146_s0 = sld [smem:[#allocation25_spill]]  ;;  %v984_v26 = vld [vmem:[#allocation2] sm:$0xff]  ;;  %v985_v27 = vld [vmem:[#allocation2 + $0x8] sm:$0xff]  ;;  %vm1032_vm1 = vcmask 261120   ;;  %v986_v29 = vld [vmem:[#allocation2 + $0x10] sm:$0xff]  ;;  %vm1216_vm2 = vcmask 64512  }
  0x5a   : > { %v1001_v28 = vpack.c.bf16 %v985_v27, %v984_v26  ;;  %v987_v30 = vld [vmem:[#allocation2 + $0x18] sm:$0xff]  ;;  %v988_v31 = vld [vmem:[#allocation2 + $0x20] sm:$0xff]  ;;  %v989_v32 = vld [vmem:[#allocation2 + $0x28] sm:$0xff]  ;;  %s6755_s18 = smov 64   ;;  %s9148_s26 = sld [smem:[#allocation22_spill]]  ;;  %vm3201_vm3 = vcmask 130048  }
  0x5b   : > { %v1002_v33 = vpack.c.bf16 %v987_v30, %v986_v29  ;;  %v1003_v34 = vpack.c.bf16 %v989_v32, %v988_v31  ;;  %v990_v35 = vld [vmem:[#allocation2 + $0x30] sm:$0xff]  ;;  %v991_v36 = vld [vmem:[#allocation2 + $0x38] sm:$0xff]  ;;  %v5213_v51 = vld [vmem:[%s893_s29] ss:$0 sm:$0xff]  ;;  %s6754_s29 = smov 96   ;;  %s6756_s17 = smov 88  }
  0x5c   : > { %5587 = vmatprep.mubr.msk.bf16.mxu0 %vm1032_vm1, %v1001_v28  ;;  %v992_v37 = vld [vmem:[#allocation2 + $0x40] sm:$0xff]  ;;  %v993_v38 = vld [vmem:[#allocation2 + $0x48] sm:$0xff]  ;;  %v1004_v39 = vpack.c.bf16 %v991_v36, %v990_v35  ;;  %s6757_s19 = smov 120   ;;  %s6758_s16 = smov 56   ;;  %vm3218_vm4 = vcmask 195584   ;;  %vm3873_vm5 = vcmask 523264  }
  0x5d   : > { %v1005_v40 = vpack.c.bf16 %v993_v38, %v992_v37  ;;  %v994_v41 = vld [vmem:[#allocation2 + $0x50] sm:$0xff]  ;;  %v995_v42 = vld [vmem:[#allocation2 + $0x58] sm:$0xff]  ;;  %s6759_s15 = smov 80   ;;  %s6760_s22 = smov 112  }
  0x5e   : > { %v996_v43 = vld [vmem:[#allocation2 + $0x60] sm:$0xff]  ;;  %v997_v44 = vld [vmem:[#allocation2 + $0x68] sm:$0xff]  ;;  %v1006_v45 = vpack.c.bf16 %v995_v42, %v994_v41  ;;  %s6762_s1 = smov 72   ;;  %s6763_s27 = smov 104  }
  0x5f   : > { %v6257_v24 = vld [vmem:[%s9146_s0 + $0x8] sm:$0xff]   ;;  %v6258_v25 = vld [vmem:[%s9146_s0] sm:$0xff]   ;;  %v1007_v46 = vpack.c.bf16 %v997_v44, %v996_v43  ;;  %v998_v47 = vld [vmem:[#allocation2 + $0x70] sm:$0xff]  ;;  %s6761_s0 = smov 48   ;;  %s6764_s4 = smov 40  }
  0x60   : > { %5583 = vmatprep.subr.bf16.mxu0 %v6257_v24  ;;  %v999_v48 = vld [vmem:[#allocation2 + $0x78] sm:$0xff]  ;;  %s9202_s7 = sld [smem:[#allocation51_spill]] }
  0x61   : > { %5584 = vmatpush3.bf16.msra.mxu0 %v6257_v24  ;;  %v1008_v49 = vpack.c.bf16 %v999_v48, %v998_v47 }
  0x62   : > { %5585 = vmatprep.subr.bf16.mxu0 %v6258_v25 }
  0x65   : > { %5586 = vmatpush3.bf16.msra.mxu0 %v6258_v25 }
  0x68   : > { %5588 = vmatmul.mubr.msk.bf16.vlgmr.msra.gmra.mxu0 %vm1032_vm1, %v1002_v33 }
  0x69   : > { %5591 = vmatprep.mubr.msk.bf16.mxu0 %vm1032_vm1, %v1003_v34 }
  0x70   : > { %5592 = vmatmul.mubr.msk.bf16.gmra.mxu0 %vm1032_vm1, %v1004_v39 }
  0x71   : > { %5595 = vmatprep.mubr.msk.bf16.mxu0 %vm1032_vm1, %v1005_v40 }
  0x78   : > { %5596 = vmatmul.mubr.msk.bf16.gmra.mxu0 %vm1032_vm1, %v1006_v45 }
  0x79   : > { %5599 = vmatprep.mubr.msk.bf16.mxu0 %vm1032_vm1, %v1007_v46 }
  0x80   : > { %5600 = vmatmul.mubr.msk.bf16.gmra.mxu0 %vm1032_vm1, %v1008_v49 }
 0x128   : > { %v5589_v50 = vpop.f32.mrf.mxu0 }
 0x129   : > { %v7080_v53 = vadd.f32 %v5589_v50, %v5213_v51 }
 0x12a   : > { %v1091_v52 = vpop.f32.mrf.mxu0 }
 0x12b   : > { %v1092_v55 = vadd.f32 %v5213_v51, %v1091_v52  ;;  %v1156_v58 = vmul.f32 0.35355338, %v7080_v53 }
 0x12c   : > { %v5590_v54 = vpop.f32.mrf.mxu0 }
 0x12d   : > { %v7082_v56 = vadd.f32 %v5590_v54, %v5213_v51  ;;  %v1154_v62 = vmul.f32 0.35355338, %v1092_v55 }
 0x12e   : > { %v1094_v57 = vpop.f32.mrf.mxu0 }
 0x12f   : > { %v1157_v59 = vmul.f32 0.35355338, %v7082_v56  ;;  %v1095_v60 = vadd.f32 %v5213_v51, %v1094_v57  ;;  %v7135_v50 = vpack.c.bf16 %v7082_v56, %v7080_v53 }
 0x130   : > { %v5593_v61 = vpop.f32.mrf.mxu0 }
 0x131   : > { %v7086_v63 = vpack.c.bf16 %v1157_v59, %v1156_v58  ;;  %v1155_v0 = vmul.f32 0.35355338, %v1095_v60  ;;  %v1116_v3 = vadd.f32 %v5593_v61, %v5213_v51  ;;  %v7118_v46 = vpack.c.bf16 %v1095_v60, %v1092_v55 }
 0x132   : > { %v1107_v1 = vpop.f32.mrf.mxu0 }
 0x133   : > { %v7088_v2 = vpack.c.bf16 %v1155_v0, %v1154_v62  ;;  %v1108_v5 = vadd.f32 %v5213_v51, %v1107_v1  ;;  %v1160_v8 = vmul.f32 0.35355338, %v1116_v3 }
 0x134   : > { %v5594_v4 = vpop.f32.mrf.mxu0 }
 0x135   : > { %v1119_v6 = vadd.f32 %v5594_v4, %v5213_v51  ;;  %5619 = vmatprep.mubr.msk.bf16.mxu1 %vm1216_vm2, %v7088_v2  ;;  %v1158_v12 = vmul.f32 0.35355338, %v1108_v5 }
 0x136   : > { %v1110_v7 = vpop.f32.mrf.mxu0 }
 0x137   : > { %v1161_v9 = vmul.f32 0.35355338, %v1119_v6  ;;  %v1111_v10 = vadd.f32 %v5213_v51, %v1110_v7  ;;  %v7128_v49 = vpack.c.bf16 %v1119_v6, %v1116_v3 }
 0x138   : > { %v5597_v11 = vpop.f32.mrf.mxu0 }
 0x139   : > { %v7092_v13 = vpack.c.bf16 %v1161_v9, %v1160_v8  ;;  %v1159_v14 = vmul.f32 0.35355338, %v1111_v10  ;;  %v1132_v17 = vadd.f32 %v5597_v11, %v5213_v51  ;;  %v7108_v37 = vpack.c.bf16 %v1111_v10, %v1108_v5 }
 0x13a   : > { %v1123_v15 = vpop.f32.mrf.mxu0 }
 0x13b   : > { %v7094_v16 = vpack.c.bf16 %v1159_v14, %v1158_v12  ;;  %v1124_v19 = vadd.f32 %v5213_v51, %v1123_v15  ;;  %v1164_v22 = vmul.f32 0.35355338, %v1132_v17  ;;  %v7177_v14 = vld [vmem:[%s9148_s26] ss:$0 sm:$0xff] }
 0x13c   : > { %v5598_v18 = vpop.f32.mrf.mxu0 }
 0x13d   : > { %v1135_v20 = vadd.f32 %v5598_v18, %v5213_v51  ;;  %v1162_v27 = vmul.f32 0.35355338, %v1124_v19 }
 0x13e   : > { %v1126_v21 = vpop.f32.mrf.mxu0 }
 0x13f   : > { %v1165_v23 = vmul.f32 0.35355338, %v1135_v20  ;;  %v7096_v24 = vpack.c.bf16 %v1135_v20, %v1132_v17  ;;  %v1127_v25 = vadd.f32 %v5213_v51, %v1126_v21 }
 0x140   : > { %v5601_v26 = vpop.f32.mrf.mxu0 }
 0x141   : > { %v7098_v28 = vpack.c.bf16 %v1165_v23, %v1164_v22  ;;  %v1163_v29 = vmul.f32 0.35355338, %v1127_v25  ;;  %1210 = vrot.lane.b32.xlu1 %v7096_v24, %s6754_s29  ;;  %v7104_v32 = vpack.c.bf16 %v1127_v25, %v1124_v19  ;;  %v1148_v33 = vadd.f32 %v5601_v26, %v5213_v51 }
 0x142   : > { %v1139_v30 = vpop.f32.mrf.mxu0 }
 0x143   : > { %v7102_v31 = vpack.c.bf16 %v1163_v29, %v1162_v27  ;;  %v1140_v35 = vadd.f32 %v5213_v51, %v1139_v30  ;;  %v1168_v39 = vmul.f32 0.35355338, %v1148_v33 }
 0x144   : > { %v5602_v34 = vpop.f32.mrf.mxu0 }
 0x145   : > { %v1151_v36 = vadd.f32 %v5602_v34, %v5213_v51  ;;  %1208 = vrot.lane.b32.xlu1 %v7104_v32, %s6754_s29  ;;  %v1166_v43 = vmul.f32 0.35355338, %v1140_v35 }
 0x146   : > { %v1142_v38 = vpop.f32.mrf.mxu0 }
 0x147   : > { %v1169_v40 = vmul.f32 0.35355338, %v1151_v36  ;;  %v7110_v41 = vpack.c.bf16 %v1151_v36, %v1148_v33  ;;  %v1143_v42 = vadd.f32 %v5213_v51, %v1142_v38 }
 0x149   : > { %v7112_v44 = vpack.c.bf16 %v1169_v40, %v1168_v39  ;;  %v1167_v45 = vmul.f32 0.35355338, %v1143_v42  ;;  %1214 = vrot.lane.b32.xlu0 %v7110_v41, %s6754_s29  ;;  %1204 = vrot.lane.b32.xlu1 %v7108_v37, %s6754_s29  ;;  %v7122_v48 = vpack.c.bf16 %v1143_v42, %v1140_v35 }
 0x14b   : > { %v7120_v47 = vpack.c.bf16 %v1167_v45, %v1166_v43 }
 0x14d   : > { %1212 = vrot.lane.b32.xlu0 %v7122_v48, %s6754_s29  ;;  %1200 = vrot.lane.b32.xlu1 %v7118_v46, %s6754_s29 }
 0x151   : > { %1206 = vrot.lane.b32.xlu0 %v7128_v49, %s6754_s29  ;;  %1528 = vrot.lane.b32.xlu1 %v7110_v41, %s6755_s18 }
 0x155   : > { %1202 = vrot.lane.b32.xlu0 %v7135_v50, %s6754_s29  ;;  %1522 = vrot.lane.b32.xlu1 %v7104_v32, %s6755_s18  ;;  %s6765_s29 = smov 8  }
 0x159   : > { %1524 = vrot.lane.b32.xlu0 %v7096_v24, %s6755_s18  ;;  %1520 = vrot.lane.b32.xlu1 %v7128_v49, %s6755_s18 }
 0x15d   : > { %1518 = vrot.lane.b32.xlu1 %v7108_v37, %s6755_s18 }
 0x161   : > { %1516 = vrot.lane.b32.xlu1 %v7135_v50, %s6755_s18 }
 0x165   : > { %1514 = vrot.lane.b32.xlu1 %v7118_v46, %s6755_s18 }
 0x169   : > { %1526 = vrot.lane.b32.xlu1 %v7122_v48, %s6755_s18  ;;  %s6766_s18 = smov 16  }
 0x1b3   : > { %v1211_v51 = vpop.permute.xlu1 %1210 }
 0x1b4   : > { %v1257_v62 = vsel %vm1216_vm2, %v1211_v51, 0 }
 0x1b7   : > { %v1209_v52 = vpop.permute.xlu1 %1208 }
 0x1b8   : > { %v1254_v4 = vsel %vm1216_vm2, %v1209_v52, 0 }
 0x1bb   : > { %v1215_v53 = vpop.permute.xlu0 %1214  ;;  %v1205_v54 = vpop.permute.xlu1 %1204 }
 0x1bc   : > { %6011 = vmatprep.subr.msk.bf16.mxu1 %vm1216_vm2, %v1215_v53  ;;  %v1263_v55 = vsel %vm1216_vm2, %v1215_v53, 0  ;;  %v1248_v10 = vsel %vm1216_vm2, %v1205_v54, 0 }
 0x1bd   : > { %5604 = vmatpush3.bf16.xpose.msra.mxu1 %v1263_v55 }
 0x1bf   : > { %v1213_v56 = vpop.permute.xlu0 %1212  ;;  %v1201_v57 = vpop.permute.xlu1 %1200 }
 0x1c0   : > { %6012 = vmatprep.subr.msk.bf16.mxu1 %vm1216_vm2, %v1213_v56  ;;  %v1260_v59 = vsel %vm1216_vm2, %v1213_v56, 0  ;;  %v1242_v12 = vsel %vm1216_vm2, %v1201_v57, 0 }
 0x1c3   : > { %v1529_v58 = vpop.permute.xlu1 %1528  ;;  %v1207_v1 = vpop.permute.xlu0 %1206 }
 0x1c4   : > { %5635 = vmatprep.subr.bf16.mxu0 %v1529_v58  ;;  %v1251_v8 = vsel %vm1216_vm2, %v1207_v1, 0 }
 0x1c5   : > { %5606 = vmatpush3.bf16.xpose.msra.mxu1 %v1260_v59  ;;  %5636 = vmatpush3.bf16.msra.mxu0 %v1529_v58 }
 0x1c6   : > { %6013 = vmatprep.subr.msk.bf16.mxu1 %vm1216_vm2, %v1211_v51 }
 0x1c7   : > { %v1523_v60 = vpop.permute.xlu1 %1522  ;;  %v1203_v5 = vpop.permute.xlu0 %1202 }
 0x1c8   : > { %v1245_v11 = vsel %vm1216_vm2, %v1203_v5, 0 }
 0x1cb   : > { %v1521_v61 = vpop.permute.xlu1 %1520  ;;  %v1525_v9 = vpop.permute.xlu0 %1524 }
 0x1cd   : > { %5608 = vmatpush3.bf16.xpose.msra.mxu1 %v1257_v62 }
 0x1ce   : > { %6014 = vmatprep.subr.msk.bf16.mxu1 %vm1216_vm2, %v1209_v52 }
 0x1cf   : > { %v1519_v0 = vpop.permute.xlu1 %1518 }
 0x1d3   : > { %v1517_v3 = vpop.permute.xlu1 %1516 }
 0x1d5   : > { %5610 = vmatpush3.bf16.xpose.msra.mxu1 %v1254_v4 }
 0x1d6   : > { %6015 = vmatprep.subr.msk.bf16.mxu1 %vm1216_vm2, %v1207_v1 }
 0x1d7   : > { %v1515_v6 = vpop.permute.xlu1 %1514 }
 0x1db   : > { %v1527_v7 = vpop.permute.xlu1 %1526 }
 0x1dc   : > { %5637 = vmatprep.subr.bf16.mxu0 %v1527_v7 }
 0x1dd   : > { %5612 = vmatpush3.bf16.xpose.msra.mxu1 %v1251_v8  ;;  %5638 = vmatpush3.bf16.msra.mxu0 %v1527_v7 }
 0x1de   : > { %6016 = vmatprep.subr.msk.bf16.mxu1 %vm1216_vm2, %v1205_v54  ;;  %5639 = vmatprep.subr.bf16.mxu0 %v1525_v9 }
 0x1e1   : > { %5640 = vmatpush3.bf16.msra.mxu0 %v1525_v9 }
 0x1e2   : > { %5641 = vmatprep.subr.bf16.mxu0 %v1523_v60 }
 0x1e5   : > { %5614 = vmatpush3.bf16.xpose.msra.mxu1 %v1248_v10  ;;  %5642 = vmatpush3.bf16.msra.mxu0 %v1523_v60 }
 0x1e6   : > { %6017 = vmatprep.subr.msk.bf16.mxu1 %vm1216_vm2, %v1203_v5  ;;  %5643 = vmatprep.subr.bf16.mxu0 %v1521_v61 }
 0x1e9   : > { %5644 = vmatpush3.bf16.msra.mxu0 %v1521_v61 }
 0x1ea   : > { %5645 = vmatprep.subr.bf16.mxu0 %v1519_v0 }
 0x1ed   : > { %5616 = vmatpush3.bf16.xpose.msra.mxu1 %v1245_v11  ;;  %5646 = vmatpush3.bf16.msra.mxu0 %v1519_v0 }
 0x1ee   : > { %6018 = vmatprep.subr.msk.bf16.mxu1 %vm1216_vm2, %v1201_v57  ;;  %5647 = vmatprep.subr.bf16.mxu0 %v1517_v3 }
 0x1f1   : > { %5648 = vmatpush3.bf16.msra.mxu0 %v1517_v3 }
 0x1f2   : > { %5649 = vmatprep.subr.bf16.mxu0 %v1515_v6 }
 0x1f5   : > { %5618 = vmatpush3.bf16.xpose.msra.mxu1 %v1242_v12  ;;  %5650 = vmatpush3.bf16.msra.mxu0 %v1515_v6 }
 0x1fc   : > { %5620 = vmatmul.mubr.msk.bf16.vlgmr.msra.gmra.mxu1 %vm1216_vm2, %v7086_v63 }
 0x1fd   : > { %5623 = vmatprep.mubr.msk.bf16.mxu1 %vm1216_vm2, %v7094_v16 }
 0x204   : > { %5624 = vmatmul.mubr.msk.bf16.gmra.mxu1 %vm1216_vm2, %v7092_v13 }
 0x205   : > { %5627 = vmatprep.mubr.msk.bf16.mxu1 %vm1216_vm2, %v7102_v31 }
 0x20c   : > { %5628 = vmatmul.mubr.msk.bf16.gmra.mxu1 %vm1216_vm2, %v7098_v28 }
 0x20d   : > { %5631 = vmatprep.mubr.msk.bf16.mxu1 %vm1216_vm2, %v7120_v47 }
 0x214   : > { %5632 = vmatmul.mubr.msk.bf16.gmra.mxu1 %vm1216_vm2, %v7112_v44 }
 0x2bc   : > { %v5621_v15 = vpop.f32.mrf.mxu1 }
 0x2bd   : > { %v1308_v17 = vadd.f32 %v5621_v15, %v7177_v14 }
 0x2be   : > { %v1299_v18 = vpop.f32.mrf.mxu1 }
 0x2bf   : > { %1366 = vmax.xlane.f32.xlu0 %v1308_v17  ;;  %v1300_v20 = vadd.f32 %v7177_v14, %v1299_v18 }
 0x2c0   : > { %v5622_v19 = vpop.f32.mrf.mxu1 }
 0x2c1   : > { %v1311_v23 = vadd.f32 %v5622_v19, %v7177_v14 }
 0x2c2   : > { %v1302_v21 = vpop.f32.mrf.mxu1 }
 0x2c3   : > { %v1303_v22 = vadd.f32 %v7177_v14, %v1302_v21  ;;  %1362 = vmax.xlane.f32.xlu0 %v1300_v20 }
 0x2c4   : > { %v5625_v25 = vpop.f32.mrf.mxu1 }
 0x2c5   : > { %1364 = vmax.xlane.f32.xlu1 %v1303_v22  ;;  %v1324_v35 = vadd.f32 %v5625_v25, %v7177_v14 }
 0x2c6   : > { %v1315_v26 = vpop.f32.mrf.mxu1 }
 0x2c7   : > { %1368 = vmax.xlane.f32.xlu0 %v1311_v23  ;;  %v1316_v39 = vadd.f32 %v7177_v14, %v1315_v26 }
 0x2c8   : > { %v5626_v27 = vpop.f32.mrf.mxu1 }
 0x2c9   : > { %v7189_v36 = vadd.f32 %v5626_v27, %v7177_v14 }
 0x2ca   : > { %v1318_v29 = vpop.f32.mrf.mxu1 }
 0x2cb   : > { %v7194_v40 = vadd.f32 %v7177_v14, %v1318_v29 }
 0x2cc   : > { %v5629_v30 = vpop.f32.mrf.mxu1 }
 0x2cd   : > { %v7197_v43 = vadd.f32 %v5629_v30, %v7177_v14 }
 0x2ce   : > { %v1331_v33 = vpop.f32.mrf.mxu1 }
 0x2cf   : > { %v7205_v52 = vadd.f32 %v7177_v14, %v1331_v33 }
 0x2d0   : > { %v5630_v34 = vpop.f32.mrf.mxu1 }
 0x2d1   : > { %v7201_v45 = vadd.f32 %v5630_v34, %v7177_v14 }
 0x2d2   : > { %v1334_v38 = vpop.f32.mrf.mxu1 }
 0x2d3   : > { %v7209_v53 = vadd.f32 %v7177_v14, %v1334_v38 }
 0x2d4   : > { %v5633_v42 = vpop.f32.mrf.mxu1 }
 0x2d5   : > { %v7213_v55 = vadd.f32 %v5633_v42, %v7177_v14 }
 0x2d6   : > { %1671 = vrot.lane.b32.xlu1 %v7122_v48, %s6756_s17  ;;  %v1347_v51 = vpop.f32.mrf.mxu1 }
 0x2d7   : > { %v7221_v58 = vadd.f32 %v7177_v14, %v1347_v51 }
 0x2d8   : > { %v5634_v54 = vpop.f32.mrf.mxu1 }
 0x2d9   : > { %v7217_v56 = vadd.f32 %v5634_v54, %v7177_v14 }
 0x2da   : > { %v1350_v57 = vpop.f32.mrf.mxu1 }
 0x2db   : > { %v7225_v59 = vadd.f32 %v7177_v14, %v1350_v57 }
 0x2dd   : > { %1673 = vrot.lane.b32.xlu0 %v7110_v41, %s6756_s17 }
 0x2fa   : > { %1374 = vmax.xlane.f32.xlu1 %v1324_v35 }
 0x2fc   : > { %1376 = vmax.xlane.f32.xlu0 %v7189_v36 }
 0x2fe   : > { %1370 = vmax.xlane.f32.xlu1 %v1316_v39 }
 0x300   : > { %1372 = vmax.xlane.f32.xlu0 %v7194_v40 }
 0x302   : > { %1382 = vmax.xlane.f32.xlu1 %v7197_v43 }
 0x304   : > { %1384 = vmax.xlane.f32.xlu0 %v7201_v45 }
 0x306   : > { %1378 = vmax.xlane.f32.xlu1 %v7205_v52 }
 0x308   : > { %1380 = vmax.xlane.f32.xlu0 %v7209_v53 }
 0x30a   : > { %1390 = vmax.xlane.f32.xlu1 %v7213_v55 }
 0x30c   : > { %1392 = vmax.xlane.f32.xlu0 %v7217_v56 }
 0x30e   : > { %1386 = vmax.xlane.f32.xlu1 %v7221_v58 }
 0x310   : > { %1388 = vmax.xlane.f32.xlu0 %v7225_v59 }
 0x31f   : > { %1669 = vrot.lane.b32.xlu1 %v7096_v24, %s6756_s17 }
 0x348   : > { %v1367_v60 = vpop.xlane.xlu0 %1366 }
 0x349   : > { %v1396_v61 = vsub.f32 %v1308_v17, %v1367_v60 }
 0x34b   : > { %v1414_v62 = vmul.f32 1.442695, %v1396_v61 }
 0x34c   : > { %v1363_v0 = vpop.xlane.xlu0 %1362 }
 0x34d   : > { %6267 = vpow2.f32 %v1414_v62  ;;  %v1394_v1 = vsub.f32 %v1300_v20, %v1363_v0 }
 0x34e   : > { %v1365_v3 = vpop.xlane.xlu1 %1364 }
 0x34f   : > { %v1410_v4 = vmul.f32 1.442695, %v1394_v1  ;;  %v1395_v6 = vsub.f32 %v1303_v22, %v1365_v3 }
 0x350   : > { %v1369_v5 = vpop.xlane.xlu0 %1368 }
 0x351   : > { %6269 = vpow2.f32 %v1410_v4  ;;  %v1397_v7 = vsub.f32 %v1311_v23, %v1369_v5  ;;  %v1412_v10 = vmul.f32 1.442695, %v1395_v6 }
 0x352   : > { %v7247_v18 = vpop.permute.xlu1 %1671 }
 0x353   : > { %v1416_v8 = vmul.f32 1.442695, %v1397_v7 }
 0x354   : > { %v7231_v9 = vpop.permute.xlu0 %1673 }
 0x355   : > { %6271 = vpow2.f32 %v1416_v8  ;;  %6019 = vmatprep.subr.msk.bf16.mxu0 %vm1216_vm2, %v7231_v9 }
 0x356   : > { %6273 = vpow2.f32 %v1412_v10 }
 0x35a   : > { %v7235_v11 = vpop.eup %6267 }
 0x35b   : > { %1446 = vadd.xlane.f32.xlu0 %v7235_v11 }
 0x35e   : > { %v7238_v12 = vpop.eup %6269 }
 0x35f   : > { %1442 = vadd.xlane.f32.xlu0 %v7238_v12 }
 0x362   : > { %v7241_v15 = vpop.eup %6271 }
 0x363   : > { %1448 = vadd.xlane.f32.xlu0 %v7241_v15  ;;  %v7244_v17 = vpop.eup %6273 }
 0x367   : > { %1444 = vadd.xlane.f32.xlu0 %v7244_v17 }
 0x383   : > { %v1375_v19 = vpop.xlane.xlu1 %1374 }
 0x384   : > { %v1400_v20 = vsub.f32 %v1324_v35, %v1375_v19 }
 0x385   : > { %v1377_v21 = vpop.xlane.xlu0 %1376 }
 0x386   : > { %v1422_v22 = vmul.f32 1.442695, %v1400_v20  ;;  %v1401_v25 = vsub.f32 %v7189_v36, %v1377_v21 }
 0x387   : > { %v1371_v23 = vpop.xlane.xlu1 %1370 }
 0x388   : > { %6275 = vpow2.f32 %v1422_v22  ;;  %v1398_v26 = vsub.f32 %v1316_v39, %v1371_v23  ;;  %v1424_v33 = vmul.f32 1.442695, %v1401_v25 }
 0x389   : > { %v1373_v27 = vpop.xlane.xlu0 %1372 }
 0x38a   : > { %v1418_v29 = vmul.f32 1.442695, %v1398_v26  ;;  %v1399_v30 = vsub.f32 %v7194_v40, %v1373_v27 }
 0x38b   : > { %v1383_v60 = vpop.xlane.xlu1 %1382 }
 0x38c   : > { %6277 = vpow2.f32 %v1418_v29  ;;  %v1420_v34 = vmul.f32 1.442695, %v1399_v30  ;;  %v1404_v62 = vsub.f32 %v7197_v43, %v1383_v60 }
 0x38d   : > { %v1385_v39 = vpop.xlane.xlu0 %1384 }
 0x38e   : > { %6279 = vpow2.f32 %v1420_v34  ;;  %v1430_v1 = vmul.f32 1.442695, %v1404_v62  ;;  %v1405_v4 = vsub.f32 %v7201_v45, %v1385_v39 }
 0x38f   : > { %6281 = vpow2.f32 %v1424_v33  ;;  %v1379_v0 = vpop.xlane.xlu1 %1378 }
 0x390   : > { %v1402_v3 = vsub.f32 %v7205_v52, %v1379_v0  ;;  %v1432_v7 = vmul.f32 1.442695, %v1405_v4 }
 0x391   : > { %v1381_v40 = vpop.xlane.xlu0 %1380 }
 0x392   : > { %v1426_v5 = vmul.f32 1.442695, %v1402_v3  ;;  %v1403_v8 = vsub.f32 %v7209_v53, %v1381_v40 }
 0x393   : > { %v1391_v6 = vpop.xlane.xlu1 %1390 }
 0x394   : > { %v1408_v43 = vsub.f32 %v7213_v55, %v1391_v6 }
 0x395   : > { %v7251_v38 = vpop.eup %6275  ;;  %v1393_v51 = vpop.xlane.xlu0 %1392 }
 0x396   : > { %1454 = vadd.xlane.f32.xlu0 %v7251_v38  ;;  %v1438_v52 = vmul.f32 1.442695, %v1408_v43  ;;  %v1409_v53 = vsub.f32 %v7217_v56, %v1393_v51 }
 0x397   : > { %v1387_v19 = vpop.xlane.xlu1 %1386 }
 0x398   : > { %v1406_v20 = vsub.f32 %v7221_v58, %v1387_v19  ;;  %v1440_v55 = vmul.f32 1.442695, %v1409_v53 }
 0x399   : > { %v7254_v35 = vpop.eup %6277  ;;  %v1389_v54 = vpop.xlane.xlu0 %1388 }
 0x39a   : > { %1450 = vadd.xlane.f32.xlu0 %v7254_v35  ;;  %v1407_v57 = vsub.f32 %v7225_v59, %v1389_v54  ;;  %v1428_v59 = vmul.f32 1.442695, %v1403_v8  ;;  %v1434_v21 = vmul.f32 1.442695, %v1406_v20 }
 0x39b   : > { %v7257_v42 = vpop.eup %6279 }
 0x39c   : > { %1452 = vadd.xlane.f32.xlu1 %v7257_v42  ;;  %v7260_v36 = vpop.eup %6281  ;;  %v1436_v61 = vmul.f32 1.442695, %v1407_v57 }
 0x39e   : > { %1456 = vadd.xlane.f32.xlu0 %v7260_v36  ;;  %6283 = vpow2.f32 %v1436_v61 }
 0x39f   : > { %6285 = vpow2.f32 %v1430_v1  ;;  %v1721_v1 = vsel %vm1216_vm2, %v7231_v9, 0 }
 0x3a0   : > { %6287 = vpow2.f32 %v1426_v5 }
 0x3a1   : > { %6289 = vpow2.f32 %v1432_v7 }
 0x3a2   : > { %6291 = vpow2.f32 %v1428_v59 }
 0x3a3   : > { %6293 = vpow2.f32 %v1438_v52 }
 0x3a4   : > { %6295 = vpow2.f32 %v1434_v21 }
 0x3a5   : > { %6297 = vpow2.f32 %v1440_v55 }
 0x3ab   : > { %v7274_v10 = vpop.eup %6283 }
 0x3ac   : > { %v7279_v45 = vpop.eup %6285 }
 0x3ad   : > { %1667 = vrot.lane.b32.xlu1 %v7104_v32, %s6756_s17  ;;  %v7283_v22 = vpop.eup %6287 }
 0x3ae   : > { %v7286_v23 = vpop.eup %6289 }
 0x3af   : > { %v7289_v58 = vpop.eup %6291 }
 0x3b0   : > { %v7294_v25 = vpop.eup %6293 }
 0x3b1   : > { %v7299_v27 = vpop.eup %6295 }
 0x3b2   : > { %v7304_v30 = vpop.eup %6297 }
 0x3b4   : > { %1665 = vrot.lane.b32.xlu0 %v7128_v49, %s6756_s17 }
 0x3b8   : > { %1663 = vrot.lane.b32.xlu0 %v7108_v37, %s6756_s17 }
 0x3d1   : > { %1468 = vadd.xlane.f32.xlu1 %v7274_v10 }
 0x3d7   : > { %1462 = vadd.xlane.f32.xlu0 %v7279_v45 }
 0x3db   : > { %1458 = vadd.xlane.f32.xlu0 %v7283_v22 }
 0x3df   : > { %1464 = vadd.xlane.f32.xlu0 %v7286_v23 }
 0x3e2   : > { %1659 = vrot.lane.b32.xlu1 %v7118_v46, %s6756_s17 }
 0x3e3   : > { %1460 = vadd.xlane.f32.xlu0 %v7289_v58 }
 0x3e4   : > { %v1447_v56 = vpop.xlane.xlu0 %1446 }
 0x3e6   : > { %1651 = vrot.lane.b32.xlu1 %v7102_v31, %s6757_s19 }
 0x3e7   : > { %1470 = vadd.xlane.f32.xlu0 %v7294_v25 }
 0x3e8   : > { %v1443_v26 = vpop.xlane.xlu0 %1442 }
 0x3ea   : > { %1655 = vrot.lane.b32.xlu1 %v7120_v47, %s6757_s19 }
 0x3eb   : > { %1466 = vadd.xlane.f32.xlu0 %v7299_v27 }
 0x3ec   : > { %v1449_v29 = vpop.xlane.xlu0 %1448 }
 0x3ed   : > { %6299 = vrcp.f32 %v1449_v29 }
 0x3ee   : > { %1984 = vrot.lane.b32.xlu1 %v7122_v48, %s6758_s16  ;;  %6301 = vrcp.f32 %v1443_v26 }
 0x3ef   : > { %1472 = vadd.xlane.f32.xlu0 %v7304_v30  ;;  %6303 = vrcp.f32 %v1447_v56 }
 0x3f0   : > { %v1445_v33 = vpop.xlane.xlu0 %1444 }
 0x3f1   : > { %6305 = vrcp.f32 %v1445_v33 }
 0x3fa   : > { %v6300_v34 = vpop.eup %6299 }
 0x3fb   : > { %v6302_v39 = vpop.eup %6301  ;;  %v1493_v54 = vmul.f32 %v6300_v34, %v7241_v15 }
 0x3fc   : > { %v6304_v40 = vpop.eup %6303  ;;  %v1490_v57 = vmul.f32 %v6302_v39, %v7238_v12  ;;  %v1670_v12 = vpop.permute.xlu1 %1669 }
 0x3fd   : > { %v1492_v61 = vmul.f32 %v6304_v40, %v7235_v11  ;;  %v1718_v11 = vsel %vm1216_vm2, %v7247_v18, 0  ;;  %v1715_v9 = vsel %vm1216_vm2, %v1670_v12, 0 }
 0x3fe   : > { %v6306_v51 = vpop.eup %6305 }
 0x3ff   : > { %v1491_v60 = vmul.f32 %v6306_v51, %v7244_v17  ;;  %v1507_v0 = vpack.c.bf16 %v1493_v54, %v1492_v61 }
 0x401   : > { %v1506_v62 = vpack.c.bf16 %v1491_v60, %v1490_v57 }
 0x403   : > { %5651 = vmatprep.mubr.bf16.mxu0 %v1506_v62 }
 0x404   : > { %5652 = vmatmul.mubr.bf16.vlgmr.msra.gmra.mxu0 %v1507_v0 }
 0x405   : > { %5668 = vmatpush3.bf16.xpose.msra.mxu0 %v1721_v1  ;;  %1661 = vrot.lane.b32.xlu0 %v7135_v50, %s6756_s17 }
 0x406   : > { %6020 = vmatprep.subr.msk.bf16.mxu0 %vm1216_vm2, %v7247_v18 }
 0x409   : > { %1643 = vrot.lane.b32.xlu0 %v7088_v2, %s6757_s19 }
 0x40d   : > { %5670 = vmatpush3.bf16.xpose.msra.mxu0 %v1718_v11  ;;  %1645 = vrot.lane.b32.xlu0 %v7086_v63, %s6757_s19 }
 0x40e   : > { %6021 = vmatprep.subr.msk.bf16.mxu0 %vm1216_vm2, %v1670_v12 }
 0x411   : > { %1647 = vrot.lane.b32.xlu0 %v7094_v16, %s6757_s19 }
 0x415   : > { %5672 = vmatpush3.bf16.xpose.msra.mxu0 %v1715_v9  ;;  %1649 = vrot.lane.b32.xlu0 %v7092_v13, %s6757_s19 }
 0x419   : > { %1653 = vrot.lane.b32.xlu0 %v7098_v28, %s6757_s19 }
 0x41d   : > { %1657 = vrot.lane.b32.xlu0 %v7112_v44, %s6757_s19 }
 0x41f   : > { %v1455_v15 = vpop.xlane.xlu0 %1454 }
 0x421   : > { %1986 = vrot.lane.b32.xlu0 %v7110_v41, %s6758_s16 }
 0x423   : > { %v1451_v17 = vpop.xlane.xlu0 %1450 }
 0x424   : > { %6307 = vrcp.f32 %v1451_v17 }
 0x425   : > { %6309 = vrcp.f32 %v1455_v15  ;;  %v1453_v18 = vpop.xlane.xlu1 %1452  ;;  %1982 = vrot.lane.b32.xlu0 %v7096_v24, %s6758_s16 }
 0x426   : > { %6311 = vrcp.f32 %v1453_v18 }
 0x427   : > { %v1457_v3 = vpop.xlane.xlu0 %1456 }
 0x428   : > { %6313 = vrcp.f32 %v1457_v3 }
 0x429   : > { %v1668_v4 = vpop.permute.xlu1 %1667  ;;  %1980 = vrot.lane.b32.xlu0 %v7104_v32, %s6758_s16 }
 0x42a   : > { %6022 = vmatprep.subr.msk.bf16.mxu0 %vm1216_vm2, %v1668_v4  ;;  %v1712_v5 = vsel %vm1216_vm2, %v1668_v4, 0 }
 0x42b   : > { %5674 = vmatpush3.bf16.xpose.msra.mxu0 %v1712_v5  ;;  %v1666_v6 = vpop.permute.xlu0 %1665 }
 0x42c   : > { %6023 = vmatprep.subr.msk.bf16.mxu0 %vm1216_vm2, %v1666_v6  ;;  %v1709_v59 = vsel %vm1216_vm2, %v1666_v6, 0 }
 0x42d   : > { %1978 = vrot.lane.b32.xlu0 %v7128_v49, %s6758_s16 }
 0x42f   : > { %v1664_v19 = vpop.permute.xlu0 %1663 }
 0x430   : > { %v1706_v29 = vsel %vm1216_vm2, %v1664_v19, 0 }
 0x431   : > { %v6308_v7 = vpop.eup %6307 }
 0x432   : > { %v6310_v8 = vpop.eup %6309  ;;  %v1494_v52 = vmul.f32 %v6308_v7, %v7254_v35 }
 0x433   : > { %v6312_v43 = vpop.eup %6311  ;;  %5676 = vmatpush3.bf16.xpose.msra.mxu0 %v1709_v59  ;;  %v1496_v55 = vmul.f32 %v6310_v8, %v7251_v38 }
 0x434   : > { %6024 = vmatprep.subr.msk.bf16.mxu0 %vm1216_vm2, %v1664_v19  ;;  %v1495_v20 = vmul.f32 %v6312_v43, %v7257_v42 }
 0x435   : > { %v6314_v53 = vpop.eup %6313 }
 0x436   : > { %v1508_v21 = vpack.c.bf16 %v1495_v20, %v1494_v52  ;;  %v1497_v56 = vmul.f32 %v6314_v53, %v7260_v36 }
 0x438   : > { %5655 = vmatprep.mubr.bf16.mxu0 %v1508_v21  ;;  %v1509_v26 = vpack.c.bf16 %v1497_v56, %v1496_v55 }
 0x43a   : > { %5656 = vmatmul.mubr.bf16.gmra.mxu0 %v1509_v26 }
 0x43b   : > { %5678 = vmatpush3.bf16.xpose.msra.mxu0 %v1706_v29 }
 0x45a   : > { %v1469_v42 = vpop.xlane.xlu1 %1468 }
 0x45e   : > { %v1660_v15 = vpop.permute.xlu1 %1659 }
 0x45f   : > { %v1700_v5 = vsel %vm1216_vm2, %v1660_v15, 0 }
 0x460   : > { %v1463_v33 = vpop.xlane.xlu0 %1462 }
 0x462   : > { %v1652_v52 = vpop.permute.xlu1 %1651 }
 0x464   : > { %v1459_v34 = vpop.xlane.xlu0 %1458 }
 0x466   : > { %v1656_v20 = vpop.permute.xlu1 %1655 }
 0x468   : > { %v1465_v39 = vpop.xlane.xlu0 %1464 }
 0x469   : > { %6315 = vrcp.f32 %v1465_v39 }
 0x46a   : > { %6317 = vrcp.f32 %v1459_v34  ;;  %v1985_v55 = vpop.permute.xlu1 %1984 }
 0x46b   : > { %6319 = vrcp.f32 %v1463_v33 }
 0x46c   : > { %v1461_v35 = vpop.xlane.xlu0 %1460 }
 0x46d   : > { %6321 = vrcp.f32 %v1461_v35 }
 0x46e   : > { %6323 = vrcp.f32 %v1469_v42 }
 0x470   : > { %v1471_v40 = vpop.xlane.xlu0 %1470 }
 0x474   : > { %v1467_v38 = vpop.xlane.xlu0 %1466 }
 0x475   : > { %6325 = vrcp.f32 %v1467_v38 }
 0x476   : > { %v6316_v36 = vpop.eup %6315  ;;  %6327 = vrcp.f32 %v1471_v40 }
 0x477   : > { %v6318_v51 = vpop.eup %6317  ;;  %v1501_v61 = vmul.f32 %v6316_v36, %v7286_v23 }
 0x478   : > { %v1473_v54 = vpop.xlane.xlu0 %1472  ;;  %v6320_v57 = vpop.eup %6319  ;;  %v1498_v62 = vmul.f32 %v6318_v51, %v7283_v22 }
 0x479   : > { %6329 = vrcp.f32 %v1473_v54  ;;  %v1500_v11 = vmul.f32 %v6320_v57, %v7279_v45 }
 0x47a   : > { %v6322_v60 = vpop.eup %6321 }
 0x47b   : > { %v1499_v0 = vmul.f32 %v6322_v60, %v7289_v58  ;;  %v1511_v17 = vpack.c.bf16 %v1501_v61, %v1500_v11  ;;  %v6324_v18 = vpop.eup %6323 }
 0x47c   : > { %v1662_v1 = vpop.permute.xlu0 %1661  ;;  %v1503_v3 = vmul.f32 %v6324_v18, %v7274_v10 }
 0x47d   : > { %6025 = vmatprep.subr.msk.bf16.mxu0 %vm1216_vm2, %v1662_v1  ;;  %v1703_v12 = vsel %vm1216_vm2, %v1662_v1, 0  ;;  %v1510_v9 = vpack.c.bf16 %v1499_v0, %v1498_v62 }
 0x47e   : > { %5680 = vmatpush3.bf16.xpose.msra.mxu0 %v1703_v12 }
 0x47f   : > { %5659 = vmatprep.mubr.bf16.mxu0 %v1510_v9  ;;  %6026 = vmatprep.subr.msk.bf16.mxu0 %vm1216_vm2, %v1660_v15 }
 0x480   : > { %5660 = vmatmul.mubr.bf16.gmra.mxu0 %v1511_v17  ;;  %v1644_v23 = vpop.permute.xlu0 %1643 }
 0x482   : > { %v6326_v22 = vpop.eup %6325 }
 0x483   : > { %v1502_v58 = vmul.f32 %v6326_v22, %v7299_v27  ;;  %v6328_v45 = vpop.eup %6327 }
 0x484   : > { %v1646_v4 = vpop.permute.xlu0 %1645  ;;  %v1504_v8 = vmul.f32 %v6328_v45, %v7294_v25 }
 0x485   : > { %v1512_v6 = vpack.c.bf16 %v1503_v3, %v1502_v58 }
 0x486   : > { %v6330_v7 = vpop.eup %6329  ;;  %5682 = vmatpush3.bf16.xpose.msra.mxu0 %v1700_v5 }
 0x487   : > { %5663 = vmatprep.mubr.bf16.mxu0 %v1512_v6  ;;  %v1505_v59 = vmul.f32 %v6330_v7, %v7304_v30 }
 0x488   : > { %v1648_v43 = vpop.permute.xlu0 %1647 }
 0x489   : > { %v1513_v19 = vpack.c.bf16 %v1505_v59, %v1504_v8 }
 0x48b   : > { %5664 = vmatmul.mubr.bf16.gmra.mxu0 %v1513_v19 }
 0x48c   : > { %5683 = vmatprep.mubr.msk.bf16.mxu0 %vm1216_vm2, %v1644_v23  ;;  %v1650_v27 = vpop.permute.xlu0 %1649 }
 0x490   : > { %v1654_v10 = vpop.permute.xlu0 %1653 }
 0x493   : > { %5684 = vmatmul.mubr.msk.bf16.vlgmr.msra.gmra.mxu0 %vm1216_vm2, %v1646_v4 }
 0x494   : > { %5687 = vmatprep.mubr.msk.bf16.mxu0 %vm1216_vm2, %v1648_v43  ;;  %v1658_v53 = vpop.permute.xlu0 %1657 }
 0x498   : > { %v1987_v21 = vpop.permute.xlu0 %1986 }
 0x499   : > { %5699 = vmatprep.subr.bf16.mxu1 %v1987_v21 }
 0x49a   : > { %5700 = vmatpush3.bf16.msra.mxu1 %v1987_v21 }
 0x49b   : > { %5688 = vmatmul.mubr.msk.bf16.gmra.mxu0 %vm1216_vm2, %v1650_v27  ;;  %5701 = vmatprep.subr.bf16.mxu1 %v1985_v55 }
 0x49c   : > { %5691 = vmatprep.mubr.msk.bf16.mxu0 %vm1216_vm2, %v1652_v52  ;;  %v1983_v25 = vpop.permute.xlu0 %1982 }
 0x49e   : > { %5702 = vmatpush3.bf16.msra.mxu1 %v1985_v55 }
 0x49f   : > { %5703 = vmatprep.subr.bf16.mxu1 %v1983_v25 }
 0x4a0   : > { %v1981_v30 = vpop.permute.xlu0 %1980 }
 0x4a2   : > { %5704 = vmatpush3.bf16.msra.mxu1 %v1983_v25 }
 0x4a3   : > { %5692 = vmatmul.mubr.msk.bf16.gmra.mxu0 %vm1216_vm2, %v1654_v10  ;;  %5705 = vmatprep.subr.bf16.mxu1 %v1981_v30 }
 0x4a4   : > { %5695 = vmatprep.mubr.msk.bf16.mxu0 %vm1216_vm2, %v1656_v20  ;;  %v1979_v56 = vpop.permute.xlu0 %1978 }
 0x4a6   : > { %5706 = vmatpush3.bf16.msra.mxu1 %v1981_v30 }
 0x4a7   : > { %5707 = vmatprep.subr.bf16.mxu1 %v1979_v56 }
 0x4aa   : > { %5708 = vmatpush3.bf16.msra.mxu1 %v1979_v56 }
 0x4ab   : > { %5696 = vmatmul.mubr.msk.bf16.gmra.mxu0 %vm1216_vm2, %v1658_v53 }
 0x4c4   : > { %v7373_v26 = vpop.f32.mrf.mxu0 }
 0x4c5   : > { %9149 = vst [vmem:[#allocation26_spill] sm:$0xff] %v7373_v26 }
 0x4c6   : > { %v7375_v29 = vpop.f32.mrf.mxu0 }
 0x4c7   : > { %9150 = vst [vmem:[#allocation27_spill] sm:$0xff] %v7375_v29 }
 0x4c8   : > { %v7377_v33 = vpop.f32.mrf.mxu0 }
 0x4c9   : > { %9151 = vst [vmem:[#allocation28_spill] sm:$0xff] %v7377_v33 }
 0x4ca   : > { %v7379_v34 = vpop.f32.mrf.mxu0 }
 0x4cb   : > { %9152 = vst [vmem:[#allocation29_spill] sm:$0xff] %v7379_v34 }
 0x4fa   : > { %v7381_v39 = vpop.f32.mrf.mxu0 }
 0x4fb   : > { %9153 = vst [vmem:[#allocation30_spill] sm:$0xff] %v7381_v39 }
 0x4fc   : > { %v7383_v35 = vpop.f32.mrf.mxu0 }
 0x4fd   : > { %9154 = vst [vmem:[#allocation31_spill] sm:$0xff] %v7383_v35 }
 0x4fe   : > { %v7385_v42 = vpop.f32.mrf.mxu0 }
 0x4ff   : > { %9155 = vst [vmem:[#allocation32_spill] sm:$0xff] %v7385_v42 }
 0x500   : > { %v7387_v40 = vpop.f32.mrf.mxu0 }
 0x501   : > { %9156 = vst [vmem:[#allocation33_spill] sm:$0xff] %v7387_v40 }
 0x540   : > { %v7389_v38 = vpop.f32.mrf.mxu0 }
 0x541   : > { %9157 = vst [vmem:[#allocation34_spill] sm:$0xff] %v7389_v38 }
 0x542   : > { %v7391_v36 = vpop.f32.mrf.mxu0 }
 0x543   : > { %9158 = vst [vmem:[#allocation35_spill] sm:$0xff] %v7391_v36 }
 0x544   : > { %v7393_v51 = vpop.f32.mrf.mxu0 }
 0x545   : > { %9159 = vst [vmem:[#allocation36_spill] sm:$0xff] %v7393_v51 }
 0x546   : > { %v7395_v54 = vpop.f32.mrf.mxu0 }
 0x547   : > { %9160 = vst [vmem:[#allocation37_spill] sm:$0xff] %v7395_v54 }
 0x54b   : > { %v7397_v57 = vpop.f32.mrf.mxu0 }
 0x54c   : > { %9161 = vst [vmem:[#allocation38_spill] sm:$0xff] %v7397_v57 }
 0x54d   : > { %v7399_v60 = vpop.f32.mrf.mxu0 }
 0x54e   : > { %9162 = vst [vmem:[#allocation39_spill] sm:$0xff] %v7399_v60 }
 0x54f   : > { %v7401_v61 = vpop.f32.mrf.mxu0 }
 0x550   : > { %9163 = vst [vmem:[#allocation40_spill] sm:$0xff] %v7401_v61 }
 0x551   : > { %v7403_v62 = vpop.f32.mrf.mxu0 }
 0x552   : > { %9164 = vst [vmem:[#allocation41_spill] sm:$0xff] %v7403_v62 }
 0x553   : > { %v5685_v0 = vpop.f32.mrf.mxu0 }
 0x554   : > { %v1766_v1 = vadd.f32 %v5685_v0, %v7177_v14 }
 0x555   : > { %v1757_v11 = vpop.f32.mrf.mxu0 }
 0x556   : > { %v1758_v12 = vadd.f32 %v7177_v14, %v1757_v11  ;;  %1824 = vmax.xlane.f32.xlu0 %v1766_v1 }
 0x557   : > { %v5686_v9 = vpop.f32.mrf.mxu0 }
 0x558   : > { %1820 = vmax.xlane.f32.xlu1 %v1758_v12  ;;  %v1769_v17 = vadd.f32 %v5686_v9, %v7177_v14 }
 0x559   : > { %v1760_v15 = vpop.f32.mrf.mxu0 }
 0x55a   : > { %v7409_v18 = vadd.f32 %v7177_v14, %v1760_v15 }
 0x55b   : > { %v5689_v23 = vpop.f32.mrf.mxu0 }
 0x55c   : > { %1822 = vmax.xlane.f32.xlu0 %v7409_v18  ;;  %1826 = vmax.xlane.f32.xlu1 %v1769_v17  ;;  %v7417_v4 = vadd.f32 %v5689_v23, %v7177_v14 }
 0x55d   : > { %v1773_v22 = vpop.f32.mrf.mxu0 }
 0x55e   : > { %v7425_v7 = vadd.f32 %v7177_v14, %v1773_v22 }
 0x55f   : > { %v5690_v58 = vpop.f32.mrf.mxu0 }
 0x560   : > { %v7420_v5 = vadd.f32 %v5690_v58, %v7177_v14 }
 0x561   : > { %v1776_v3 = vpop.f32.mrf.mxu0 }
 0x562   : > { %v7428_v8 = vadd.f32 %v7177_v14, %v1776_v3 }
 0x563   : > { %v5693_v45 = vpop.f32.mrf.mxu0 }
 0x564   : > { %v7433_v43 = vadd.f32 %v5693_v45, %v7177_v14 }
 0x565   : > { %v1789_v6 = vpop.f32.mrf.mxu0 }
 0x566   : > { %v7441_v52 = vadd.f32 %v7177_v14, %v1789_v6 }
 0x567   : > { %v5694_v59 = vpop.f32.mrf.mxu0 }
 0x568   : > { %v7436_v19 = vadd.f32 %v5694_v59, %v7177_v14 }
 0x569   : > { %v1792_v27 = vpop.f32.mrf.mxu0 }
 0x56a   : > { %v7444_v10 = vadd.f32 %v7177_v14, %v1792_v27 }
 0x56b   : > { %v5697_v20 = vpop.f32.mrf.mxu0 }
 0x56c   : > { %v7449_v53 = vadd.f32 %v5697_v20, %v7177_v14 }
 0x56d   : > { %1974 = vrot.lane.b32.xlu1 %v7135_v50, %s6758_s16  ;;  %v1805_v21 = vpop.f32.mrf.mxu0 }
 0x56e   : > { %v7453_v55 = vadd.f32 %v7177_v14, %v1805_v21 }
 0x56f   : > { %v5698_v25 = vpop.f32.mrf.mxu0 }
 0x570   : > { %v7467_v30 = vadd.f32 %v5698_v25, %v7177_v14 }
 0x571   : > { %v1808_v56 = vpop.f32.mrf.mxu0 }
 0x572   : > { %1976 = vrot.lane.b32.xlu0 %v7108_v37, %s6758_s16  ;;  %v7471_v0 = vadd.f32 %v7177_v14, %v1808_v56 }
 0x591   : > { %1832 = vmax.xlane.f32.xlu0 %v7417_v4  ;;  %1834 = vmax.xlane.f32.xlu1 %v7420_v5 }
 0x595   : > { %1830 = vmax.xlane.f32.xlu1 %v7428_v8  ;;  %1828 = vmax.xlane.f32.xlu0 %v7425_v7 }
 0x599   : > { %1840 = vmax.xlane.f32.xlu0 %v7433_v43  ;;  %1842 = vmax.xlane.f32.xlu1 %v7436_v19 }
 0x59d   : > { %1838 = vmax.xlane.f32.xlu1 %v7444_v10  ;;  %1836 = vmax.xlane.f32.xlu0 %v7441_v52 }
 0x5a1   : > { %1848 = vmax.xlane.f32.xlu0 %v7449_v53 }
 0x5a5   : > { %1844 = vmax.xlane.f32.xlu0 %v7453_v55 }
 0x5ae   : > { %2123 = vrot.lane.b32.xlu1 %v7110_v41, %s6759_s15 }
 0x5bb   : > { %1972 = vrot.lane.b32.xlu0 %v7118_v46, %s6758_s16  ;;  %s9203_s16 = scalar_lea.vmem %s9202_s7, %s6966_s2 }
 0x5bf   : > { %2121 = vrot.lane.b32.xlu0 %v7122_v48, %s6759_s15 }
 0x5c3   : > { %2119 = vrot.lane.b32.xlu0 %v7096_v24, %s6759_s15 }
 0x5c7   : > { %2115 = vrot.lane.b32.xlu0 %v7128_v49, %s6759_s15 }
 0x5d2   : > { %1850 = vmax.xlane.f32.xlu1 %v7467_v30 }
 0x5d6   : > { %1846 = vmax.xlane.f32.xlu1 %v7471_v0 }
 0x5df   : > { %v1825_v11 = vpop.xlane.xlu0 %1824 }
 0x5e0   : > { %v1854_v9 = vsub.f32 %v1766_v1, %v1825_v11 }
 0x5e1   : > { %v1821_v15 = vpop.xlane.xlu1 %1820 }
 0x5e2   : > { %v1872_v23 = vmul.f32 1.442695, %v1854_v9  ;;  %v1852_v22 = vsub.f32 %v1758_v12, %v1821_v15 }
 0x5e4   : > { %6331 = vpow2.f32 %v1872_v23  ;;  %v1868_v58 = vmul.f32 1.442695, %v1852_v22 }
 0x5e5   : > { %v1827_v3 = vpop.xlane.xlu1 %1826  ;;  %v1823_v45 = vpop.xlane.xlu0 %1822 }
 0x5e6   : > { %v1855_v6 = vsub.f32 %v1769_v17, %v1827_v3  ;;  %6333 = vpow2.f32 %v1868_v58  ;;  %v1853_v27 = vsub.f32 %v7409_v18, %v1823_v45 }
 0x5e8   : > { %v1874_v59 = vmul.f32 1.442695, %v1855_v6  ;;  %v1870_v21 = vmul.f32 1.442695, %v1853_v27 }
 0x5e9   : > { %v1977_v20 = vpop.permute.xlu0 %1976  ;;  %v1975_v14 = vpop.permute.xlu1 %1974 }
 0x5ea   : > { %5709 = vmatprep.subr.bf16.mxu1 %v1977_v20  ;;  %6335 = vpow2.f32 %v1874_v59 }
 0x5eb   : > { %5710 = vmatpush3.bf16.msra.mxu1 %v1977_v20  ;;  %6337 = vpow2.f32 %v1870_v21 }
 0x5ec   : > { %5711 = vmatprep.subr.bf16.mxu1 %v1975_v14 }
 0x5ef   : > { %5712 = vmatpush3.bf16.msra.mxu1 %v1975_v14 }
 0x5f1   : > { %v7475_v1 = vpop.eup %6331 }
 0x5f2   : > { %1904 = vadd.xlane.f32.xlu1 %v7475_v1 }
 0x5f3   : > { %v7478_v12 = vpop.eup %6333 }
 0x5f6   : > { %1900 = vadd.xlane.f32.xlu1 %v7478_v12 }
 0x5f7   : > { %v7481_v17 = vpop.eup %6335 }
 0x5f8   : > { %v7484_v18 = vpop.eup %6337 }
 0x5fa   : > { %1906 = vadd.xlane.f32.xlu1 %v7481_v17 }
 0x5fe   : > { %1902 = vadd.xlane.f32.xlu1 %v7484_v18 }
 0x60f   : > { %2117 = vrot.lane.b32.xlu1 %v7104_v32, %s6759_s15 }
 0x61a   : > { %v1835_v25 = vpop.xlane.xlu1 %1834  ;;  %v1833_v56 = vpop.xlane.xlu0 %1832 }
 0x61b   : > { %v1858_v11 = vsub.f32 %v7417_v4, %v1833_v56  ;;  %v1859_v3 = vsub.f32 %v7420_v5, %v1835_v25 }
 0x61d   : > { %v1880_v9 = vmul.f32 1.442695, %v1858_v11  ;;  %v1882_v27 = vmul.f32 1.442695, %v1859_v3 }
 0x61e   : > { %v1831_v15 = vpop.xlane.xlu1 %1830  ;;  %v1829_v23 = vpop.xlane.xlu0 %1828 }
 0x61f   : > { %v1857_v22 = vsub.f32 %v7428_v8, %v1831_v15  ;;  %v1856_v58 = vsub.f32 %v7425_v7, %v1829_v23  ;;  %6339 = vpow2.f32 %v1880_v9 }
 0x621   : > { %v1878_v45 = vmul.f32 1.442695, %v1857_v22  ;;  %v1876_v6 = vmul.f32 1.442695, %v1856_v58 }
 0x622   : > { %v1841_v59 = vpop.xlane.xlu0 %1840  ;;  %v1843_v4 = vpop.xlane.xlu1 %1842 }
 0x623   : > { %6341 = vpow2.f32 %v1878_v45  ;;  %v1862_v20 = vsub.f32 %v7433_v43, %v1841_v59  ;;  %v1863_v5 = vsub.f32 %v7436_v19, %v1843_v4 }
 0x624   : > { %6343 = vpow2.f32 %v1876_v6 }
 0x625   : > { %6345 = vpow2.f32 %v1882_v27  ;;  %v1888_v21 = vmul.f32 1.442695, %v1862_v20 }
 0x626   : > { %v1837_v14 = vpop.xlane.xlu0 %1836  ;;  %v1839_v15 = vpop.xlane.xlu1 %1838 }
 0x627   : > { %v1860_v56 = vsub.f32 %v7441_v52, %v1837_v14  ;;  %6347 = vpow2.f32 %v1888_v21  ;;  %v1890_v52 = vmul.f32 1.442695, %v1863_v5  ;;  %v1861_v58 = vsub.f32 %v7444_v10, %v1839_v15 }
 0x629   : > { %v1884_v25 = vmul.f32 1.442695, %v1860_v56 }
 0x62a   : > { %v1849_v8 = vpop.xlane.xlu0 %1848  ;;  %v7508_v45 = vpop.permute.xlu1 %2123 }
 0x62b   : > { %v1866_v7 = vsub.f32 %v7449_v53, %v1849_v8 }
 0x62c   : > { %v7496_v11 = vpop.eup %6339 }
 0x62d   : > { %v1896_v9 = vmul.f32 1.442695, %v1866_v7  ;;  %1912 = vadd.xlane.f32.xlu0 %v7496_v11 }
 0x62e   : > { %v1845_v43 = vpop.xlane.xlu0 %1844 }
 0x62f   : > { %6349 = vpow2.f32 %v1896_v9  ;;  %v1864_v23 = vsub.f32 %v7453_v55, %v1845_v43  ;;  %v1886_v55 = vmul.f32 1.442695, %v1861_v58 }
 0x630   : > { %v7501_v22 = vpop.eup %6341  ;;  %6351 = vpow2.f32 %v1884_v25 }
 0x631   : > { %v1892_v53 = vmul.f32 1.442695, %v1864_v23  ;;  %v7504_v3 = vpop.eup %6343  ;;  %1910 = vadd.xlane.f32.xlu0 %v7501_v22 }
 0x632   : > { %v1973_v19 = vpop.permute.xlu0 %1972  ;;  %v7512_v10 = vpop.eup %6345 }
 0x633   : > { %6353 = vpow2.f32 %v1892_v53  ;;  %1908 = vadd.xlane.f32.xlu1 %v7504_v3  ;;  %5713 = vmatprep.subr.bf16.mxu1 %v1973_v19 }
 0x634   : > { %5714 = vmatpush3.bf16.msra.mxu1 %v1973_v19  ;;  %6355 = vpow2.f32 %v1890_v52  ;;  %v7515_v6 = vpop.eup %6347 }
 0x635   : > { %6027 = vmatprep.subr.msk.bf16.mxu1 %vm1216_vm2, %v7508_v45  ;;  %6357 = vpow2.f32 %v1886_v55 }
 0x637   : > { %1914 = vadd.xlane.f32.xlu1 %v7512_v10 }
 0x63b   : > { %1920 = vadd.xlane.f32.xlu1 %v7515_v6 }
 0x63c   : > { %v7518_v59 = vpop.eup %6349 }
 0x63d   : > { %1928 = vadd.xlane.f32.xlu0 %v7518_v59  ;;  %v7521_v27 = vpop.eup %6351 }
 0x63f   : > { %1916 = vadd.xlane.f32.xlu1 %v7521_v27 }
 0x640   : > { %v7524_v20 = vpop.eup %6353 }
 0x641   : > { %1924 = vadd.xlane.f32.xlu0 %v7524_v20  ;;  %v7527_v14 = vpop.eup %6355 }
 0x642   : > { %v7530_v4 = vpop.eup %6357 }
 0x643   : > { %1922 = vadd.xlane.f32.xlu1 %v7527_v14 }
 0x647   : > { %1918 = vadd.xlane.f32.xlu1 %v7530_v4 }
 0x65b   : > { %v1851_v21 = vpop.xlane.xlu1 %1850 }
 0x65c   : > { %v1867_v56 = vsub.f32 %v7467_v30, %v1851_v21 }
 0x65e   : > { %v1898_v8 = vmul.f32 1.442695, %v1867_v56 }
 0x65f   : > { %v1847_v7 = vpop.xlane.xlu1 %1846 }
 0x660   : > { %6359 = vpow2.f32 %v1898_v8  ;;  %v1865_v5 = vsub.f32 %v7471_v0, %v1847_v7 }
 0x662   : > { %v1894_v25 = vmul.f32 1.442695, %v1865_v5 }
 0x664   : > { %6361 = vpow2.f32 %v1894_v25  ;;  %v2171_v25 = vsel %vm1216_vm2, %v7508_v45, 0 }
 0x66d   : > { %v7535_v9 = vpop.eup %6359 }
 0x66e   : > { %1930 = vadd.xlane.f32.xlu0 %v7535_v9 }
 0x671   : > { %v7538_v15 = vpop.eup %6361 }
 0x672   : > { %1926 = vadd.xlane.f32.xlu1 %v7538_v15 }
 0x67b   : > { %v1905_v43 = vpop.xlane.xlu1 %1904 }
 0x67f   : > { %v1901_v23 = vpop.xlane.xlu1 %1900 }
 0x683   : > { %v1907_v52 = vpop.xlane.xlu1 %1906  ;;  %2113 = vrot.lane.b32.xlu1 %v7108_v37, %s6759_s15 }
 0x684   : > { %2111 = vrot.lane.b32.xlu0 %v7135_v50, %s6759_s15  ;;  %6363 = vrcp.f32 %v1907_v52 }
 0x685   : > { %6365 = vrcp.f32 %v1901_v23 }
 0x686   : > { %6367 = vrcp.f32 %v1905_v43 }
 0x687   : > { %v1903_v30 = vpop.xlane.xlu1 %1902  ;;  %2093 = vrot.lane.b32.xlu1 %v7088_v2, %s6760_s22 }
 0x688   : > { %6369 = vrcp.f32 %v1903_v30  ;;  %2109 = vrot.lane.b32.xlu0 %v7118_v46, %s6759_s15 }
 0x68b   : > { %2097 = vrot.lane.b32.xlu1 %v7094_v16, %s6760_s22  ;;  %v2118_v45 = vpop.permute.xlu1 %2117 }
 0x68c   : > { %2095 = vrot.lane.b32.xlu0 %v7086_v63, %s6760_s22  ;;  %v2162_v23 = vsel %vm1216_vm2, %v2118_v45, 0 }
 0x68f   : > { %2101 = vrot.lane.b32.xlu1 %v7102_v31, %s6760_s22 }
 0x690   : > { %2099 = vrot.lane.b32.xlu0 %v7092_v13, %s6760_s22 }
 0x691   : > { %v6364_v0 = vpop.eup %6363 }
 0x692   : > { %v6366_v58 = vpop.eup %6365  ;;  %v1951_v55 = vmul.f32 %v6364_v0, %v7481_v17  ;;  %v2122_v17 = vpop.permute.xlu0 %2121 }
 0x693   : > { %2105 = vrot.lane.b32.xlu1 %v7120_v47, %s6760_s22  ;;  %v6368_v53 = vpop.eup %6367  ;;  %v1948_v21 = vmul.f32 %v6366_v58, %v7478_v12 }
 0x694   : > { %2103 = vrot.lane.b32.xlu0 %v7098_v28, %s6760_s22  ;;  %v1950_v8 = vmul.f32 %v6368_v53, %v7475_v1  ;;  %v2168_v1 = vsel %vm1216_vm2, %v2122_v17, 0 }
 0x695   : > { %v6370_v19 = vpop.eup %6369 }
 0x696   : > { %v1949_v56 = vmul.f32 %v6370_v19, %v7484_v18  ;;  %v1965_v5 = vpack.c.bf16 %v1951_v55, %v1950_v8  ;;  %v2120_v12 = vpop.permute.xlu0 %2119 }
 0x697   : > { %2434 = vrot.lane.b32.xlu1 %v7122_v48, %s6761_s0  ;;  %v2165_v18 = vsel %vm1216_vm2, %v2120_v12, 0 }
 0x698   : > { %2107 = vrot.lane.b32.xlu0 %v7112_v44, %s6760_s22  ;;  %v1964_v7 = vpack.c.bf16 %v1949_v56, %v1948_v21 }
 0x69a   : > { %5715 = vmatprep.mubr.bf16.mxu1 %v1964_v7  ;;  %v2116_v43 = vpop.permute.xlu0 %2115 }
 0x69b   : > { %5716 = vmatmul.mubr.bf16.vlgmr.msra.gmra.mxu1 %v1965_v5  ;;  %v2159_v0 = vsel %vm1216_vm2, %v2116_v43, 0 }
 0x69c   : > { %5732 = vmatpush3.bf16.xpose.msra.mxu1 %v2171_v25  ;;  %2436 = vrot.lane.b32.xlu0 %v7110_v41, %s6761_s0 }
 0x69d   : > { %6028 = vmatprep.subr.msk.bf16.mxu1 %vm1216_vm2, %v2122_v17 }
 0x6a0   : > { %2432 = vrot.lane.b32.xlu0 %v7096_v24, %s6761_s0 }
 0x6a4   : > { %5734 = vmatpush3.bf16.xpose.msra.mxu1 %v2168_v1  ;;  %2430 = vrot.lane.b32.xlu0 %v7104_v32, %s6761_s0 }
 0x6a5   : > { %6029 = vmatprep.subr.msk.bf16.mxu1 %vm1216_vm2, %v2120_v12 }
 0x6a8   : > { %2428 = vrot.lane.b32.xlu0 %v7128_v49, %s6761_s0 }
 0x6ac   : > { %5736 = vmatpush3.bf16.xpose.msra.mxu1 %v2165_v18 }
 0x6ad   : > { %6030 = vmatprep.subr.msk.bf16.mxu1 %vm1216_vm2, %v2118_v45 }
 0x6b4   : > { %5738 = vmatpush3.bf16.xpose.msra.mxu1 %v2162_v23 }
 0x6b5   : > { %6031 = vmatprep.subr.msk.bf16.mxu1 %vm1216_vm2, %v2116_v43 }
 0x6b6   : > { %v1913_v52 = vpop.xlane.xlu0 %1912 }
 0x6ba   : > { %v1911_v30 = vpop.xlane.xlu0 %1910 }
 0x6bb   : > { %6371 = vrcp.f32 %v1911_v30 }
 0x6bc   : > { %5740 = vmatpush3.bf16.xpose.msra.mxu1 %v2159_v0  ;;  %v1909_v58 = vpop.xlane.xlu1 %1908 }
 0x6bd   : > { %6373 = vrcp.f32 %v1909_v58 }
 0x6be   : > { %6375 = vrcp.f32 %v1913_v52 }
 0x6c0   : > { %v1915_v53 = vpop.xlane.xlu1 %1914 }
 0x6c1   : > { %6377 = vrcp.f32 %v1915_v53 }
 0x6c4   : > { %v1921_v19 = vpop.xlane.xlu1 %1920 }
 0x6c8   : > { %v1917_v55 = vpop.xlane.xlu1 %1916  ;;  %v6372_v21 = vpop.eup %6371 }
 0x6c9   : > { %v1953_v7 = vmul.f32 %v6372_v21, %v7501_v22 }
 0x6ca   : > { %v6374_v56 = vpop.eup %6373 }
 0x6cb   : > { %v1952_v8 = vmul.f32 %v6374_v56, %v7504_v3  ;;  %v6376_v5 = vpop.eup %6375 }
 0x6cc   : > { %v1923_v25 = vpop.xlane.xlu1 %1922  ;;  %v1954_v12 = vmul.f32 %v6376_v5, %v7496_v11 }
 0x6cd   : > { %v1966_v17 = vpack.c.bf16 %v1953_v7, %v1952_v8  ;;  %6379 = vrcp.f32 %v1923_v25 }
 0x6ce   : > { %v6378_v1 = vpop.eup %6377  ;;  %6381 = vrcp.f32 %v1917_v55 }
 0x6cf   : > { %5719 = vmatprep.mubr.bf16.mxu1 %v1966_v17  ;;  %v1955_v18 = vmul.f32 %v6378_v1, %v7512_v10  ;;  %6383 = vrcp.f32 %v1921_v19  ;;  %v1929_v10 = vpop.xlane.xlu0 %1928 }
 0x6d0   : > { %v1919_v45 = vpop.xlane.xlu1 %1918 }
 0x6d1   : > { %6385 = vrcp.f32 %v1919_v45  ;;  %v1967_v43 = vpack.c.bf16 %v1955_v18, %v1954_v12 }
 0x6d3   : > { %5720 = vmatmul.mubr.bf16.gmra.mxu1 %v1967_v43  ;;  %v1925_v19 = vpop.xlane.xlu0 %1924 }
 0x6da   : > { %v6380_v23 = vpop.eup %6379 }
 0x6db   : > { %v6382_v3 = vpop.eup %6381  ;;  %v1959_v30 = vmul.f32 %v6380_v23, %v7527_v14 }
 0x6dc   : > { %v6384_v52 = vpop.eup %6383  ;;  %v1956_v0 = vmul.f32 %v6382_v3, %v7521_v27 }
 0x6dd   : > { %v1958_v53 = vmul.f32 %v6384_v52, %v7515_v6 }
 0x6de   : > { %v6386_v22 = vpop.eup %6385 }
 0x6df   : > { %v1957_v58 = vmul.f32 %v6386_v22, %v7530_v4  ;;  %v1969_v55 = vpack.c.bf16 %v1959_v30, %v1958_v53 }
 0x6e1   : > { %v1968_v11 = vpack.c.bf16 %v1957_v58, %v1956_v0 }
 0x6e3   : > { %5723 = vmatprep.mubr.bf16.mxu1 %v1968_v11 }
 0x6e4   : > { %5724 = vmatmul.mubr.bf16.gmra.mxu1 %v1969_v55 }
 0x6f7   : > { %v1931_v21 = vpop.xlane.xlu0 %1930 }
 0x6f8   : > { %6387 = vrcp.f32 %v1931_v21 }
 0x6f9   : > { %6389 = vrcp.f32 %v1925_v19 }
 0x6fa   : > { %6391 = vrcp.f32 %v1929_v10 }
 0x6fb   : > { %v1927_v56 = vpop.xlane.xlu1 %1926  ;;  %v2112_v8 = vpop.permute.xlu0 %2111 }
 0x6fc   : > { %6393 = vrcp.f32 %v1927_v56  ;;  %v2153_v18 = vsel %vm1216_vm2, %v2112_v8, 0 }
 0x6ff   : > { %v2114_v14 = vpop.permute.xlu1 %2113  ;;  %v2110_v7 = vpop.permute.xlu0 %2109 }
 0x700   : > { %6032 = vmatprep.subr.msk.bf16.mxu1 %vm1216_vm2, %v2114_v14  ;;  %v2156_v27 = vsel %vm1216_vm2, %v2114_v14, 0 }
 0x701   : > { %5742 = vmatpush3.bf16.xpose.msra.mxu1 %v2156_v27 }
 0x702   : > { %6033 = vmatprep.subr.msk.bf16.mxu1 %vm1216_vm2, %v2112_v8 }
 0x703   : > { %v2094_v6 = vpop.permute.xlu1 %2093  ;;  %v2096_v4 = vpop.permute.xlu0 %2095 }
 0x705   : > { %v6388_v5 = vpop.eup %6387 }
 0x706   : > { %v6390_v25 = vpop.eup %6389  ;;  %v1963_v43 = vmul.f32 %v6388_v5, %v7535_v9  ;;  %v2150_v9 = vsel %vm1216_vm2, %v2110_v7, 0 }
 0x707   : > { %v2098_v17 = vpop.permute.xlu1 %2097  ;;  %v2100_v1 = vpop.permute.xlu0 %2099  ;;  %v1960_v23 = vmul.f32 %v6390_v25, %v7524_v20 }
 0x708   : > { %v6392_v12 = vpop.eup %6391 }
 0x709   : > { %v6394_v45 = vpop.eup %6393  ;;  %5744 = vmatpush3.bf16.xpose.msra.mxu1 %v2153_v18  ;;  %v1962_v30 = vmul.f32 %v6392_v12, %v7518_v59 }
 0x70a   : > { %6034 = vmatprep.subr.msk.bf16.mxu1 %vm1216_vm2, %v2110_v7  ;;  %v1961_v3 = vmul.f32 %v6394_v45, %v7538_v15 }
 0x70b   : > { %v2102_v52 = vpop.permute.xlu1 %2101  ;;  %v2104_v22 = vpop.permute.xlu0 %2103  ;;  %v1971_v58 = vpack.c.bf16 %v1963_v43, %v1962_v30 }
 0x70c   : > { %v1970_v0 = vpack.c.bf16 %v1961_v3, %v1960_v23 }
 0x70e   : > { %5727 = vmatprep.mubr.bf16.mxu1 %v1970_v0 }
 0x70f   : > { %v2106_v53 = vpop.permute.xlu1 %2105  ;;  %5728 = vmatmul.mubr.bf16.gmra.mxu1 %v1971_v58  ;;  %v2108_v11 = vpop.permute.xlu0 %2107 }
 0x710   : > { %5747 = vmatprep.mubr.msk.bf16.mxu1 %vm1216_vm2, %v2094_v6 }
 0x711   : > { %5746 = vmatpush3.bf16.xpose.msra.mxu1 %v2150_v9 }
 0x713   : > { %v2437_v55 = vpop.permute.xlu0 %2436  ;;  %v2435_v20 = vpop.permute.xlu1 %2434 }
 0x714   : > { %5763 = vmatprep.subr.bf16.mxu0 %v2437_v55 }
 0x715   : > { %5764 = vmatpush3.bf16.msra.mxu0 %v2437_v55 }
 0x716   : > { %5765 = vmatprep.subr.bf16.mxu0 %v2435_v20 }
 0x717   : > { %v2433_v15 = vpop.permute.xlu0 %2432 }
 0x718   : > { %5748 = vmatmul.mubr.msk.bf16.vlgmr.msra.gmra.mxu1 %vm1216_vm2, %v2096_v4 }
 0x719   : > { %5751 = vmatprep.mubr.msk.bf16.mxu1 %vm1216_vm2, %v2098_v17  ;;  %5766 = vmatpush3.bf16.msra.mxu0 %v2435_v20 }
 0x71a   : > { %5767 = vmatprep.subr.bf16.mxu0 %v2433_v15 }
 0x71b   : > { %v2431_v59 = vpop.permute.xlu0 %2430 }
 0x71d   : > { %5768 = vmatpush3.bf16.msra.mxu0 %v2433_v15 }
 0x71e   : > { %5769 = vmatprep.subr.bf16.mxu0 %v2431_v59 }
 0x71f   : > { %v2429_v10 = vpop.permute.xlu0 %2428 }
 0x720   : > { %5752 = vmatmul.mubr.msk.bf16.gmra.mxu1 %vm1216_vm2, %v2100_v1 }
 0x721   : > { %5755 = vmatprep.mubr.msk.bf16.mxu1 %vm1216_vm2, %v2102_v52  ;;  %5770 = vmatpush3.bf16.msra.mxu0 %v2431_v59 }
 0x722   : > { %5771 = vmatprep.subr.bf16.mxu0 %v2429_v10 }
 0x725   : > { %5772 = vmatpush3.bf16.msra.mxu0 %v2429_v10 }
 0x728   : > { %5756 = vmatmul.mubr.msk.bf16.gmra.mxu1 %vm1216_vm2, %v2104_v22 }
 0x729   : > { %5759 = vmatprep.mubr.msk.bf16.mxu1 %vm1216_vm2, %v2106_v53 }
 0x730   : > { %5760 = vmatmul.mubr.msk.bf16.gmra.mxu1 %vm1216_vm2, %v2108_v11  ;;  %v7654_v11 = vld [vmem:[%s9148_s26] ss:$0 sm:$0xff]  ;;  %s6767_s26 = smov 24  }
 0x75b   : > { %v7605_v19 = vpop.f32.mrf.mxu1 }
 0x75d   : > { %v7607_v21 = vpop.f32.mrf.mxu1 }
 0x75f   : > { %v7609_v56 = vpop.f32.mrf.mxu1 }
 0x761   : > { %v7613_v14 = vpop.f32.mrf.mxu1 }
 0x793   : > { %v7617_v27 = vpop.f32.mrf.mxu1 }
 0x795   : > { %v7619_v6 = vpop.f32.mrf.mxu1 }
 0x797   : > { %v7621_v4 = vpop.f32.mrf.mxu1 }
 0x799   : > { %v7625_v25 = vpop.f32.mrf.mxu1 }
 0x7a4   : > { %v7629_v1 = vpop.f32.mrf.mxu1 }
 0x7a6   : > { %v7631_v12 = vpop.f32.mrf.mxu1 }
 0x7a8   : > { %v7633_v18 = vpop.f32.mrf.mxu1 }
 0x7aa   : > { %v7637_v43 = vpop.f32.mrf.mxu1 }
 0x7cf   : > { %v7641_v3 = vpop.f32.mrf.mxu1 }
 0x7d1   : > { %v7643_v52 = vpop.f32.mrf.mxu1 }
 0x7d3   : > { %v7645_v22 = vpop.f32.mrf.mxu1 }
 0x7d5   : > { %v7649_v0 = vpop.f32.mrf.mxu1 }
 0x7d8   : > { %v5749_v53 = vpop.f32.mrf.mxu1 }
 0x7d9   : > { %v2216_v9 = vadd.f32 %v7654_v11, %v5749_v53 }
 0x7da   : > { %v2207_v55 = vpop.f32.mrf.mxu1 }
 0x7db   : > { %v2208_v20 = vadd.f32 %v7654_v11, %v2207_v55  ;;  %2274 = vmax.xlane.f32.xlu0 %v2216_v9 }
 0x7dc   : > { %v5750_v15 = vpop.f32.mrf.mxu1 }
 0x7dd   : > { %2270 = vmax.xlane.f32.xlu1 %v2208_v20  ;;  %v2219_v10 = vadd.f32 %v7654_v11, %v5750_v15 }
 0x7de   : > { %v2210_v59 = vpop.f32.mrf.mxu1 }
 0x7df   : > { %v7660_v30 = vadd.f32 %v7654_v11, %v2210_v59 }
 0x7e0   : > { %v5753_v53 = vpop.f32.mrf.mxu1 }
 0x7e1   : > { %2272 = vmax.xlane.f32.xlu0 %v7660_v30  ;;  %2276 = vmax.xlane.f32.xlu1 %v2219_v10  ;;  %v7668_v7 = vadd.f32 %v7654_v11, %v5753_v53 }
 0x7e2   : > { %v2223_v55 = vpop.f32.mrf.mxu1 }
 0x7e3   : > { %v7676_v23 = vadd.f32 %v7654_v11, %v2223_v55 }
 0x7e4   : > { %v5754_v58 = vpop.f32.mrf.mxu1 }
 0x7e5   : > { %v7671_v15 = vadd.f32 %v7654_v11, %v5754_v58 }
 0x7e6   : > { %v2226_v45 = vpop.f32.mrf.mxu1 }
 0x7e7   : > { %v7679_v17 = vadd.f32 %v7654_v11, %v2226_v45 }
 0x7e8   : > { %v5757_v5 = vpop.f32.mrf.mxu1 }
 0x7e9   : > { %v7684_v53 = vadd.f32 %v7654_v11, %v5757_v5 }
 0x7ea   : > { %v2239_v59 = vpop.f32.mrf.mxu1 }
 0x7eb   : > { %v7692_v55 = vadd.f32 %v7654_v11, %v2239_v59 }
 0x7ec   : > { %v5758_v8 = vpop.f32.mrf.mxu1 }
 0x7ed   : > { %v7687_v58 = vadd.f32 %v7654_v11, %v5758_v8 }
 0x7ee   : > { %v2242_v60 = vpop.f32.mrf.mxu1 }
 0x7ef   : > { %v7695_v45 = vadd.f32 %v7654_v11, %v2242_v60 }
 0x7f0   : > { %v5761_v62 = vpop.f32.mrf.mxu1 }
 0x7f1   : > { %v7700_v5 = vadd.f32 %v7654_v11, %v5761_v62 }
 0x7f2   : > { %2424 = vrot.lane.b32.xlu1 %v7135_v50, %s6761_s0  ;;  %v2255_v8 = vpop.f32.mrf.mxu1 }
 0x7f3   : > { %v7704_v57 = vadd.f32 %v7654_v11, %v2255_v8 }
 0x7f4   : > { %v5762_v60 = vpop.f32.mrf.mxu1 }
 0x7f5   : > { %v7718_v62 = vadd.f32 %v7654_v11, %v5762_v60 }
 0x7f6   : > { %v2258_v59 = vpop.f32.mrf.mxu1 }
 0x7f7   : > { %2426 = vrot.lane.b32.xlu0 %v7108_v37, %s6761_s0  ;;  %v7722_v8 = vadd.f32 %v7654_v11, %v2258_v59 }
 0x816   : > { %2282 = vmax.xlane.f32.xlu0 %v7668_v7  ;;  %2284 = vmax.xlane.f32.xlu1 %v7671_v15 }
 0x81a   : > { %2280 = vmax.xlane.f32.xlu1 %v7679_v17  ;;  %2278 = vmax.xlane.f32.xlu0 %v7676_v23 }
 0x81e   : > { %2290 = vmax.xlane.f32.xlu0 %v7684_v53  ;;  %2292 = vmax.xlane.f32.xlu1 %v7687_v58 }
 0x822   : > { %2288 = vmax.xlane.f32.xlu1 %v7695_v45  ;;  %2286 = vmax.xlane.f32.xlu0 %v7692_v55 }
 0x826   : > { %2298 = vmax.xlane.f32.xlu0 %v7700_v5 }
 0x82a   : > { %2294 = vmax.xlane.f32.xlu0 %v7704_v57 }
 0x833   : > { %2573 = vrot.lane.b32.xlu1 %v7110_v41, %s6762_s1 }
 0x840   : > { %2422 = vrot.lane.b32.xlu0 %v7118_v46, %s6761_s0  ;;  %s9204_s0 = scalar_lea.vmem %s9061_s8, %s6966_s2 }
 0x844   : > { %2571 = vrot.lane.b32.xlu0 %v7122_v48, %s6762_s1 }
 0x848   : > { %2569 = vrot.lane.b32.xlu0 %v7096_v24, %s6762_s1 }
 0x84c   : > { %2565 = vrot.lane.b32.xlu0 %v7128_v49, %s6762_s1 }
 0x857   : > { %2300 = vmax.xlane.f32.xlu1 %v7718_v62 }
 0x85b   : > { %2296 = vmax.xlane.f32.xlu1 %v7722_v8 }
 0x864   : > { %v2275_v61 = vpop.xlane.xlu0 %2274 }
 0x865   : > { %v2304_v38 = vsub.f32 %v2216_v9, %v2275_v61 }
 0x866   : > { %v2271_v51 = vpop.xlane.xlu1 %2270 }
 0x867   : > { %v2322_v36 = vmul.f32 1.442695, %v2304_v38  ;;  %v2302_v54 = vsub.f32 %v2208_v20, %v2271_v51 }
 0x869   : > { %6395 = vpow2.f32 %v2322_v36  ;;  %v2318_v39 = vmul.f32 1.442695, %v2302_v54 }
 0x86a   : > { %v2277_v42 = vpop.xlane.xlu1 %2276  ;;  %v2273_v35 = vpop.xlane.xlu0 %2272 }
 0x86b   : > { %v2305_v40 = vsub.f32 %v2219_v10, %v2277_v42  ;;  %6397 = vpow2.f32 %v2318_v39  ;;  %v2303_v26 = vsub.f32 %v7660_v30, %v2273_v35 }
 0x86d   : > { %v2324_v60 = vmul.f32 1.442695, %v2305_v40  ;;  %v2320_v29 = vmul.f32 1.442695, %v2303_v26 }
 0x86e   : > { %v2427_v33 = vpop.permute.xlu0 %2426  ;;  %v2425_v59 = vpop.permute.xlu1 %2424 }
 0x86f   : > { %5773 = vmatprep.subr.bf16.mxu0 %v2427_v33  ;;  %6399 = vpow2.f32 %v2324_v60 }
 0x870   : > { %5774 = vmatpush3.bf16.msra.mxu0 %v2427_v33  ;;  %6401 = vpow2.f32 %v2320_v29 }
 0x871   : > { %5775 = vmatprep.subr.bf16.mxu0 %v2425_v59 }
 0x874   : > { %5776 = vmatpush3.bf16.msra.mxu0 %v2425_v59 }
 0x876   : > { %v7726_v38 = vpop.eup %6395 }
 0x877   : > { %2354 = vadd.xlane.f32.xlu1 %v7726_v38 }
 0x878   : > { %v7729_v36 = vpop.eup %6397 }
 0x87b   : > { %2350 = vadd.xlane.f32.xlu1 %v7729_v36 }
 0x87c   : > { %v7732_v39 = vpop.eup %6399 }
 0x87d   : > { %v7735_v35 = vpop.eup %6401 }
 0x87f   : > { %2356 = vadd.xlane.f32.xlu1 %v7732_v39 }
 0x883   : > { %2352 = vadd.xlane.f32.xlu1 %v7735_v35 }
 0x894   : > { %2567 = vrot.lane.b32.xlu1 %v7104_v32, %s6762_s1 }
 0x89f   : > { %v2285_v26 = vpop.xlane.xlu1 %2284  ;;  %v2283_v29 = vpop.xlane.xlu0 %2282 }
 0x8a0   : > { %v2308_v33 = vsub.f32 %v7668_v7, %v2283_v29  ;;  %v2309_v30 = vsub.f32 %v7671_v15, %v2285_v26 }
 0x8a2   : > { %v2330_v42 = vmul.f32 1.442695, %v2308_v33  ;;  %v2332_v60 = vmul.f32 1.442695, %v2309_v30 }
 0x8a3   : > { %v2281_v40 = vpop.xlane.xlu1 %2280  ;;  %v2279_v51 = vpop.xlane.xlu0 %2278 }
 0x8a4   : > { %v2307_v54 = vsub.f32 %v7679_v17, %v2281_v40  ;;  %v2306_v61 = vsub.f32 %v7676_v23, %v2279_v51  ;;  %6403 = vpow2.f32 %v2330_v42 }
 0x8a6   : > { %v2328_v9 = vmul.f32 1.442695, %v2307_v54  ;;  %v2326_v20 = vmul.f32 1.442695, %v2306_v61 }
 0x8a7   : > { %v2291_v10 = vpop.xlane.xlu0 %2290  ;;  %v2293_v7 = vpop.xlane.xlu1 %2292 }
 0x8a8   : > { %6405 = vpow2.f32 %v2328_v9  ;;  %v2312_v59 = vsub.f32 %v7684_v53, %v2291_v10  ;;  %v2313_v15 = vsub.f32 %v7687_v58, %v2293_v7 }
 0x8a9   : > { %6407 = vpow2.f32 %v2326_v20 }
 0x8aa   : > { %6409 = vpow2.f32 %v2332_v60  ;;  %v2338_v29 = vmul.f32 1.442695, %v2312_v59 }
 0x8ab   : > { %v2287_v34 = vpop.xlane.xlu0 %2286  ;;  %v2289_v51 = vpop.xlane.xlu1 %2288 }
 0x8ac   : > { %v2310_v33 = vsub.f32 %v7692_v55, %v2287_v34  ;;  %6411 = vpow2.f32 %v2338_v29  ;;  %v2340_v34 = vmul.f32 1.442695, %v2313_v15  ;;  %v2311_v55 = vsub.f32 %v7695_v45, %v2289_v51 }
 0x8ae   : > { %v2334_v26 = vmul.f32 1.442695, %v2310_v33 }
 0x8af   : > { %v2299_v17 = vpop.xlane.xlu0 %2298  ;;  %v7759_v9 = vpop.permute.xlu1 %2573 }
 0x8b0   : > { %v2316_v23 = vsub.f32 %v7700_v5, %v2299_v17 }
 0x8b1   : > { %v7747_v42 = vpop.eup %6403 }
 0x8b2   : > { %v2346_v40 = vmul.f32 1.442695, %v2316_v23  ;;  %2362 = vadd.xlane.f32.xlu0 %v7747_v42 }
 0x8b3   : > { %v2295_v53 = vpop.xlane.xlu0 %2294 }
 0x8b4   : > { %6413 = vpow2.f32 %v2346_v40  ;;  %v2314_v54 = vsub.f32 %v7704_v57, %v2295_v53  ;;  %v2336_v57 = vmul.f32 1.442695, %v2311_v55 }
 0x8b5   : > { %v7752_v61 = vpop.eup %6405  ;;  %6415 = vpow2.f32 %v2334_v26 }
 0x8b6   : > { %v2342_v5 = vmul.f32 1.442695, %v2314_v54  ;;  %v7755_v30 = vpop.eup %6407  ;;  %2360 = vadd.xlane.f32.xlu0 %v7752_v61 }
 0x8b7   : > { %v2423_v58 = vpop.permute.xlu0 %2422  ;;  %v7763_v45 = vpop.eup %6409 }
 0x8b8   : > { %6417 = vpow2.f32 %v2342_v5  ;;  %2358 = vadd.xlane.f32.xlu1 %v7755_v30  ;;  %5777 = vmatprep.subr.bf16.mxu0 %v2423_v58 }
 0x8b9   : > { %5778 = vmatpush3.bf16.msra.mxu0 %v2423_v58  ;;  %6419 = vpow2.f32 %v2340_v34  ;;  %v7766_v20 = vpop.eup %6411 }
 0x8ba   : > { %6035 = vmatprep.subr.msk.bf16.mxu0 %vm1216_vm2, %v7759_v9  ;;  %6421 = vpow2.f32 %v2336_v57 }
 0x8bc   : > { %2364 = vadd.xlane.f32.xlu1 %v7763_v45 }
 0x8c0   : > { %2370 = vadd.xlane.f32.xlu1 %v7766_v20 }
 0x8c1   : > { %v7769_v10 = vpop.eup %6413 }
 0x8c2   : > { %2378 = vadd.xlane.f32.xlu0 %v7769_v10  ;;  %v7772_v60 = vpop.eup %6415 }
 0x8c4   : > { %2366 = vadd.xlane.f32.xlu1 %v7772_v60 }
 0x8c5   : > { %v7775_v59 = vpop.eup %6417 }
 0x8c6   : > { %2374 = vadd.xlane.f32.xlu0 %v7775_v59  ;;  %v7778_v7 = vpop.eup %6419 }
 0x8c7   : > { %v7781_v29 = vpop.eup %6421 }
 0x8c8   : > { %2372 = vadd.xlane.f32.xlu1 %v7778_v7 }
 0x8cc   : > { %2368 = vadd.xlane.f32.xlu1 %v7781_v29 }
 0x8e0   : > { %v2301_v33 = vpop.xlane.xlu1 %2300 }
 0x8e1   : > { %v2317_v17 = vsub.f32 %v7718_v62, %v2301_v33 }
 0x8e3   : > { %v2348_v23 = vmul.f32 1.442695, %v2317_v17 }
 0x8e4   : > { %v2297_v15 = vpop.xlane.xlu1 %2296 }
 0x8e5   : > { %6423 = vpow2.f32 %v2348_v23  ;;  %v2315_v26 = vsub.f32 %v7722_v8, %v2297_v15 }
 0x8e7   : > { %v2344_v40 = vmul.f32 1.442695, %v2315_v26 }
 0x8e9   : > { %6425 = vpow2.f32 %v2344_v40 }
 0x8f2   : > { %v7786_v51 = vpop.eup %6423 }
 0x8f3   : > { %2380 = vadd.xlane.f32.xlu0 %v7786_v51 }
 0x8f6   : > { %v7789_v53 = vpop.eup %6425 }
 0x8f7   : > { %2376 = vadd.xlane.f32.xlu1 %v7789_v53 }
 0x900   : > { %v2355_v54 = vpop.xlane.xlu1 %2354 }
 0x904   : > { %v2351_v34 = vpop.xlane.xlu1 %2350 }
 0x908   : > { %v2357_v55 = vpop.xlane.xlu1 %2356  ;;  %2563 = vrot.lane.b32.xlu1 %v7108_v37, %s6762_s1 }
 0x909   : > { %2561 = vrot.lane.b32.xlu0 %v7135_v50, %s6762_s1  ;;  %6427 = vrcp.f32 %v2357_v55 }
 0x90a   : > { %6429 = vrcp.f32 %v2351_v34 }
 0x90b   : > { %6431 = vrcp.f32 %v2355_v54 }
 0x90c   : > { %v2353_v62 = vpop.xlane.xlu1 %2352  ;;  %2543 = vrot.lane.b32.xlu1 %v7088_v2, %s6763_s27 }
 0x90d   : > { %6433 = vrcp.f32 %v2353_v62  ;;  %2559 = vrot.lane.b32.xlu0 %v7118_v46, %s6762_s1 }
 0x910   : > { %2547 = vrot.lane.b32.xlu1 %v7094_v16, %s6763_s27 }
 0x911   : > { %2545 = vrot.lane.b32.xlu0 %v7086_v63, %s6763_s27 }
 0x914   : > { %2551 = vrot.lane.b32.xlu1 %v7102_v31, %s6763_s27 }
 0x915   : > { %2549 = vrot.lane.b32.xlu0 %v7092_v13, %s6763_s27 }
 0x916   : > { %v6428_v8 = vpop.eup %6427 }
 0x917   : > { %v6430_v5 = vpop.eup %6429  ;;  %v2401_v57 = vmul.f32 %v6428_v8, %v7732_v39 }
 0x918   : > { %2555 = vrot.lane.b32.xlu1 %v7120_v47, %s6763_s27  ;;  %v6432_v58 = vpop.eup %6431  ;;  %v2398_v33 = vmul.f32 %v6430_v5, %v7729_v36  ;;  %v2572_v47 = vpop.permute.xlu0 %2571 }
 0x919   : > { %2553 = vrot.lane.b32.xlu0 %v7098_v28, %s6763_s27  ;;  %v2400_v63 = vmul.f32 %v6432_v58, %v7726_v38  ;;  %v2621_v28 = vsel %vm1216_vm2, %v7759_v9, 0  ;;  %v2568_v38 = vpop.permute.xlu1 %2567 }
 0x91a   : > { %v6434_v2 = vpop.eup %6433 }
 0x91b   : > { %v2399_v16 = vmul.f32 %v6434_v2, %v7735_v35  ;;  %v2415_v31 = vpack.c.bf16 %v2401_v57, %v2400_v63  ;;  %v2612_v35 = vsel %vm1216_vm2, %v2568_v38, 0 }
 0x91c   : > { %2884 = vrot.lane.b32.xlu1 %v7122_v48, %s6764_s4  ;;  %v2618_v48 = vsel %vm1216_vm2, %v2572_v47, 0  ;;  %v2570_v36 = vpop.permute.xlu0 %2569 }
 0x91d   : > { %2557 = vrot.lane.b32.xlu0 %v7112_v44, %s6763_s27  ;;  %v2414_v13 = vpack.c.bf16 %v2399_v16, %v2398_v33  ;;  %v2615_v44 = vsel %vm1216_vm2, %v2570_v36, 0 }
 0x91f   : > { %5779 = vmatprep.mubr.bf16.mxu0 %v2414_v13 }
 0x920   : > { %5780 = vmatmul.mubr.bf16.vlgmr.msra.gmra.mxu0 %v2415_v31  ;;  %v2566_v39 = vpop.permute.xlu0 %2565 }
 0x921   : > { %5796 = vmatpush3.bf16.xpose.msra.mxu0 %v2621_v28  ;;  %2886 = vrot.lane.b32.xlu0 %v7110_v41, %s6764_s4  ;;  %v2609_v17 = vsel %vm1216_vm2, %v2566_v39, 0 }
 0x922   : > { %6036 = vmatprep.subr.msk.bf16.mxu0 %vm1216_vm2, %v2572_v47 }
 0x929   : > { %5798 = vmatpush3.bf16.xpose.msra.mxu0 %v2618_v48 }
 0x92a   : > { %6037 = vmatprep.subr.msk.bf16.mxu0 %vm1216_vm2, %v2570_v36 }
 0x931   : > { %5800 = vmatpush3.bf16.xpose.msra.mxu0 %v2615_v44 }
 0x932   : > { %6038 = vmatprep.subr.msk.bf16.mxu0 %vm1216_vm2, %v2568_v38 }
 0x939   : > { %5802 = vmatpush3.bf16.xpose.msra.mxu0 %v2612_v35 }
 0x93a   : > { %6039 = vmatprep.subr.msk.bf16.mxu0 %vm1216_vm2, %v2566_v39 }
 0x93b   : > { %v2363_v41 = vpop.xlane.xlu0 %2362 }
 0x93f   : > { %v2361_v9 = vpop.xlane.xlu0 %2360 }
 0x940   : > { %6435 = vrcp.f32 %v2361_v9 }
 0x941   : > { %5804 = vmatpush3.bf16.xpose.msra.mxu0 %v2609_v17  ;;  %v2359_v23 = vpop.xlane.xlu1 %2358 }
 0x942   : > { %6437 = vrcp.f32 %v2359_v23 }
 0x943   : > { %6439 = vrcp.f32 %v2363_v41 }
 0x945   : > { %v2365_v15 = vpop.xlane.xlu1 %2364 }
 0x946   : > { %6441 = vrcp.f32 %v2365_v15 }
 0x949   : > { %v2371_v26 = vpop.xlane.xlu1 %2370 }
 0x94d   : > { %v2367_v40 = vpop.xlane.xlu1 %2366  ;;  %v6436_v54 = vpop.eup %6435 }
 0x94e   : > { %v2403_v62 = vmul.f32 %v6436_v54, %v7752_v61 }
 0x94f   : > { %v6438_v34 = vpop.eup %6437 }
 0x950   : > { %v2402_v55 = vmul.f32 %v6438_v34, %v7755_v30  ;;  %v6440_v8 = vpop.eup %6439 }
 0x951   : > { %v2373_v5 = vpop.xlane.xlu1 %2372  ;;  %v2404_v57 = vmul.f32 %v6440_v8, %v7747_v42 }
 0x952   : > { %v2416_v58 = vpack.c.bf16 %v2403_v62, %v2402_v55  ;;  %6443 = vrcp.f32 %v2373_v5 }
 0x953   : > { %v6442_v2 = vpop.eup %6441  ;;  %6445 = vrcp.f32 %v2367_v40 }
 0x954   : > { %5783 = vmatprep.mubr.bf16.mxu0 %v2416_v58  ;;  %v2405_v33 = vmul.f32 %v6442_v2, %v7763_v45  ;;  %6447 = vrcp.f32 %v2371_v26  ;;  %v2379_v45 = vpop.xlane.xlu0 %2378 }
 0x955   : > { %v2369_v16 = vpop.xlane.xlu1 %2368 }
 0x956   : > { %6449 = vrcp.f32 %v2369_v16  ;;  %v2417_v63 = vpack.c.bf16 %v2405_v33, %v2404_v57 }
 0x958   : > { %5784 = vmatmul.mubr.bf16.gmra.mxu0 %v2417_v63  ;;  %v2375_v38 = vpop.xlane.xlu0 %2374 }
 0x95f   : > { %v6444_v13 = vpop.eup %6443 }
 0x960   : > { %v6446_v30 = vpop.eup %6445  ;;  %v2409_v28 = vmul.f32 %v6444_v13, %v7778_v7 }
 0x961   : > { %v6448_v31 = vpop.eup %6447  ;;  %v2406_v47 = vmul.f32 %v6446_v30, %v7772_v60 }
 0x962   : > { %v2408_v36 = vmul.f32 %v6448_v31, %v7766_v20 }
 0x963   : > { %v6450_v61 = vpop.eup %6449 }
 0x964   : > { %v2407_v48 = vmul.f32 %v6450_v61, %v7781_v29  ;;  %v2419_v44 = vpack.c.bf16 %v2409_v28, %v2408_v36 }
 0x966   : > { %v2418_v42 = vpack.c.bf16 %v2407_v48, %v2406_v47 }
 0x968   : > { %5787 = vmatprep.mubr.bf16.mxu0 %v2418_v42 }
 0x969   : > { %5788 = vmatmul.mubr.bf16.gmra.mxu0 %v2419_v44 }
 0x97c   : > { %v2381_v39 = vpop.xlane.xlu0 %2380 }
 0x97d   : > { %6451 = vrcp.f32 %v2381_v39 }
 0x97e   : > { %6453 = vrcp.f32 %v2375_v38 }
 0x97f   : > { %6455 = vrcp.f32 %v2379_v45 }
 0x980   : > { %v2377_v35 = vpop.xlane.xlu1 %2376  ;;  %v2562_v41 = vpop.permute.xlu0 %2561 }
 0x981   : > { %6457 = vrcp.f32 %v2377_v35  ;;  %v2603_v54 = vsel %vm1216_vm2, %v2562_v41, 0 }
 0x984   : > { %v2564_v7 = vpop.permute.xlu1 %2563  ;;  %v2560_v9 = vpop.permute.xlu0 %2559 }
 0x985   : > { %6040 = vmatprep.subr.msk.bf16.mxu0 %vm1216_vm2, %v2564_v7  ;;  %v2606_v60 = vsel %vm1216_vm2, %v2564_v7, 0 }
 0x986   : > { %5806 = vmatpush3.bf16.xpose.msra.mxu0 %v2606_v60 }
 0x987   : > { %6041 = vmatprep.subr.msk.bf16.mxu0 %vm1216_vm2, %v2562_v41 }
 0x988   : > { %v2544_v20 = vpop.permute.xlu1 %2543  ;;  %v2546_v29 = vpop.permute.xlu0 %2545 }
 0x98a   : > { %v6452_v17 = vpop.eup %6451 }
 0x98b   : > { %v6454_v23 = vpop.eup %6453  ;;  %v2413_v55 = vmul.f32 %v6452_v17, %v7786_v51  ;;  %v2600_v51 = vsel %vm1216_vm2, %v2560_v9, 0 }
 0x98c   : > { %v2548_v15 = vpop.permute.xlu1 %2547  ;;  %v2550_v26 = vpop.permute.xlu0 %2549  ;;  %v2410_v62 = vmul.f32 %v6454_v23, %v7775_v59 }
 0x98d   : > { %v6456_v40 = vpop.eup %6455 }
 0x98e   : > { %v6458_v34 = vpop.eup %6457  ;;  %5808 = vmatpush3.bf16.xpose.msra.mxu0 %v2603_v54  ;;  %v2412_v2 = vmul.f32 %v6456_v40, %v7769_v10 }
 0x98f   : > { %6042 = vmatprep.subr.msk.bf16.mxu0 %vm1216_vm2, %v2560_v9  ;;  %v2411_v8 = vmul.f32 %v6458_v34, %v7789_v53 }
 0x990   : > { %v2552_v5 = vpop.permute.xlu1 %2551  ;;  %v2554_v58 = vpop.permute.xlu0 %2553  ;;  %v2421_v33 = vpack.c.bf16 %v2413_v55, %v2412_v2 }
 0x991   : > { %v2420_v57 = vpack.c.bf16 %v2411_v8, %v2410_v62 }
 0x993   : > { %5791 = vmatprep.mubr.bf16.mxu0 %v2420_v57 }
 0x994   : > { %v2556_v16 = vpop.permute.xlu1 %2555  ;;  %5792 = vmatmul.mubr.bf16.gmra.mxu0 %v2421_v33  ;;  %v2558_v63 = vpop.permute.xlu0 %2557 }
 0x995   : > { %5811 = vmatprep.mubr.msk.bf16.mxu0 %vm1216_vm2, %v2544_v20 }
 0x996   : > { %5810 = vmatpush3.bf16.xpose.msra.mxu0 %v2600_v51 }
 0x998   : > { %v2887_v13 = vpop.permute.xlu0 %2886  ;;  %v2885_v59 = vpop.permute.xlu1 %2884 }
 0x999   : > { %5827 = vmatprep.subr.bf16.mxu0 %v2887_v13  ;;  %5995 = vmatprep.subr.bf16.mxu1 %v2887_v13 }
 0x99a   : > { %6003 = vmatpush3.bf16.msra.mxu1 %v2887_v13 }
 0x99b   : > { %5996 = vmatprep.subr.bf16.mxu1 %v2885_v59 }
 0x99d   : > { %5812 = vmatmul.mubr.msk.bf16.vlgmr.msra.gmra.mxu0 %vm1216_vm2, %v2546_v29 }
 0x99e   : > { %5815 = vmatprep.mubr.msk.bf16.mxu0 %vm1216_vm2, %v2548_v15  ;;  %5828 = vmatpush3.bf16.msra.mxu0 %v2887_v13 }
 0x99f   : > { %6004 = vmatpush3.bf16.msra.mxu1 %v2885_v59  ;;  %5829 = vmatprep.subr.bf16.mxu0 %v2885_v59 }
 0x9a2   : > { %5830 = vmatpush3.bf16.msra.mxu0 %v2885_v59 }
 0x9a5   : > { %5816 = vmatmul.mubr.msk.bf16.gmra.mxu0 %vm1216_vm2, %v2550_v26 }
 0x9a6   : > { %5819 = vmatprep.mubr.msk.bf16.mxu0 %vm1216_vm2, %v2552_v5 }
 0x9ad   : > { %5820 = vmatmul.mubr.msk.bf16.gmra.mxu0 %vm1216_vm2, %v2554_v58 }
 0x9ae   : > { %5823 = vmatprep.mubr.msk.bf16.mxu0 %vm1216_vm2, %v2556_v16 }
 0x9b5   : > { %5824 = vmatmul.mubr.msk.bf16.gmra.mxu0 %vm1216_vm2, %v2558_v63 }
 0x9e0   : > { %v7850_v10 = vpop.f32.mrf.mxu0 }
 0x9e2   : > { %v7852_v53 = vpop.f32.mrf.mxu0 }
 0x9e4   : > { %v7854_v30 = vpop.f32.mrf.mxu0 }
 0x9e6   : > { %v7858_v61 = vpop.f32.mrf.mxu0 }
 0xa18   : > { %v7862_v47 = vpop.f32.mrf.mxu0 }
 0xa1a   : > { %v7864_v48 = vpop.f32.mrf.mxu0 }
 0xa1c   : > { %v7866_v36 = vpop.f32.mrf.mxu0 }
 0xa1e   : > { %v7870_v44 = vpop.f32.mrf.mxu0 }
 0xa29   : > { %v7874_v38 = vpop.f32.mrf.mxu0 }
 0xa2b   : > { %v7876_v39 = vpop.f32.mrf.mxu0 }
 0xa2d   : > { %v7878_v35 = vpop.f32.mrf.mxu0 }
 0xa2f   : > { %v7882_v7 = vpop.f32.mrf.mxu0 }
 0xa54   : > { %v7886_v60 = vpop.f32.mrf.mxu0 }
 0xa56   : > { %v7888_v20 = vpop.f32.mrf.mxu0 }
 0xa57   : > { %9165 = vst [vmem:[#allocation42_spill] sm:$0xff] %v7888_v20 }
 0xa58   : > { %v7890_v29 = vpop.f32.mrf.mxu0 }
 0xa5a   : > { %v7894_v23 = vpop.f32.mrf.mxu0 }
 0xa5b   : > { %9166 = vst [vmem:[#allocation43_spill] sm:$0xff] %v7894_v23 }
 0xa5d   : > { %v5813_v26 = vpop.f32.mrf.mxu0 }
 0xa5e   : > { %v2666_v40 = vadd.f32 %v7654_v11, %v5813_v26 }
 0xa5f   : > { %v2657_v54 = vpop.f32.mrf.mxu0 }
 0xa60   : > { %v2658_v34 = vadd.f32 %v7654_v11, %v2657_v54  ;;  %2724 = vmax.xlane.f32.xlu0 %v2666_v40 }
 0xa61   : > { %v5814_v55 = vpop.f32.mrf.mxu0 }
 0xa62   : > { %2720 = vmax.xlane.f32.xlu1 %v2658_v34  ;;  %v2669_v8 = vadd.f32 %v7654_v11, %v5814_v55 }
 0xa63   : > { %v2660_v62 = vpop.f32.mrf.mxu0 }
 0xa64   : > { %v2661_v5 = vadd.f32 %v7654_v11, %v2660_v62 }
 0xa65   : > { %v5817_v58 = vpop.f32.mrf.mxu0 }
 0xa66   : > { %2722 = vmax.xlane.f32.xlu0 %v2661_v5  ;;  %2726 = vmax.xlane.f32.xlu1 %v2669_v8  ;;  %v2682_v57 = vadd.f32 %v7654_v11, %v5817_v58 }
 0xa67   : > { %v2673_v2 = vpop.f32.mrf.mxu0 }
 0xa68   : > { %v2674_v51 = vadd.f32 %v7654_v11, %v2673_v2 }
 0xa69   : > { %v5818_v33 = vpop.f32.mrf.mxu0 }
 0xa6a   : > { %v7904_v16 = vadd.f32 %v7654_v11, %v5818_v33  ;;  %2732 = vmax.xlane.f32.xlu0 %v2682_v57 }
 0xa6b   : > { %v2676_v63 = vpop.f32.mrf.mxu0 }
 0xa6c   : > { %2734 = vmax.xlane.f32.xlu1 %v7904_v16  ;;  %v2677_v59 = vadd.f32 %v7654_v11, %v2676_v63 }
 0xa6d   : > { %v5821_v13 = vpop.f32.mrf.mxu0 }
 0xa6e   : > { %2728 = vmax.xlane.f32.xlu0 %v2674_v51  ;;  %v7910_v54 = vadd.f32 %v7654_v11, %v5821_v13 }
 0xa6f   : > { %v2689_v26 = vpop.f32.mrf.mxu0 }
 0xa70   : > { %2730 = vmax.xlane.f32.xlu1 %v2677_v59  ;;  %v7917_v2 = vadd.f32 %v7654_v11, %v2689_v26 }
 0xa71   : > { %v5822_v55 = vpop.f32.mrf.mxu0 }
 0xa72   : > { %v7913_v62 = vadd.f32 %v7654_v11, %v5822_v55  ;;  %2740 = vmax.xlane.f32.xlu0 %v7910_v54 }
 0xa73   : > { %v2692_v58 = vpop.f32.mrf.mxu0 }
 0xa74   : > { %2742 = vmax.xlane.f32.xlu1 %v7913_v62  ;;  %v7921_v63 = vadd.f32 %v7654_v11, %v2692_v58 }
 0xa75   : > { %v5825_v33 = vpop.f32.mrf.mxu0 }
 0xa76   : > { %2736 = vmax.xlane.f32.xlu0 %v7917_v2  ;;  %v7925_v13 = vadd.f32 %v7654_v11, %v5825_v33 }
 0xa77   : > { %v2705_v55 = vpop.f32.mrf.mxu0 }
 0xa78   : > { %2738 = vmax.xlane.f32.xlu1 %v7921_v63  ;;  %v7930_v15 = vadd.f32 %v7654_v11, %v2705_v55 }
 0xa79   : > { %v5826_v26 = vpop.f32.mrf.mxu0 }
 0xa7a   : > { %2748 = vmax.xlane.f32.xlu0 %v7925_v13  ;;  %v7942_v58 = vadd.f32 %v7654_v11, %v5826_v26 }
 0xa7b   : > { %v2708_v33 = vpop.f32.mrf.mxu0 }
 0xa7c   : > { %v7946_v55 = vadd.f32 %v7654_v11, %v2708_v33 }
 0xa7e   : > { %2744 = vmax.xlane.f32.xlu0 %v7930_v15 }
 0xa89   : > { %2878 = vrot.lane.b32.xlu1 %v7128_v49, %s6764_s4 }
 0xa94   : > { %2882 = vrot.lane.b32.xlu0 %v7096_v24, %s6764_s4 }
 0xa98   : > { %2880 = vrot.lane.b32.xlu0 %v7104_v32, %s6764_s4 }
 0xa9c   : > { %2874 = vrot.lane.b32.xlu0 %v7135_v50, %s6764_s4 }
 0xaad   : > { %2750 = vmax.xlane.f32.xlu1 %v7942_v58 }
 0xab1   : > { %2746 = vmax.xlane.f32.xlu1 %v7946_v55 }
 0xac2   : > { %2876 = vrot.lane.b32.xlu1 %v7108_v37, %s6764_s4 }
 0xae9   : > { %v2725_v24 = vpop.xlane.xlu0 %2724 }
 0xaea   : > { %v2754_v32 = vsub.f32 %v2666_v40, %v2725_v24 }
 0xaeb   : > { %v2721_v49 = vpop.xlane.xlu1 %2720 }
 0xaec   : > { %v2772_v17 = vmul.f32 1.442695, %v2754_v32  ;;  %v2752_v50 = vsub.f32 %v2658_v34, %v2721_v49 }
 0xaee   : > { %6459 = vpow2.f32 %v2772_v17  ;;  %v2768_v9 = vmul.f32 1.442695, %v2752_v50 }
 0xaef   : > { %v2727_v26 = vpop.xlane.xlu1 %2726  ;;  %v2723_v41 = vpop.xlane.xlu0 %2722 }
 0xaf0   : > { %v2755_v42 = vsub.f32 %v2669_v8, %v2727_v26  ;;  %6461 = vpow2.f32 %v2768_v9  ;;  %v2753_v45 = vsub.f32 %v2661_v5, %v2723_v41 }
 0xaf2   : > { %v2774_v31 = vmul.f32 1.442695, %v2755_v42  ;;  %v2770_v20 = vmul.f32 1.442695, %v2753_v45 }
 0xaf3   : > { %v2733_v11 = vpop.xlane.xlu0 %2732 }
 0xaf4   : > { %v2758_v33 = vsub.f32 %v2682_v57, %v2733_v11  ;;  %6463 = vpow2.f32 %v2774_v31 }
 0xaf5   : > { %v2735_v28 = vpop.xlane.xlu1 %2734 }
 0xaf6   : > { %v2780_v23 = vmul.f32 1.442695, %v2758_v33  ;;  %v2759_v40 = vsub.f32 %v7904_v16, %v2735_v28 }
 0xaf7   : > { %v2729_v37 = vpop.xlane.xlu0 %2728 }
 0xaf8   : > { %6465 = vpow2.f32 %v2780_v23  ;;  %v2756_v24 = vsub.f32 %v2674_v51, %v2729_v37  ;;  %v2782_v42 = vmul.f32 1.442695, %v2759_v40 }
 0xaf9   : > { %v2731_v34 = vpop.xlane.xlu1 %2730  ;;  %6467 = vpow2.f32 %v2770_v20 }
 0xafa   : > { %v2776_v17 = vmul.f32 1.442695, %v2756_v24  ;;  %v2757_v32 = vsub.f32 %v2677_v59, %v2731_v34 }
 0xafb   : > { %v7952_v49 = vpop.eup %6459  ;;  %v2741_v9 = vpop.xlane.xlu0 %2740 }
 0xafc   : > { %6469 = vpow2.f32 %v2776_v17  ;;  %v2778_v41 = vmul.f32 1.442695, %v2757_v32  ;;  %v2762_v8 = vsub.f32 %v7910_v54, %v2741_v9  ;;  %2804 = vadd.xlane.f32.xlu1 %v7952_v49 }
 0xafd   : > { %v2743_v31 = vpop.xlane.xlu1 %2742  ;;  %v7956_v45 = vpop.eup %6461 }
 0xafe   : > { %6471 = vpow2.f32 %v2778_v41  ;;  %v2788_v23 = vmul.f32 1.442695, %v2762_v8  ;;  %v2763_v51 = vsub.f32 %v7913_v62, %v2743_v31 }
 0xaff   : > { %v2737_v28 = vpop.xlane.xlu0 %2736  ;;  %6473 = vpow2.f32 %v2782_v42 }
 0xb00   : > { %v2760_v20 = vsub.f32 %v7917_v2, %v2737_v28  ;;  %2800 = vadd.xlane.f32.xlu1 %v7956_v45  ;;  %6475 = vpow2.f32 %v2788_v23  ;;  %v2790_v37 = vmul.f32 1.442695, %v2763_v51  ;;  %v9167_v23 = vpack.i.bf16 %v7609_v56, %v7605_v19 }
 0xb01   : > { %v2739_v5 = vpop.xlane.xlu1 %2738  ;;  %v7961_v16 = vpop.eup %6463  ;;  %v9170_v19 = vpack.i.bf16 %v7870_v44, %v7864_v48  ;;  %v9172_v44 = vpack.i.bf16 %v7613_v14, %v7607_v21  ;;  %v9176_v21 = vpack.i.bf16 %v7633_v18, %v7629_v1 }
 0xb02   : > { %v2761_v57 = vsub.f32 %v7921_v63, %v2739_v5  ;;  %v2784_v54 = vmul.f32 1.442695, %v2760_v20  ;;  %v9168_v20 = vpack.i.bf16 %v7858_v61, %v7852_v53 }
 0xb03   : > { %v2749_v59 = vpop.xlane.xlu0 %2748 }
 0xb04   : > { %v2786_v50 = vmul.f32 1.442695, %v2761_v57  ;;  %v2766_v26 = vsub.f32 %v7925_v13, %v2749_v59  ;;  %2806 = vadd.xlane.f32.xlu1 %v7961_v16  ;;  %v9169_v57 = vpack.i.bf16 %v7625_v25, %v7619_v6  ;;  %v9171_v6 = vpack.i.bf16 %v7637_v43, %v7631_v12 }
 0xb05   : > { %v7966_v11 = vpop.eup %6465  ;;  %v2879_v9 = vpop.permute.xlu1 %2878  ;;  %v9173_v12 = vpack.i.bf16 %v7854_v30, %v7850_v10  ;;  %v9174_v43 = vpack.i.bf16 %v7621_v4, %v7617_v27 }
 0xb06   : > { %6477 = vpow2.f32 %v2786_v50  ;;  %v2796_v2 = vmul.f32 1.442695, %v2766_v26  ;;  %2812 = vadd.xlane.f32.xlu0 %v7966_v11  ;;  %v7969_v33 = vpop.eup %6467 }
 0xb07   : > { %v2745_v63 = vpop.xlane.xlu0 %2744  ;;  %6479 = vpow2.f32 %v2784_v54 }
 0xb08   : > { %v2764_v62 = vsub.f32 %v7930_v15, %v2745_v63  ;;  %2802 = vadd.xlane.f32.xlu1 %v7969_v33  ;;  %6481 = vpow2.f32 %v2796_v2 }
 0xb09   : > { %v7973_v40 = vpop.eup %6469  ;;  %6483 = vpow2.f32 %v2790_v37 }
 0xb0a   : > { %v2792_v13 = vmul.f32 1.442695, %v2764_v62  ;;  %2808 = vadd.xlane.f32.xlu0 %v7973_v40 }
 0xb0b   : > { %v7976_v24 = vpop.eup %6471  ;;  %v2883_v34 = vpop.permute.xlu0 %2882 }
 0xb0c   : > { %2810 = vadd.xlane.f32.xlu1 %v7976_v24  ;;  %5831 = vmatprep.subr.bf16.mxu0 %v2883_v34  ;;  %v7979_v17 = vpop.eup %6473  ;;  %6485 = vpow2.f32 %v2792_v13 }
 0xb0d   : > { %5997 = vmatprep.subr.bf16.mxu1 %v2883_v34  ;;  %5832 = vmatpush3.bf16.msra.mxu0 %v2883_v34  ;;  %v7982_v32 = vpop.eup %6475 }
 0xb0e   : > { %6005 = vmatpush3.bf16.msra.mxu1 %v2883_v34  ;;  %2814 = vadd.xlane.f32.xlu0 %v7979_v17 }
 0xb0f   : > { %v2881_v15 = vpop.permute.xlu0 %2880 }
 0xb10   : > { %5833 = vmatprep.subr.bf16.mxu0 %v2881_v15  ;;  %5998 = vmatprep.subr.bf16.mxu1 %v2881_v15 }
 0xb11   : > { %5834 = vmatpush3.bf16.msra.mxu0 %v2881_v15 }
 0xb12   : > { %6006 = vmatpush3.bf16.msra.mxu1 %v2881_v15  ;;  %2820 = vadd.xlane.f32.xlu0 %v7982_v32 }
 0xb13   : > { %v7985_v42 = vpop.eup %6477  ;;  %5835 = vmatprep.subr.bf16.mxu0 %v2879_v9  ;;  %5999 = vmatprep.subr.bf16.mxu1 %v2879_v9  ;;  %v2875_v61 = vpop.permute.xlu0 %2874 }
 0xb14   : > { %2818 = vadd.xlane.f32.xlu1 %v7985_v42  ;;  %v7988_v41 = vpop.eup %6479 }
 0xb15   : > { %5836 = vmatpush3.bf16.msra.mxu0 %v2879_v9  ;;  %v7991_v8 = vpop.eup %6481 }
 0xb16   : > { %6007 = vmatpush3.bf16.msra.mxu1 %v2879_v9  ;;  %2816 = vadd.xlane.f32.xlu0 %v7988_v41  ;;  %v7994_v31 = vpop.eup %6483 }
 0xb18   : > { %2828 = vadd.xlane.f32.xlu1 %v7991_v8 }
 0xb19   : > { %v7997_v28 = vpop.eup %6485 }
 0xb1a   : > { %2822 = vadd.xlane.f32.xlu0 %v7994_v31 }
 0xb1c   : > { %2824 = vadd.xlane.f32.xlu1 %v7997_v28 }
 0xb2d   : > { %2872 = vrot.lane.b32.xlu1 %v7118_v46, %s6764_s4  ;;  %s9205_s4 = scalar_lea.vmem %s9063_s10, %s6966_s2  ;;  %s9206_s2 = sld [smem:[#allocation12_spill]] }
 0xb31   : > { %6143 = vrot.lane.b32.xlu1 %v9167_v23, %s6765_s29 }
 0xb33   : > { %p5296_p1 = scmp.ne.s32.totalorder %s9206_s2, 1 }
 0xb34   : > { %s9207_s19 = sld [smem:[#allocation52_spill]] (!%p5296_p1) }
 0xb35   : > { %6148 = vrot.lane.b32.xlu1 %v9168_v20, %s6766_s18  ;;  %s9213_s1 = sld [smem:[#allocation53_spill]] (!%p5296_p1) }
 0xb36   : > { %v2751_v5 = vpop.xlane.xlu1 %2750  ;;  %s9215_s17 = sld [smem:[#allocation57_spill]] (!%p5296_p1) }
 0xb37   : > { %v2767_v46 = vsub.f32 %v7942_v58, %v2751_v5  ;;  %v9175_v58 = vpack.i.bf16 %v7866_v36, %v7862_v47 }
 0xb39   : > { %6158 = vrot.lane.b32.xlu1 %v9169_v57, %s6765_s29  ;;  %v2798_v53 = vmul.f32 1.442695, %v2767_v46 }
 0xb3a   : > { %v2747_v51 = vpop.xlane.xlu1 %2746 }
 0xb3b   : > { %v2765_v59 = vsub.f32 %v7946_v55, %v2747_v51 }
 0xb3d   : > { %v2794_v54 = vmul.f32 1.442695, %v2765_v59  ;;  %6168 = vrot.lane.b32.xlu1 %v9170_v19, %s6766_s18 }
 0xb3e   : > { %v2877_v56 = vpop.permute.xlu1 %2876 }
 0xb3f   : > { %6487 = vpow2.f32 %v2794_v54  ;;  %5837 = vmatprep.subr.bf16.mxu0 %v2877_v56  ;;  %6000 = vmatprep.subr.bf16.mxu1 %v2877_v56 }
 0xb40   : > { %5838 = vmatpush3.bf16.msra.mxu0 %v2877_v56  ;;  %6008 = vmatpush3.bf16.msra.mxu1 %v2877_v56  ;;  %6489 = vpow2.f32 %v2798_v53 }
 0xb41   : > { %6178 = vrot.lane.b32.xlu1 %v9171_v6, %s6765_s29  ;;  %5839 = vmatprep.subr.bf16.mxu0 %v2875_v61 }
 0xb42   : > { %6001 = vmatprep.subr.bf16.mxu1 %v2875_v61 }
 0xb44   : > { %5840 = vmatpush3.bf16.msra.mxu0 %v2875_v61  ;;  %6009 = vmatpush3.bf16.msra.mxu1 %v2875_v61 }
 0xb4c   : > { %v8024_v25 = vpop.eup %6487 }
 0xb4d   : > { %2826 = vadd.xlane.f32.xlu0 %v8024_v25  ;;  %v8027_v48 = vpop.eup %6489 }
 0xb51   : > { %2830 = vadd.xlane.f32.xlu0 %v8027_v48 }
 0xb67   : > { %6138 = vrot.lane.b32.xlu0 %v9172_v44, %s6765_s29 }
 0xb6b   : > { %6153 = vrot.lane.b32.xlu0 %v9173_v12, %s6766_s18 }
 0xb6f   : > { %6163 = vrot.lane.b32.xlu0 %v9174_v43, %s6765_s29 }
 0xb73   : > { %6173 = vrot.lane.b32.xlu0 %v9175_v58, %s6766_s18 }
 0xb77   : > { %6183 = vrot.lane.b32.xlu0 %v9176_v21, %s6765_s29 }
 0xb85   : > { %v2805_v14 = vpop.xlane.xlu1 %2804 }
 0xb89   : > { %v2801_v55 = vpop.xlane.xlu1 %2800 }
 0xb8a   : > { %6491 = vrcp.f32 %v2801_v55 }
 0xb8d   : > { %v2807_v50 = vpop.xlane.xlu1 %2806 }
 0xb8f   : > { %v2813_v10 = vpop.xlane.xlu0 %2812 }
 0xb91   : > { %v2803_v30 = vpop.xlane.xlu1 %2802 }
 0xb92   : > { %6493 = vrcp.f32 %v2803_v30 }
 0xb93   : > { %v2809_v26 = vpop.xlane.xlu0 %2808 }
 0xb94   : > { %6495 = vrcp.f32 %v2809_v26 }
 0xb95   : > { %v2811_v27 = vpop.xlane.xlu1 %2810 }
 0xb96   : > { %6497 = vrcp.f32 %v2811_v27 }
 0xb97   : > { %6499 = vrcp.f32 %v2807_v50  ;;  %v2815_v4 = vpop.xlane.xlu0 %2814  ;;  %v6492_v36 = vpop.eup %6491 }
 0xb98   : > { %6501 = vrcp.f32 %v2815_v4  ;;  %v2848_v63 = vmul.f32 %v6492_v36, %v7956_v45  ;;  %v6259_v4 = vld [vmem:[%s6996_s3 + $0x8] sm:$0xff]  }
 0xb99   : > { %6503 = vrcp.f32 %v2805_v14 }
 0xb9a   : > { %6505 = vrcp.f32 %v2813_v10 }
 0xb9b   : > { %v2821_v47 = vpop.xlane.xlu0 %2820 }
 0xb9d   : > { %v2819_v1 = vpop.xlane.xlu1 %2818 }
 0xb9e   : > { %6507 = vrcp.f32 %v2819_v1 }
 0xb9f   : > { %v6494_v18 = vpop.eup %6493  ;;  %v2817_v2 = vpop.xlane.xlu0 %2816 }
 0xba0   : > { %6509 = vrcp.f32 %v2817_v2  ;;  %v2849_v37 = vmul.f32 %v6494_v18, %v7969_v33 }
 0xba1   : > { %v6496_v62 = vpop.eup %6495  ;;  %v2829_v13 = vpop.xlane.xlu1 %2828  ;;  %6511 = vrcp.f32 %v2821_v47  ;;  %v6260_v47 = vld [vmem:[%s6996_s3] sm:$0xff]  }
 0xba2   : > { %v2864_v34 = vpack.c.bf16 %v2849_v37, %v2848_v63  ;;  %v2852_v20 = vmul.f32 %v6496_v62, %v7973_v40 }
 0xba3   : > { %v6498_v15 = vpop.eup %6497  ;;  %v2823_v9 = vpop.xlane.xlu0 %2822 }
 0xba4   : > { %v6500_v23 = vpop.eup %6499  ;;  %6513 = vrcp.f32 %v2823_v9  ;;  %5843 = vmatprep.mubr.bf16.mxu0 %v2864_v34  ;;  %v2853_v5 = vmul.f32 %v6498_v15, %v7976_v24  ;;  %v9178_v9 = vpack.i.bf16 %v7882_v7, %v7876_v39  ;;  %v9181_v39 = vpack.i.bf16 %v7890_v29, %v7886_v60  ;;  %v9182_v7 = vld [vmem:[#allocation43_spill] sm:$0xff] }
 0xba5   : > { %v6502_v57 = vpop.eup %6501  ;;  %v2825_v51 = vpop.xlane.xlu1 %2824  ;;  %v2851_v33 = vmul.f32 %v6500_v23, %v7961_v16 }
 0xba6   : > { %v6504_v46 = vpop.eup %6503  ;;  %v2866_v59 = vpack.c.bf16 %v2853_v5, %v2852_v20  ;;  %v2855_v54 = vmul.f32 %v6502_v57, %v7979_v17  ;;  %6515 = vrcp.f32 %v2825_v51  ;;  %v9179_v5 = vpack.i.bf16 %v7645_v22, %v7641_v3 }
 0xba7   : > { %v6506_v45 = vpop.eup %6505  ;;  %v2850_v56 = vmul.f32 %v6504_v46, %v7952_v49  ;;  %v9183_v46 = vld [vmem:[#allocation42_spill] sm:$0xff] }
 0xba8   : > { %5847 = vmatprep.mubr.bf16.mxu1 %v2866_v59  ;;  %v2854_v53 = vmul.f32 %v6506_v45, %v7966_v11  ;;  %v9184_v3 = vpack.i.bf16 %v9182_v7, %v9183_v46  ;;  %v9189_v7 = vld [vmem:[#allocation33_spill] sm:$0xff] }
 0xba9   : > { %v2873_v19 = vpop.permute.xlu1 %2872  ;;  %v2865_v24 = vpack.c.bf16 %v2851_v33, %v2850_v56 }
 0xbaa   : > { %5841 = vmatprep.subr.bf16.mxu0 %v2873_v19  ;;  %6002 = vmatprep.subr.bf16.mxu1 %v2873_v19  ;;  %v2867_v61 = vpack.c.bf16 %v2855_v54, %v2854_v53 }
 0xbab   : > { %v6508_v40 = vpop.eup %6507  ;;  %5842 = vmatpush3.bf16.msra.mxu0 %v2873_v19  ;;  %6010 = vmatpush3.bf16.msra.mxu1 %v2873_v19 }
 0xbac   : > { %v2857_v16 = vmul.f32 %v6508_v40, %v7985_v42  ;;  %5859 = vmatprep.subr.bf16.mxu1 %v6259_v4 }
 0xbad   : > { %v6510_v6 = vpop.eup %6509  ;;  %v6144_v19 = vpop.permute.xlu1 %6143 }
 0xbae   : > { %5844 = vmatmul.mubr.bf16.vlgmr.msra.gmra.mxu0 %v2865_v24  ;;  %5848 = vmatmul.mubr.bf16.vlgmr.msra.gmra.mxu1 %v2867_v61  ;;  %v2856_v44 = vmul.f32 %v6510_v6, %v7988_v41  ;;  %v6512_v17 = vpop.eup %6511 }
 0xbaf   : > { %v2858_v49 = vmul.f32 %v6512_v17, %v7982_v32  ;;  %5860 = vmatpush3.bf16.msra.mxu1 %v6259_v4  ;;  %v6145_v17 = vunpack.i.l.bf16 %v6144_v19 }
 0xbb0   : > { %v2868_v12 = vpack.c.bf16 %v2857_v16, %v2856_v44  ;;  %5861 = vmatprep.subr.bf16.mxu1 %v6260_v47  ;;  %v6146_v16 = vunpack.i.h.bf16 %v6144_v19 }
 0xbb1   : > { %v6514_v43 = vpop.eup %6513  ;;  %v6149_v53 = vpop.permute.xlu1 %6148 }
 0xbb2   : > { %5851 = vmatprep.mubr.bf16.mxu1 %v2868_v12  ;;  %v2859_v11 = vmul.f32 %v6514_v43, %v7994_v31 }
 0xbb3   : > { %v6516_v41 = vpop.eup %6515  ;;  %5862 = vmatpush3.bf16.msra.mxu1 %v6260_v47 }
 0xbb4   : > { %v2869_v58 = vpack.c.bf16 %v2859_v11, %v2858_v49  ;;  %v2860_v55 = vmul.f32 %v6516_v41, %v7997_v28  ;;  %v9185_v11 = vld [vmem:[#allocation29_spill] sm:$0xff] }
 0xbb5   : > { %v6159_v60 = vpop.permute.xlu1 %6158 }
 0xbb6   : > { %5852 = vmatmul.mubr.bf16.gmra.mxu1 %v2869_v58 }
 0xbb9   : > { %v6169_v24 = vpop.permute.xlu1 %6168 }
 0xbbd   : > { %v8094_v12 = vpop.permute.xlu1 %6178 }
 0xbd6   : > { %v2827_v21 = vpop.xlane.xlu0 %2826 }
 0xbd7   : > { %6517 = vrcp.f32 %v2827_v21 }
 0xbd8   : > { %6519 = vrcp.f32 %v2829_v13  ;;  %v9177_v13 = vpack.i.bf16 %v7878_v35, %v7874_v38  ;;  %v9180_v38 = vpack.i.bf16 %v7649_v0, %v7643_v52 }
 0xbda   : > { %v2831_v14 = vpop.xlane.xlu0 %2830 }
 0xbdb   : > { %6521 = vrcp.f32 %v2831_v14  ;;  %v9186_v14 = vld [vmem:[#allocation27_spill] sm:$0xff] }
 0xbde   : > { %v6139_v0 = vpop.permute.xlu0 %6138 }
 0xbdf   : > { %v6141_v61 = vunpack.i.h.bf16 %v6139_v0  ;;  %v6140_v44 = vunpack.i.l.bf16 %v6139_v0 }
 0xbe1   : > { %v3186_v58 = vsel %vm1216_vm2, %v9185_v11, %v6141_v61  ;;  %v3185_v41 = vsel %vm1216_vm2, %v9186_v14, %v6140_v44  ;;  %v6181_v44 = vunpack.i.h.bf16 %v8094_v12 }
 0xbe2   : > { %v6154_v56 = vpop.permute.xlu0 %6153 }
 0xbe3   : > { %v6156_v43 = vunpack.i.h.bf16 %v6154_v56  ;;  %v6155_v49 = vunpack.i.l.bf16 %v6154_v56 }
 0xbe4   : > { %v6518_v42 = vpop.eup %6517 }
 0xbe5   : > { %v2861_v50 = vmul.f32 %v6518_v42, %v8024_v25  ;;  %v6520_v10 = vpop.eup %6519 }
 0xbe6   : > { %v2862_v31 = vmul.f32 %v6520_v10, %v7991_v8  ;;  %v6164_v40 = vpop.permute.xlu0 %6163 }
 0xbe7   : > { %v2870_v32 = vpack.c.bf16 %v2861_v50, %v2860_v55  ;;  %v9187_v50 = vld [vmem:[#allocation28_spill] sm:$0xff] }
 0xbe8   : > { %v6522_v30 = vpop.eup %6521  ;;  %v3188_v10 = vsel %vm1216_vm2, %v9187_v50, %v6146_v16 }
 0xbe9   : > { %5855 = vmatprep.mubr.bf16.mxu1 %v2870_v32  ;;  %v2863_v26 = vmul.f32 %v6522_v30, %v8027_v48  ;;  %v9188_v32 = vld [vmem:[#allocation26_spill] sm:$0xff]  ;;  %v3205_v4 = vsel %vm3201_vm3, %v3188_v10, %v6156_v43  ;;  %v6180_v43 = vunpack.i.l.bf16 %v8094_v12 }
 0xbea   : > { %v6174_v29 = vpop.permute.xlu0 %6173  ;;  %v3187_v30 = vsel %vm1216_vm2, %v9188_v32, %v6145_v17 }
 0xbeb   : > { %v2871_v27 = vpack.c.bf16 %v2863_v26, %v2862_v31  ;;  %v6151_v31 = vunpack.i.h.bf16 %v6149_v53  ;;  %v6150_v26 = vunpack.i.l.bf16 %v6149_v53  ;;  %v3204_v47 = vsel %vm3201_vm3, %v3187_v30, %v6155_v49 }
 0xbed   : > { %5856 = vmatmul.mubr.bf16.gmra.mxu1 %v2871_v27 }
 0xbee   : > { %v8092_v6 = vpop.permute.xlu0 %6183 }
 0xbef   : > { %v6186_v49 = vunpack.i.h.bf16 %v8092_v6  ;;  %v6185_v11 = vunpack.i.l.bf16 %v8092_v6 }
 0xc6e   : > { %v5845_v36 = vpop.f32.mrf.mxu0  ;;  %v5849_v1 = vpop.f32.mrf.mxu1 }
 0xc70   : > { %v2930_v28 = vpop.f32.mrf.mxu0  ;;  %v2946_v25 = vpop.f32.mrf.mxu1 }
 0xc72   : > { %v5846_v18 = vpop.f32.mrf.mxu0  ;;  %v5850_v2 = vpop.f32.mrf.mxu1 }
 0xc73   : > { %v6187_v63 = vpack.i.bf16 %v5846_v18, %v5845_v36  ;;  %v6207_v15 = vpack.i.bf16 %v5850_v2, %v5849_v1  ;;  %v3202_v18 = vsel %vm3201_vm3, %v3185_v41, %v6150_v26  ;;  %v3203_v2 = vsel %vm3201_vm3, %v3186_v58, %v6151_v31  ;;  %v9193_v31 = vld [vmem:[#allocation37_spill] sm:$0xff]  ;;  %v9194_v26 = vld [vmem:[#allocation35_spill] sm:$0xff] }
 0xc74   : > { %v2933_v37 = vpop.f32.mrf.mxu0  ;;  %v2949_v62 = vpop.f32.mrf.mxu1  ;;  %v3194_v12 = vsel %vm1216_vm2, %v9193_v31, %v6181_v44  ;;  %v3193_v6 = vsel %vm1216_vm2, %v9194_v26, %v6180_v43 }
 0xc75   : > { %v6192_v8 = vpack.i.bf16 %v2933_v37, %v2930_v28  ;;  %6188 = vrot.lane.b32.xlu0 %v6187_v63, %s6767_s26  ;;  %v6212_v23 = vpack.i.bf16 %v2949_v62, %v2946_v25  ;;  %v6161_v37 = vunpack.i.h.bf16 %v6159_v60 }
 0xc76   : > { %v5853_v48 = vpop.f32.mrf.mxu1 }
 0xc77   : > { %6193 = vrot.lane.b32.xlu1 %v6192_v8, %s6767_s26  ;;  %v3190_v46 = vsel %vm1216_vm2, %v9189_v7, %v6161_v37 }
 0xc78   : > { %v2962_v34 = vpop.f32.mrf.mxu1 }
 0xc79   : > { %6203 = vrot.lane.b32.xlu0 %v9177_v13, %s6766_s18  ;;  %v6166_v13 = vunpack.i.h.bf16 %v6164_v40 }
 0xc7a   : > { %v5854_v20 = vpop.f32.mrf.mxu1 }
 0xc7b   : > { %6198 = vrot.lane.b32.xlu1 %v9178_v9, %s6766_s18  ;;  %v6227_v51 = vpack.i.bf16 %v5854_v20, %v5853_v48  ;;  %v6160_v48 = vunpack.i.l.bf16 %v6159_v60  ;;  %v6175_v20 = vunpack.i.l.bf16 %v6174_v29 }
 0xc7c   : > { %v2965_v57 = vpop.f32.mrf.mxu1 }
 0xc7d   : > { %6208 = vrot.lane.b32.xlu0 %v6207_v15, %s6767_s26  ;;  %v6232_v35 = vpack.i.bf16 %v2965_v57, %v2962_v34  ;;  %v6165_v34 = vunpack.i.l.bf16 %v6164_v40  ;;  %v6171_v57 = vunpack.i.h.bf16 %v6169_v24 }
 0xc7f   : > { %6213 = vrot.lane.b32.xlu1 %v6212_v23, %s6767_s26  ;;  %v6176_v23 = vunpack.i.h.bf16 %v6174_v29  ;;  %v3207_v60 = vsel %vm3201_vm3, %v3190_v46, %v6171_v57 }
 0xc81   : > { %6223 = vrot.lane.b32.xlu0 %v9179_v5, %s6765_s29 }
 0xc83   : > { %6218 = vrot.lane.b32.xlu1 %v9180_v38, %s6765_s29 }
 0xc85   : > { %6228 = vrot.lane.b32.xlu0 %v6227_v51, %s6767_s26  ;;  %v6170_v51 = vunpack.i.l.bf16 %v6169_v24 }
 0xc87   : > { %6233 = vrot.lane.b32.xlu1 %v6232_v35, %s6767_s26 }
 0xc89   : > { %6243 = vrot.lane.b32.xlu0 %v9181_v39, %s6766_s18 }
 0xc8b   : > { %6238 = vrot.lane.b32.xlu1 %v9184_v3, %s6766_s18  ;;  %v9190_v3 = vld [vmem:[#allocation31_spill] sm:$0xff] }
 0xcad   : > { %v5857_v22 = vpop.f32.mrf.mxu1 }
 0xcaf   : > { %v2978_v59 = vpop.f32.mrf.mxu1 }
 0xcb1   : > { %v5858_v45 = vpop.f32.mrf.mxu1 }
 0xcb2   : > { %v6252_v33 = vpack.i.bf16 %v5858_v45, %v5857_v22  ;;  %v3189_v22 = vsel %vm1216_vm2, %v9190_v3, %v6160_v48  ;;  %v9197_v3 = vld [vmem:[#allocation40_spill] sm:$0xff] }
 0xcb3   : > { %v2981_v54 = vpop.f32.mrf.mxu1  ;;  %v3206_v40 = vsel %vm3201_vm3, %v3189_v22, %v6170_v51 }
 0xcb4   : > { %v6247_v52 = vpack.i.bf16 %v2981_v54, %v2978_v59  ;;  %6253 = vrot.lane.b32.xlu0 %v6252_v33, %s6767_s26  ;;  %v9191_v59 = vld [vmem:[#allocation32_spill] sm:$0xff]  ;;  %v9192_v33 = vld [vmem:[#allocation30_spill] sm:$0xff] }
 0xcb5   : > { %v3192_v45 = vsel %vm1216_vm2, %v9191_v59, %v6166_v13  ;;  %v3191_v54 = vsel %vm1216_vm2, %v9192_v33, %v6165_v34  ;;  %v9198_v59 = vld [vmem:[#allocation38_spill] sm:$0xff] }
 0xcb6   : > { %6248 = vrot.lane.b32.xlu1 %v6247_v52, %s6767_s26  ;;  %v3208_v0 = vsel %vm3201_vm3, %v3191_v54, %v6175_v20  ;;  %v3209_v19 = vsel %vm3201_vm3, %v3192_v45, %v6176_v23 }
 0xce7   : > { %v6189_v21 = vpop.permute.xlu0 %6188 }
 0xce8   : > { %v6191_v42 = vunpack.i.h.bf16 %v6189_v21  ;;  %v6190_v55 = vunpack.i.l.bf16 %v6189_v21 }
 0xce9   : > { %v6194_v27 = vpop.permute.xlu1 %6193 }
 0xcea   : > { %v6196_v36 = vunpack.i.h.bf16 %v6194_v27  ;;  %v6195_v1 = vunpack.i.l.bf16 %v6194_v27  ;;  %v3221_v28 = vsel %vm3218_vm4, %v3204_v47, %v6190_v55  ;;  %v3222_v25 = vsel %vm3218_vm4, %v3205_v4, %v6191_v42  ;;  %v9195_v27 = vld [vmem:[#allocation36_spill] sm:$0xff]  ;;  %v9196_v47 = vld [vmem:[#allocation34_spill] sm:$0xff] }
 0xceb   : > { %v6204_v63 = vpop.permute.xlu0 %6203  ;;  %v3236_v5 = vpack.c.bf16 %v3222_v25, %v3221_v28  ;;  %v3196_v4 = vsel %vm1216_vm2, %v9195_v27, %v6186_v49 }
 0xcec   : > { %v3219_v62 = vsel %vm3218_vm4, %v3202_v18, %v6195_v1  ;;  %v3220_v8 = vsel %vm3218_vm4, %v3203_v2, %v6196_v36  ;;  %v6206_v14 = vunpack.i.h.bf16 %v6204_v63  ;;  %v6205_v41 = vunpack.i.l.bf16 %v6204_v63 }
 0xced   : > { %v3235_v15 = vpack.c.bf16 %v3220_v8, %v3219_v62  ;;  %v6199_v9 = vpop.permute.xlu1 %6198  ;;  %v3195_v36 = vsel %vm1216_vm2, %v9196_v47, %v6185_v11  ;;  %v6590_v47 = vld [vmem:[#allocation2 + $0x8] sm:$0xff] }
 0xcee   : > { %v6201_v55 = vunpack.i.h.bf16 %v6199_v9  ;;  %v6200_v50 = vunpack.i.l.bf16 %v6199_v9  ;;  %v3212_v28 = vsel %vm3201_vm3, %v3195_v36, %v6205_v41  ;;  %v3213_v25 = vsel %vm3201_vm3, %v3196_v4, %v6206_v14  ;;  %v8177_v14 = vld [vmem:[%s901_s21] ss:$0 sm:$0xff]  ;;  %s9208_s21 = sld [smem:[#allocation24_spill]] (!%p5296_p1) }
 0xcef   : > { %v6209_v38 = vpop.permute.xlu0 %6208  ;;  %5863 = vmatprep.mubr.msk.bf16.mxu1 %vm1032_vm1, %v3235_v15 }
 0xcf0   : > { %v6211_v35 = vunpack.i.h.bf16 %v6209_v38  ;;  %v6210_v39 = vunpack.i.l.bf16 %v6209_v38  ;;  %5864 = vmatmul.mubr.msk.bf16.vlgmr.msra.gmra.mxu1 %vm1032_vm1, %v3236_v5  ;;  %v3211_v63 = vsel %vm3201_vm3, %v3194_v12, %v6201_v55  ;;  %v3210_v37 = vsel %vm3201_vm3, %v3193_v6, %v6200_v50  ;;  %v6588_v50 = vld [vmem:[#allocation2] sm:$0xff]  ;;  %v6589_v12 = vld [vmem:[#allocation2 + $0x18] sm:$0xff] }
 0xcf1   : > { %v6214_v52 = vpop.permute.xlu1 %6213 }
 0xcf2   : > { %v6216_v56 = vunpack.i.h.bf16 %v6214_v52  ;;  %v6215_v53 = vunpack.i.l.bf16 %v6214_v52  ;;  %v3225_v29 = vsel %vm3218_vm4, %v3208_v0, %v6210_v39  ;;  %v3226_v24 = vsel %vm3218_vm4, %v3209_v19, %v6211_v35  ;;  %v9199_v52 = vld [vmem:[#allocation41_spill] sm:$0xff]  ;;  %v9200_v19 = vld [vmem:[#allocation39_spill] sm:$0xff] }
 0xcf3   : > { %v6224_v61 = vpop.permute.xlu0 %6223  ;;  %v3238_v42 = vpack.c.bf16 %v3226_v24, %v3225_v29 }
 0xcf4   : > { %v3224_v16 = vsel %vm3218_vm4, %v3207_v60, %v6216_v56  ;;  %v3223_v17 = vsel %vm3218_vm4, %v3206_v40, %v6215_v53  ;;  %v6226_v23 = vunpack.i.h.bf16 %v6224_v61  ;;  %v6225_v20 = vunpack.i.l.bf16 %v6224_v61 }
 0xcf5   : > { %v3237_v58 = vpack.c.bf16 %v3224_v16, %v3223_v17  ;;  %v6219_v21 = vpop.permute.xlu1 %6218 }
 0xcf6   : > { %v6221_v57 = vunpack.i.h.bf16 %v6219_v21  ;;  %v6220_v51 = vunpack.i.l.bf16 %v6219_v21  ;;  %v3200_v22 = vsel %vm1216_vm2, %v9197_v3, %v6226_v23  ;;  %v3199_v45 = vsel %vm1216_vm2, %v9198_v59, %v6225_v20  ;;  %v6593_v20 = vld [vmem:[#allocation2 + $0x28] sm:$0xff] }
 0xcf7   : > { %v6229_v10 = vpop.permute.xlu0 %6228  ;;  %5867 = vmatprep.mubr.msk.bf16.mxu1 %vm1032_vm1, %v3237_v58 }
 0xcf8   : > { %v6231_v32 = vunpack.i.h.bf16 %v6229_v10  ;;  %v6230_v30 = vunpack.i.l.bf16 %v6229_v10  ;;  %5868 = vmatmul.mubr.msk.bf16.gmra.mxu1 %vm1032_vm1, %v3238_v42  ;;  %v3198_v0 = vsel %vm1216_vm2, %v9199_v52, %v6221_v57  ;;  %v3197_v56 = vsel %vm1216_vm2, %v9200_v19, %v6220_v51  ;;  %v6594_v57 = vld [vmem:[#allocation2 + $0x30] sm:$0xff] }
 0xcf9   : > { %v6234_v1 = vpop.permute.xlu1 %6233 }
 0xcfa   : > { %v6236_v18 = vunpack.i.h.bf16 %v6234_v1  ;;  %v6235_v2 = vunpack.i.l.bf16 %v6234_v1  ;;  %v3229_v62 = vsel %vm3218_vm4, %v3212_v28, %v6230_v30  ;;  %v3230_v8 = vsel %vm3218_vm4, %v3213_v25, %v6231_v32  ;;  %v6591_v28 = vld [vmem:[#allocation2 + $0x10] sm:$0xff] }
 0xcfb   : > { %v3240_v15 = vpack.c.bf16 %v3230_v8, %v3229_v62  ;;  %v6244_v9 = vpop.permute.xlu0 %6243 }
 0xcfc   : > { %v3228_v48 = vsel %vm3218_vm4, %v3211_v63, %v6236_v18  ;;  %v3227_v13 = vsel %vm3218_vm4, %v3210_v37, %v6235_v2  ;;  %v6246_v38 = vunpack.i.h.bf16 %v6244_v9  ;;  %v6245_v35 = vunpack.i.l.bf16 %v6244_v9 }
 0xcfd   : > { %v3239_v34 = vpack.c.bf16 %v3228_v48, %v3227_v13  ;;  %v6239_v5 = vpop.permute.xlu1 %6238  ;;  %v6592_v48 = vld [vmem:[#allocation2 + $0x20] sm:$0xff] }
 0xcfe   : > { %v6241_v39 = vunpack.i.h.bf16 %v6239_v5  ;;  %v6240_v7 = vunpack.i.l.bf16 %v6239_v5  ;;  %v3216_v53 = vsel %vm3201_vm3, %v3199_v45, %v6245_v35  ;;  %v3217_v40 = vsel %vm3201_vm3, %v3200_v22, %v6246_v38  ;;  %v6595_v35 = vld [vmem:[#allocation2 + $0x38] sm:$0xff] }
 0xcff   : > { %5871 = vmatprep.mubr.msk.bf16.mxu1 %vm1032_vm1, %v3239_v34 }
 0xd00   : > { %5872 = vmatmul.mubr.msk.bf16.gmra.mxu1 %vm1032_vm1, %v3240_v15  ;;  %v3215_v16 = vsel %vm3201_vm3, %v3198_v0, %v6241_v39  ;;  %v3214_v17 = vsel %vm3201_vm3, %v3197_v56, %v6240_v7 }
 0xd26   : > { %v6254_v46 = vpop.permute.xlu0 %6253 }
 0xd27   : > { %v6256_v33 = vunpack.i.h.bf16 %v6254_v46  ;;  %v6255_v54 = vunpack.i.l.bf16 %v6254_v46 }
 0xd28   : > { %v6249_v60 = vpop.permute.xlu1 %6248 }
 0xd29   : > { %v3233_v29 = vsel %vm3218_vm4, %v3216_v53, %v6255_v54  ;;  %v3234_v24 = vsel %vm3218_vm4, %v3217_v40, %v6256_v33  ;;  %v6251_v61 = vunpack.i.h.bf16 %v6249_v60  ;;  %v6250_v44 = vunpack.i.l.bf16 %v6249_v60  ;;  %v6596_v54 = vld [vmem:[#allocation2 + $0x40] sm:$0xff]  ;;  %v6597_v53 = vld [vmem:[#allocation2 + $0x48] sm:$0xff]  ;;  %v6598_v60 = vld [vmem:[#allocation2 + $0x50] sm:$0xff] }
 0xd2a   : > { %v3242_v43 = vpack.c.bf16 %v3234_v24, %v3233_v29  ;;  %v6599_v24 = vld [vmem:[#allocation2 + $0x58] sm:$0xff] }
 0xd2b   : > { %v3232_v49 = vsel %vm3218_vm4, %v3215_v16, %v6251_v61  ;;  %v3231_v11 = vsel %vm3218_vm4, %v3214_v17, %v6250_v44 }
 0xd2c   : > { %v3241_v58 = vpack.c.bf16 %v3232_v49, %v3231_v11 }
 0xd2e   : > { %5875 = vmatprep.mubr.msk.bf16.mxu1 %vm1032_vm1, %v3241_v58 }
 0xd2f   : > { %5876 = vmatmul.mubr.msk.bf16.gmra.mxu1 %vm1032_vm1, %v3242_v43 }
 0xdb0   : > { %v5865_v21 = vpop.f32.mrf.mxu1 }
 0xdb1   : > { %v3333_v31 = vadd.f32 %v5865_v21, %v8177_v14 }
 0xdb2   : > { %v3324_v41 = vpop.f32.mrf.mxu1 }
 0xdb3   : > { %v3325_v42 = vadd.f32 %v8177_v14, %v3324_v41  ;;  %v8191_v25 = vadd.f32 %v6591_v28, %v3333_v31 }
 0xdb4   : > { %v5866_v55 = vpop.f32.mrf.mxu1 }
 0xdb5   : > { %v8180_v10 = vadd.f32 %v6588_v50, %v3325_v42  ;;  %v3336_v32 = vadd.f32 %v5866_v55, %v8177_v14  ;;  %v3411_v9 = vsel %vm1032_vm1, %v8191_v25, 0.0  ;;  %v6600_v42 = vld [vmem:[#allocation2 + $0x60] sm:$0xff] }
 0xdb6   : > { %v3327_v30 = vpop.f32.mrf.mxu1 }
 0xdb7   : > { %v8184_v26 = vadd.f32 %v6589_v12, %v3336_v32  ;;  %v3328_v6 = vadd.f32 %v8177_v14, %v3327_v30  ;;  %v3405_v27 = vsel %vm1032_vm1, %v8180_v10, 0.0  ;;  %v6601_v32 = vld [vmem:[#allocation2 + $0x70] sm:$0xff] }
 0xdb8   : > { %v5869_v4 = vpop.f32.mrf.mxu1  ;;  %3406 = vadd.xlane.f32.xlu1 %v3405_v27  ;;  %v6602_v27 = vld [vmem:[#allocation2 + $0x68] sm:$0xff] }
 0xdb9   : > { %v8189_v36 = vadd.f32 %v6590_v47, %v3328_v6  ;;  %v3414_v63 = vsel %vm1032_vm1, %v8184_v26, 0.0  ;;  %v3349_v62 = vadd.f32 %v5869_v4, %v8177_v14  ;;  %v6603_v47 = vld [vmem:[#allocation2 + $0x78] sm:$0xff] }
 0xdba   : > { %v3340_v1 = vpop.f32.mrf.mxu1 }
 0xdbb   : > { %v3341_v18 = vadd.f32 %v8177_v14, %v3340_v1  ;;  %v3408_v2 = vsel %vm1032_vm1, %v8189_v36, 0.0  ;;  %v8207_v51 = vadd.f32 %v6594_v57, %v3349_v62 }
 0xdbc   : > { %v5870_v37 = vpop.f32.mrf.mxu1  ;;  %3409 = vadd.xlane.f32.xlu0 %v3408_v2  ;;  %3415 = vadd.xlane.f32.xlu1 %v3414_v63 }
 0xdbd   : > { %v8199_v13 = vadd.f32 %v6592_v48, %v3341_v18  ;;  %v3352_v34 = vadd.f32 %v5870_v37, %v8177_v14  ;;  %v3423_v33 = vsel %vm1032_vm1, %v8207_v51, 0.0 }
 0xdbe   : > { %v3343_v8 = vpop.f32.mrf.mxu1 }
 0xdbf   : > { %v3344_v15 = vadd.f32 %v8177_v14, %v3343_v8  ;;  %v8209_v39 = vadd.f32 %v6595_v35, %v3352_v34  ;;  %v3417_v46 = vsel %vm1032_vm1, %v8199_v13, 0.0 }
 0xdc0   : > { %v5873_v23 = vpop.f32.mrf.mxu1  ;;  %3412 = vadd.xlane.f32.xlu0 %v3411_v9 }
 0xdc1   : > { %v8205_v5 = vadd.f32 %v6593_v20, %v3344_v15  ;;  %v3365_v59 = vadd.f32 %v5873_v23, %v8177_v14  ;;  %v3426_v56 = vsel %vm1032_vm1, %v8209_v39, 0.0 }
 0xdc2   : > { %v3356_v38 = vpop.f32.mrf.mxu1 }
 0xdc3   : > { %v3357_v7 = vadd.f32 %v8177_v14, %v3356_v38  ;;  %v3420_v3 = vsel %vm1032_vm1, %v8205_v5, 0.0  ;;  %v8227_v29 = vadd.f32 %v6598_v60, %v3365_v59 }
 0xdc4   : > { %v5874_v22 = vpop.f32.mrf.mxu1  ;;  %3418 = vadd.xlane.f32.xlu0 %v3417_v46  ;;  %3421 = vadd.xlane.f32.xlu1 %v3420_v3 }
 0xdc5   : > { %v8219_v52 = vadd.f32 %v6596_v54, %v3357_v7  ;;  %v3368_v0 = vadd.f32 %v5874_v22, %v8177_v14  ;;  %v3435_v17 = vsel %vm1032_vm1, %v8227_v29, 0.0 }
 0xdc6   : > { %v3359_v45 = vpop.f32.mrf.mxu1 }
 0xdc7   : > { %v3360_v19 = vadd.f32 %v8177_v14, %v3359_v45  ;;  %v8229_v61 = vadd.f32 %v6599_v24, %v3368_v0  ;;  %v3429_v44 = vsel %vm1032_vm1, %v8219_v52, 0.0 }
 0xdc8   : > { %3424 = vadd.xlane.f32.xlu0 %v3423_v33  ;;  %3427 = vadd.xlane.f32.xlu1 %v3426_v56 }
 0xdc9   : > { %v8225_v40 = vadd.f32 %v6597_v53, %v3360_v19  ;;  %v3438_v43 = vsel %vm1032_vm1, %v8229_v61, 0.0 }
 0xdcb   : > { %v3432_v16 = vsel %vm1032_vm1, %v8225_v40, 0.0 }
 0xdcc   : > { %3430 = vadd.xlane.f32.xlu0 %v3429_v44  ;;  %3433 = vadd.xlane.f32.xlu1 %v3432_v16 }
 0xdd0   : > { %3436 = vadd.xlane.f32.xlu0 %v3435_v17  ;;  %3439 = vadd.xlane.f32.xlu1 %v3438_v43 }
 0xdef   : > { %v5877_v49 = vpop.f32.mrf.mxu1 }
 0xdf0   : > { %v3381_v58 = vadd.f32 %v5877_v49, %v8177_v14 }
 0xdf1   : > { %v3372_v11 = vpop.f32.mrf.mxu1 }
 0xdf2   : > { %v3373_v21 = vadd.f32 %v8177_v14, %v3372_v11  ;;  %v8243_v30 = vadd.f32 %v6601_v32, %v3381_v58 }
 0xdf3   : > { %v5878_v41 = vpop.f32.mrf.mxu1 }
 0xdf4   : > { %v8241_v55 = vadd.f32 %v6600_v42, %v3373_v21  ;;  %v3384_v31 = vadd.f32 %v5878_v41, %v8177_v14  ;;  %v3447_v28 = vsel %vm1032_vm1, %v8243_v30, 0.0 }
 0xdf5   : > { %v3375_v50 = vpop.f32.mrf.mxu1 }
 0xdf6   : > { %v3376_v12 = vadd.f32 %v8177_v14, %v3375_v50  ;;  %v3441_v6 = vsel %vm1032_vm1, %v8241_v55, 0.0  ;;  %v8251_v1 = vadd.f32 %v6603_v47, %v3384_v31 }
 0xdf7   : > { %3442 = vadd.xlane.f32.xlu0 %v3441_v6 }
 0xdf8   : > { %v8249_v4 = vadd.f32 %v6602_v27, %v3376_v12  ;;  %v3450_v14 = vsel %vm1032_vm1, %v8251_v1, 0.0 }
 0xdfa   : > { %v3444_v18 = vsel %vm1032_vm1, %v8249_v4, 0.0 }
 0xdfb   : > { %3448 = vadd.xlane.f32.xlu0 %v3447_v28  ;;  %3445 = vadd.xlane.f32.xlu1 %v3444_v18 }
 0xdff   : > { %3451 = vadd.xlane.f32.xlu1 %v3450_v14 }
 0xe41   : > { %v3407_v2 = vpop.xlane.xlu1 %3406 }
 0xe42   : > { %v3454_v63 = vmul.f32 0.03125, %v3407_v2 }
 0xe44   : > { %v8260_v37 = vsub.f32 %v8180_v10, %v3454_v63  ;;  %v6262_v63 = vld [vmem:[%s7013_s5] sm:$0xff]  }
 0xe45   : > { %v3410_v62 = vpop.xlane.xlu0 %3409  ;;  %v3416_v8 = vpop.xlane.xlu1 %3415 }
 0xe46   : > { %v3455_v48 = vmul.f32 0.03125, %v3410_v62  ;;  %v3457_v34 = vmul.f32 0.03125, %v3416_v8  ;;  %v3486_v15 = vmul.f32 %v8260_v37, %v8260_v37 }
 0xe48   : > { %v8265_v9 = vsub.f32 %v8189_v36, %v3455_v48  ;;  %v8268_v23 = vsub.f32 %v8184_v26, %v3457_v34  ;;  %v3502_v20 = vsel %vm1032_vm1, %v3486_v15, 0.0 }
 0xe49   : > { %v3413_v57 = vpop.xlane.xlu0 %3412  ;;  %3503 = vadd.xlane.f32.xlu0 %v3502_v20 }
 0xe4a   : > { %v3456_v38 = vmul.f32 0.03125, %v3413_v57  ;;  %v3487_v10 = vmul.f32 %v8265_v9, %v8265_v9  ;;  %v3489_v36 = vmul.f32 %v8268_v23, %v8268_v23 }
 0xe4c   : > { %v8274_v35 = vsub.f32 %v8191_v25, %v3456_v38  ;;  %v3505_v7 = vsel %vm1032_vm1, %v3487_v10, 0.0  ;;  %v3511_v54 = vsel %vm1032_vm1, %v3489_v36, 0.0 }
 0xe4d   : > { %v3419_v46 = vpop.xlane.xlu0 %3418  ;;  %3506 = vadd.xlane.f32.xlu1 %v3505_v7  ;;  %v3422_v26 = vpop.xlane.xlu1 %3421 }
 0xe4e   : > { %v3458_v3 = vmul.f32 0.03125, %v3419_v46  ;;  %v3459_v22 = vmul.f32 0.03125, %v3422_v26  ;;  %v3488_v59 = vmul.f32 %v8274_v35, %v8274_v35 }
 0xe50   : > { %v8282_v45 = vsub.f32 %v8199_v13, %v3458_v3  ;;  %v8285_v33 = vsub.f32 %v8205_v5, %v3459_v22  ;;  %v3508_v25 = vsel %vm1032_vm1, %v3488_v59, 0.0 }
 0xe51   : > { %v3425_v0 = vpop.xlane.xlu0 %3424  ;;  %3509 = vadd.xlane.f32.xlu0 %v3508_v25  ;;  %3512 = vadd.xlane.f32.xlu1 %v3511_v54  ;;  %v3428_v19 = vpop.xlane.xlu1 %3427  ;;  %v6263_v54 = vld [vmem:[%s7027_s30 + $0x18] sm:$0xff]  }
 0xe52   : > { %v3460_v56 = vmul.f32 0.03125, %v3425_v0  ;;  %v3461_v53 = vmul.f32 0.03125, %v3428_v19  ;;  %v3490_v60 = vmul.f32 %v8282_v45, %v8282_v45  ;;  %v3491_v13 = vmul.f32 %v8285_v33, %v8285_v33  ;;  %5899 = vmatprep.subr.bf16.mxu1 %v6263_v54 }
 0xe53   : > { %5900 = vmatpush3.bf16.msra.mxu1 %v6263_v54 }
 0xe54   : > { %v8294_v24 = vsub.f32 %v8207_v51, %v3460_v56  ;;  %v8297_v5 = vsub.f32 %v8209_v39, %v3461_v53  ;;  %v3514_v44 = vsel %vm1032_vm1, %v3490_v60, 0.0  ;;  %v3517_v16 = vsel %vm1032_vm1, %v3491_v13, 0.0 }
 0xe55   : > { %v3431_v17 = vpop.xlane.xlu0 %3430  ;;  %3515 = vadd.xlane.f32.xlu0 %v3514_v44  ;;  %3518 = vadd.xlane.f32.xlu1 %v3517_v16  ;;  %v3434_v43 = vpop.xlane.xlu1 %3433 }
 0xe56   : > { %v3462_v49 = vmul.f32 0.03125, %v3431_v17  ;;  %v3463_v11 = vmul.f32 0.03125, %v3434_v43  ;;  %v3492_v58 = vmul.f32 %v8294_v24, %v8294_v24  ;;  %v3493_v51 = vmul.f32 %v8297_v5, %v8297_v5 }
 0xe58   : > { %v8306_v21 = vsub.f32 %v8219_v52, %v3462_v49  ;;  %v8309_v39 = vsub.f32 %v8225_v40, %v3463_v11  ;;  %v3520_v41 = vsel %vm1032_vm1, %v3492_v58, 0.0  ;;  %v3523_v42 = vsel %vm1032_vm1, %v3493_v51, 0.0 }
 0xe59   : > { %v3437_v50 = vpop.xlane.xlu0 %3436  ;;  %3521 = vadd.xlane.f32.xlu0 %v3520_v41  ;;  %3524 = vadd.xlane.f32.xlu1 %v3523_v42  ;;  %v3440_v32 = vpop.xlane.xlu1 %3439 }
 0xe5a   : > { %v3464_v31 = vmul.f32 0.03125, %v3437_v50  ;;  %v3465_v12 = vmul.f32 0.03125, %v3440_v32  ;;  %v3494_v6 = vmul.f32 %v8306_v21, %v8306_v21  ;;  %v3495_v52 = vmul.f32 %v8309_v39, %v8309_v39 }
 0xe5c   : > { %v8318_v40 = vsub.f32 %v8227_v29, %v3464_v31  ;;  %v8321_v27 = vsub.f32 %v8229_v61, %v3465_v12  ;;  %v3526_v47 = vsel %vm1032_vm1, %v3494_v6, 0.0  ;;  %v3529_v28 = vsel %vm1032_vm1, %v3495_v52, 0.0  ;;  %v6261_v61 = vld [vmem:[%s7013_s5 + $0x8] sm:$0xff]  }
 0xe5d   : > { %3527 = vadd.xlane.f32.xlu0 %v3526_v47  ;;  %3530 = vadd.xlane.f32.xlu1 %v3529_v28 }
 0xe5e   : > { %v3496_v18 = vmul.f32 %v8318_v40, %v8318_v40  ;;  %v3497_v14 = vmul.f32 %v8321_v27, %v8321_v27  ;;  %5879 = vmatprep.subr.bf16.mxu0 %v6261_v61 }
 0xe5f   : > { %5880 = vmatpush3.bf16.msra.mxu0 %v6261_v61 }
 0xe60   : > { %v3532_v2 = vsel %vm1032_vm1, %v3496_v18, 0.0  ;;  %v3535_v29 = vsel %vm1032_vm1, %v3497_v14, 0.0  ;;  %5881 = vmatprep.subr.bf16.mxu0 %v6262_v63  ;;  %v8363_v18 = vld [vmem:[%s9203_s16] ss:$0 sm:$0xff] }
 0xe61   : > { %3533 = vadd.xlane.f32.xlu0 %v3532_v2  ;;  %3536 = vadd.xlane.f32.xlu1 %v3535_v29 }
 0xe63   : > { %5882 = vmatpush3.bf16.msra.mxu0 %v6262_v63 }
 0xe80   : > { %v3443_v62 = vpop.xlane.xlu0 %3442 }
 0xe81   : > { %v3466_v8 = vmul.f32 0.03125, %v3443_v62 }
 0xe83   : > { %v8334_v48 = vsub.f32 %v8241_v55, %v3466_v8 }
 0xe84   : > { %v3449_v34 = vpop.xlane.xlu0 %3448  ;;  %v3446_v15 = vpop.xlane.xlu1 %3445 }
 0xe85   : > { %v3468_v20 = vmul.f32 0.03125, %v3449_v34  ;;  %v3467_v57 = vmul.f32 0.03125, %v3446_v15  ;;  %v3498_v38 = vmul.f32 %v8334_v48, %v8334_v48 }
 0xe87   : > { %v8339_v10 = vsub.f32 %v8243_v30, %v3468_v20  ;;  %v8342_v7 = vsub.f32 %v8249_v4, %v3467_v57  ;;  %v3538_v36 = vsel %vm1032_vm1, %v3498_v38, 0.0  ;;  %v8372_v20 = vld [vmem:[%s9204_s0] ss:$0 sm:$0xff]  ;;  %s9209_s0 = sld [smem:[#allocation54_spill]] (!%p5296_p1) }
 0xe88   : > { %3539 = vadd.xlane.f32.xlu0 %v3538_v36  ;;  %v3452_v46 = vpop.xlane.xlu1 %3451 }
 0xe89   : > { %v3469_v55 = vmul.f32 0.03125, %v3452_v46  ;;  %v3500_v26 = vmul.f32 %v8339_v10, %v8339_v10  ;;  %v3499_v3 = vmul.f32 %v8342_v7, %v8342_v7 }
 0xe8b   : > { %v8350_v22 = vsub.f32 %v8251_v1, %v3469_v55  ;;  %v3544_v30 = vsel %vm1032_vm1, %v3500_v26, 0.0  ;;  %v3541_v59 = vsel %vm1032_vm1, %v3499_v3, 0.0 }
 0xe8c   : > { %3545 = vadd.xlane.f32.xlu0 %v3544_v30  ;;  %3542 = vadd.xlane.f32.xlu1 %v3541_v59 }
 0xe8d   : > { %v3501_v4 = vmul.f32 %v8350_v22, %v8350_v22  ;;  %s9210_s27 = smov (!%p5296_p1), %s9209_s0 }
 0xe8f   : > { %v3547_v25 = vsel %vm1032_vm1, %v3501_v4, 0.0 }
 0xe90   : > { %3548 = vadd.xlane.f32.xlu1 %v3547_v25 }
 0xed2   : > { %v3504_v0 = vpop.xlane.xlu0 %3503 }
 0xed3   : > { %v3550_v19 = vmul.f32 0.03125, %v3504_v0 }
 0xed5   : > { %v3566_v56 = vadd.f32 1e-05, %v3550_v19 }
 0xed6   : > { %v3507_v1 = vpop.xlane.xlu1 %3506 }
 0xed7   : > { %6523 = vrsqrt.f32 %v3566_v56  ;;  %v3551_v53 = vmul.f32 0.03125, %v3507_v1 }
 0xed9   : > { %v3567_v60 = vadd.f32 1e-05, %v3551_v53 }
 0xeda   : > { %v3510_v13 = vpop.xlane.xlu0 %3509  ;;  %v3513_v44 = vpop.xlane.xlu1 %3512 }
 0xedb   : > { %6525 = vrsqrt.f32 %v3567_v60  ;;  %v3552_v16 = vmul.f32 0.03125, %v3510_v13  ;;  %v3553_v17 = vmul.f32 0.03125, %v3513_v44 }
 0xedd   : > { %v3568_v43 = vadd.f32 1e-05, %v3552_v16  ;;  %v3569_v49 = vadd.f32 1e-05, %v3553_v17 }
 0xede   : > { %v3516_v11 = vpop.xlane.xlu0 %3515  ;;  %v3519_v58 = vpop.xlane.xlu1 %3518 }
 0xedf   : > { %6527 = vrsqrt.f32 %v3568_v43  ;;  %v3554_v51 = vmul.f32 0.03125, %v3516_v11  ;;  %v3555_v41 = vmul.f32 0.03125, %v3519_v58 }
 0xee0   : > { %6529 = vrsqrt.f32 %v3569_v49 }
 0xee1   : > { %v3570_v42 = vadd.f32 1e-05, %v3554_v51  ;;  %v3571_v50 = vadd.f32 1e-05, %v3555_v41 }
 0xee2   : > { %v3522_v32 = vpop.xlane.xlu0 %3521  ;;  %v3525_v31 = vpop.xlane.xlu1 %3524 }
 0xee3   : > { %6531 = vrsqrt.f32 %v3570_v42  ;;  %v3556_v12 = vmul.f32 0.03125, %v3522_v32  ;;  %v3557_v6 = vmul.f32 0.03125, %v3525_v31 }
 0xee4   : > { %v6524_v52 = vpop.eup %6523  ;;  %6533 = vrsqrt.f32 %v3571_v50 }
 0xee5   : > { %v3572_v47 = vadd.f32 1e-05, %v3556_v12  ;;  %v3573_v28 = vadd.f32 1e-05, %v3557_v6  ;;  %v3598_v14 = vmul.f32 %v6524_v52, %v8260_v37 }
 0xee6   : > { %v3528_v2 = vpop.xlane.xlu0 %3527  ;;  %v3531_v29 = vpop.xlane.xlu1 %3530 }
 0xee7   : > { %6535 = vrsqrt.f32 %v3572_v47  ;;  %v3558_v61 = vmul.f32 0.03125, %v3528_v2  ;;  %v3559_v63 = vmul.f32 0.03125, %v3531_v29  ;;  %v3620_v8 = vmul.f32 %v8363_v18, %v3598_v14 }
 0xee8   : > { %v6526_v62 = vpop.eup %6525  ;;  %6537 = vrsqrt.f32 %v3573_v28 }
 0xee9   : > { %v3574_v34 = vadd.f32 1e-05, %v3558_v61  ;;  %v3575_v15 = vadd.f32 1e-05, %v3559_v63  ;;  %v3599_v57 = vmul.f32 %v6526_v62, %v8265_v9  ;;  %v8377_v3 = vadd.f32 %v8372_v20, %v3620_v8 }
 0xeea   : > { %v3534_v37 = vpop.xlane.xlu0 %3533  ;;  %v3537_v38 = vpop.xlane.xlu1 %3536 }
 0xeeb   : > { %6539 = vrsqrt.f32 %v3574_v34  ;;  %v3560_v36 = vmul.f32 0.03125, %v3534_v37  ;;  %v3561_v46 = vmul.f32 0.03125, %v3537_v38  ;;  %v3621_v55 = vmul.f32 %v8363_v18, %v3599_v57 }
 0xeec   : > { %v6528_v26 = vpop.eup %6527  ;;  %6541 = vrsqrt.f32 %v3575_v15 }
 0xeed   : > { %v6530_v30 = vpop.eup %6529  ;;  %v3600_v59 = vmul.f32 %v6528_v26, %v8274_v35  ;;  %v3576_v4 = vadd.f32 1e-05, %v3560_v36  ;;  %v3577_v25 = vadd.f32 1e-05, %v3561_v46  ;;  %v8381_v54 = vadd.f32 %v8372_v20, %v3621_v55 }
 0xeee   : > { %v3601_v9 = vmul.f32 %v6530_v30, %v8268_v23 }
 0xeef   : > { %6543 = vrsqrt.f32 %v3576_v4  ;;  %v3658_v0 = vpack.c.bf16 %v8381_v54, %v8377_v3  ;;  %v3622_v19 = vmul.f32 %v8363_v18, %v3600_v59 }
 0xef0   : > { %v6532_v56 = vpop.eup %6531  ;;  %6545 = vrsqrt.f32 %v3577_v25  ;;  %v3623_v1 = vmul.f32 %v8363_v18, %v3601_v9 }
 0xef1   : > { %v6534_v53 = vpop.eup %6533  ;;  %5883 = vmatprep.mubr.msk.bf16.mxu0 %vm1032_vm1, %v3658_v0  ;;  %v8390_v35 = vadd.f32 %v8372_v20, %v3622_v19  ;;  %v3602_v60 = vmul.f32 %v6532_v56, %v8282_v45 }
 0xef2   : > { %v8394_v23 = vadd.f32 %v8372_v20, %v3623_v1  ;;  %v3603_v13 = vmul.f32 %v6534_v53, %v8285_v33 }
 0xef3   : > { %v3624_v44 = vmul.f32 %v8363_v18, %v3602_v60 }
 0xef4   : > { %v6536_v16 = vpop.eup %6535  ;;  %v3659_v17 = vpack.c.bf16 %v8394_v23, %v8390_v35  ;;  %v3625_v43 = vmul.f32 %v8363_v18, %v3603_v13 }
 0xef5   : > { %v6538_v49 = vpop.eup %6537  ;;  %v8402_v11 = vadd.f32 %v8372_v20, %v3624_v44  ;;  %v3604_v58 = vmul.f32 %v6536_v16, %v8294_v24 }
 0xef6   : > { %5884 = vmatmul.mubr.msk.bf16.vlgmr.msra.gmra.mxu0 %vm1032_vm1, %v3659_v17  ;;  %v8407_v45 = vadd.f32 %v8372_v20, %v3625_v43  ;;  %v3605_v33 = vmul.f32 %v6538_v49, %v8297_v5 }
 0xef7   : > { %v3626_v51 = vmul.f32 %v8363_v18, %v3604_v58  ;;  %v6264_v58 = vld [vmem:[%s7027_s30 + $0x10] sm:$0xff]  }
 0xef8   : > { %v6540_v41 = vpop.eup %6539  ;;  %v3660_v42 = vpack.c.bf16 %v8407_v45, %v8402_v11  ;;  %v3627_v50 = vmul.f32 %v8363_v18, %v3605_v33  ;;  %5901 = vmatprep.subr.bf16.mxu1 %v6264_v58  ;;  %v6266_v33 = vld [vmem:[%s7027_s30] sm:$0xff]  }
 0xef9   : > { %v6542_v32 = vpop.eup %6541  ;;  %v8415_v31 = vadd.f32 %v8372_v20, %v3626_v51  ;;  %v3606_v24 = vmul.f32 %v6540_v41, %v8306_v21  ;;  %5902 = vmatpush3.bf16.msra.mxu1 %v6264_v58 }
 0xefa   : > { %5887 = vmatprep.mubr.msk.bf16.mxu0 %vm1032_vm1, %v3660_v42  ;;  %v8420_v12 = vadd.f32 %v8372_v20, %v3627_v50  ;;  %v3607_v5 = vmul.f32 %v6542_v32, %v8309_v39 }
 0xefb   : > { %v3628_v6 = vmul.f32 %v8363_v18, %v3606_v24 }
 0xefc   : > { %v6544_v52 = vpop.eup %6543  ;;  %v3661_v47 = vpack.c.bf16 %v8420_v12, %v8415_v31  ;;  %v3629_v28 = vmul.f32 %v8363_v18, %v3607_v5 }
 0xefd   : > { %v6546_v14 = vpop.eup %6545  ;;  %v8428_v2 = vadd.f32 %v8372_v20, %v3628_v6  ;;  %v3608_v21 = vmul.f32 %v6544_v52, %v8318_v40 }
 0xefe   : > { %5888 = vmatmul.mubr.msk.bf16.gmra.mxu0 %vm1032_vm1, %v3661_v47  ;;  %v8433_v29 = vadd.f32 %v8372_v20, %v3629_v28  ;;  %v3609_v39 = vmul.f32 %v6546_v14, %v8321_v27 }
 0xeff   : > { %v3630_v61 = vmul.f32 %v8363_v18, %v3608_v21 }
 0xf00   : > { %v3662_v63 = vpack.c.bf16 %v8433_v29, %v8428_v2  ;;  %v3631_v62 = vmul.f32 %v8363_v18, %v3609_v39 }
 0xf01   : > { %v8441_v8 = vadd.f32 %v8372_v20, %v3630_v61 }
 0xf02   : > { %5891 = vmatprep.mubr.msk.bf16.mxu0 %vm1032_vm1, %v3662_v63  ;;  %v8445_v40 = vadd.f32 %v8372_v20, %v3631_v62 }
 0xf04   : > { %v3663_v34 = vpack.c.bf16 %v8445_v40, %v8441_v8 }
 0xf06   : > { %5892 = vmatmul.mubr.msk.bf16.gmra.mxu0 %vm1032_vm1, %v3663_v34 }
 0xf11   : > { %v3540_v27 = vpop.xlane.xlu0 %3539 }
 0xf12   : > { %v3562_v15 = vmul.f32 0.03125, %v3540_v27 }
 0xf14   : > { %v3578_v57 = vadd.f32 1e-05, %v3562_v15 }
 0xf15   : > { %v3546_v37 = vpop.xlane.xlu0 %3545  ;;  %v3543_v38 = vpop.xlane.xlu1 %3542 }
 0xf16   : > { %6547 = vrsqrt.f32 %v3578_v57  ;;  %v3564_v36 = vmul.f32 0.03125, %v3546_v37  ;;  %v3563_v46 = vmul.f32 0.03125, %v3543_v38 }
 0xf18   : > { %v3580_v55 = vadd.f32 1e-05, %v3564_v36  ;;  %v3579_v26 = vadd.f32 1e-05, %v3563_v46 }
 0xf19   : > { %v3549_v30 = vpop.xlane.xlu1 %3548 }
 0xf1a   : > { %6549 = vrsqrt.f32 %v3580_v55  ;;  %v3565_v59 = vmul.f32 0.03125, %v3549_v30 }
 0xf1b   : > { %6551 = vrsqrt.f32 %v3579_v26 }
 0xf1c   : > { %v3581_v4 = vadd.f32 1e-05, %v3565_v59 }
 0xf1e   : > { %6553 = vrsqrt.f32 %v3581_v4 }
 0xf23   : > { %v6548_v25 = vpop.eup %6547 }
 0xf24   : > { %v3610_v9 = vmul.f32 %v6548_v25, %v8334_v48 }
 0xf26   : > { %v3632_v53 = vmul.f32 %v8363_v18, %v3610_v9 }
 0xf27   : > { %v6550_v0 = vpop.eup %6549 }
 0xf28   : > { %v6552_v19 = vpop.eup %6551  ;;  %v3612_v56 = vmul.f32 %v6550_v0, %v8339_v10  ;;  %v8458_v48 = vadd.f32 %v8372_v20, %v3632_v53 }
 0xf29   : > { %v3611_v1 = vmul.f32 %v6552_v19, %v8342_v7 }
 0xf2a   : > { %v3634_v16 = vmul.f32 %v8363_v18, %v3612_v56 }
 0xf2b   : > { %v6554_v60 = vpop.eup %6553  ;;  %v3633_v13 = vmul.f32 %v8363_v18, %v3611_v1 }
 0xf2c   : > { %v3613_v44 = vmul.f32 %v6554_v60, %v8350_v22  ;;  %v8467_v43 = vadd.f32 %v8372_v20, %v3634_v16 }
 0xf2d   : > { %v8461_v17 = vadd.f32 %v8372_v20, %v3633_v13 }
 0xf2e   : > { %v3635_v10 = vmul.f32 %v8363_v18, %v3613_v44  ;;  %v6265_v18 = vld [vmem:[%s7027_s30 + $0x8] sm:$0xff]  }
 0xf2f   : > { %v3664_v7 = vpack.c.bf16 %v8461_v17, %v8458_v48  ;;  %5903 = vmatprep.subr.bf16.mxu1 %v6265_v18 }
 0xf30   : > { %v8470_v22 = vadd.f32 %v8372_v20, %v3635_v10  ;;  %5904 = vmatpush3.bf16.msra.mxu1 %v6265_v18  ;;  %v5270_v20 = vld [vmem:[%s9205_s4] ss:$0 sm:$0xff] }
 0xf31   : > { %5895 = vmatprep.mubr.msk.bf16.mxu0 %vm1032_vm1, %v3664_v7  ;;  %5905 = vmatprep.subr.bf16.mxu1 %v6266_v33 }
 0xf32   : > { %v3665_v49 = vpack.c.bf16 %v8470_v22, %v8467_v43 }
 0xf34   : > { %5896 = vmatmul.mubr.msk.bf16.gmra.mxu0 %vm1032_vm1, %v3665_v49  ;;  %5906 = vmatpush3.bf16.msra.mxu1 %v6266_v33 }
 0xfb6   : > { %v5885_v51 = vpop.f32.mrf.mxu0 }
 0xfb7   : > { %v3756_v24 = vadd.f32 %v5885_v51, %v5270_v20 }
 0xfb8   : > { %v3747_v41 = vpop.f32.mrf.mxu0 }
 0xfb9   : > { %v3748_v50 = vadd.f32 %v5270_v20, %v3747_v41  ;;  %v3812_v21 = vmax.f32 %v3756_v24, 0.0 }
 0xfba   : > { %v5886_v42 = vpop.f32.mrf.mxu0 }
 0xfbb   : > { %v3759_v32 = vadd.f32 %v5886_v42, %v5270_v20  ;;  %v3810_v28 = vmax.f32 %v3748_v50, 0.0 }
 0xfbc   : > { %v3750_v5 = vpop.f32.mrf.mxu0 }
 0xfbd   : > { %v3751_v6 = vadd.f32 %v5270_v20, %v3750_v5  ;;  %v3813_v52 = vmax.f32 %v3759_v32, 0.0 }
 0xfbe   : > { %v5889_v47 = vpop.f32.mrf.mxu0 }
 0xfbf   : > { %v3811_v14 = vmax.f32 %v3751_v6, 0.0  ;;  %v3827_v63 = vpack.c.bf16 %v3813_v52, %v3812_v21  ;;  %v3772_v15 = vadd.f32 %v5889_v47, %v5270_v20  ;;  %v8497_v47 = vld [vmem:[%s923_s20] ss:$0 sm:$0xff]  ;;  %s9214_s20 = sld [smem:[#allocation55_spill]] (!%p5296_p1) }
 0xfc0   : > { %v3763_v39 = vpop.f32.mrf.mxu0 }
 0xfc1   : > { %v3826_v61 = vpack.c.bf16 %v3811_v14, %v3810_v28  ;;  %v3764_v34 = vadd.f32 %v5270_v20, %v3763_v39  ;;  %v3816_v26 = vmax.f32 %v3772_v15, 0.0 }
 0xfc2   : > { %v5890_v62 = vpop.f32.mrf.mxu0 }
 0xfc3   : > { %v3775_v27 = vadd.f32 %v5890_v62, %v5270_v20  ;;  %5907 = vmatprep.mubr.msk.bf16.mxu1 %vm3873_vm5, %v3826_v61  ;;  %v3814_v46 = vmax.f32 %v3764_v34, 0.0 }
 0xfc4   : > { %v3766_v57 = vpop.f32.mrf.mxu0  ;;  %5908 = vmatmul.mubr.msk.bf16.vlgmr.msra.gmra.mxu1 %vm3873_vm5, %v3827_v63 }
 0xfc5   : > { %v3767_v37 = vadd.f32 %v5270_v20, %v3766_v57  ;;  %v3817_v38 = vmax.f32 %v3775_v27, 0.0 }
 0xfc6   : > { %v5893_v36 = vpop.f32.mrf.mxu0 }
 0xfc7   : > { %v3815_v55 = vmax.f32 %v3767_v37, 0.0  ;;  %v3829_v4 = vpack.c.bf16 %v3817_v38, %v3816_v26  ;;  %v3788_v19 = vadd.f32 %v5893_v36, %v5270_v20 }
 0xfc8   : > { %v3779_v30 = vpop.f32.mrf.mxu0 }
 0xfc9   : > { %v3828_v59 = vpack.c.bf16 %v3815_v55, %v3814_v46  ;;  %v3780_v9 = vadd.f32 %v5270_v20, %v3779_v30  ;;  %v3820_v44 = vmax.f32 %v3788_v19, 0.0 }
 0xfca   : > { %v5894_v25 = vpop.f32.mrf.mxu0 }
 0xfcb   : > { %v3791_v0 = vadd.f32 %v5894_v25, %v5270_v20  ;;  %5911 = vmatprep.mubr.msk.bf16.mxu1 %vm3873_vm5, %v3828_v59  ;;  %v3818_v60 = vmax.f32 %v3780_v9, 0.0 }
 0xfcc   : > { %v3782_v56 = vpop.f32.mrf.mxu0  ;;  %5912 = vmatmul.mubr.msk.bf16.gmra.mxu1 %vm3873_vm5, %v3829_v4 }
 0xfcd   : > { %v3783_v1 = vadd.f32 %v5270_v20, %v3782_v56  ;;  %v3821_v53 = vmax.f32 %v3791_v0, 0.0 }
 0xfcf   : > { %v3819_v13 = vmax.f32 %v3783_v1, 0.0  ;;  %v3831_v10 = vpack.c.bf16 %v3821_v53, %v3820_v44 }
 0xfd1   : > { %v3830_v16 = vpack.c.bf16 %v3819_v13, %v3818_v60 }
 0xfd3   : > { %5915 = vmatprep.mubr.msk.bf16.mxu1 %vm3873_vm5, %v3830_v16 }
 0xfd4   : > { %5916 = vmatmul.mubr.msk.bf16.gmra.mxu1 %vm3873_vm5, %v3831_v10 }
 0xff4   : > { %v5897_v7 = vpop.f32.mrf.mxu0 }
 0xff5   : > { %v3804_v51 = vadd.f32 %v5897_v7, %v5270_v20 }
 0xff6   : > { %v3795_v49 = vpop.f32.mrf.mxu0 }
 0xff7   : > { %v3796_v18 = vadd.f32 %v5270_v20, %v3795_v49  ;;  %v3824_v5 = vmax.f32 %v3804_v51, 0.0 }
 0xff8   : > { %v5898_v58 = vpop.f32.mrf.mxu0 }
 0xff9   : > { %v3807_v33 = vadd.f32 %v5898_v58, %v5270_v20  ;;  %v3822_v32 = vmax.f32 %v3796_v18, 0.0 }
 0xffa   : > { %v3798_v41 = vpop.f32.mrf.mxu0 }
 0xffb   : > { %v3799_v42 = vadd.f32 %v5270_v20, %v3798_v41  ;;  %v3825_v50 = vmax.f32 %v3807_v33, 0.0 }
 0xffd   : > { %v3823_v24 = vmax.f32 %v3799_v42, 0.0  ;;  %v3833_v52 = vpack.c.bf16 %v3825_v50, %v3824_v5 }
 0xfff   : > { %v3832_v6 = vpack.c.bf16 %v3823_v24, %v3822_v32 }
0x1001   : > { %5919 = vmatprep.mubr.msk.bf16.mxu1 %vm3873_vm5, %v3832_v6 }
0x1002   : > { %5920 = vmatmul.mubr.msk.bf16.gmra.mxu1 %vm3873_vm5, %v3833_v52 }
0x1084   : > { %v5909_v28 = vpop.f32.mrf.mxu1 }
0x1085   : > { %v3941_v14 = vadd.f32 %v5909_v28, %v8497_v47 }
0x1086   : > { %v3932_v20 = vpop.f32.mrf.mxu1 }
0x1087   : > { %v8501_v21 = vadd.f32 %v3941_v14, %v8390_v35  ;;  %v3933_v39 = vadd.f32 %v8497_v47, %v3932_v20 }
0x1088   : > { %v5910_v61 = vpop.f32.mrf.mxu1 }
0x1089   : > { %v8505_v63 = vadd.f32 %v3933_v39, %v8377_v3  ;;  %v3944_v62 = vadd.f32 %v5910_v61, %v8497_v47  ;;  %v4019_v34 = vsel %vm1032_vm1, %v8501_v21, 0.0 }
0x108a   : > { %4020 = vadd.xlane.f32.xlu0 %v4019_v34  ;;  %v3935_v27 = vpop.f32.mrf.mxu1 }
0x108b   : > { %v8511_v15 = vadd.f32 %v3944_v62, %v8394_v23  ;;  %v3936_v57 = vadd.f32 %v8497_v47, %v3935_v27  ;;  %v4013_v36 = vsel %vm1032_vm1, %v8505_v63, 0.0 }
0x108c   : > { %v5913_v35 = vpop.f32.mrf.mxu1 }
0x108d   : > { %v8515_v37 = vadd.f32 %v3936_v57, %v8381_v54  ;;  %v3957_v38 = vadd.f32 %v5913_v35, %v8497_v47  ;;  %v4022_v3 = vsel %vm1032_vm1, %v8511_v15, 0.0 }
0x108e   : > { %4023 = vadd.xlane.f32.xlu1 %v4022_v3  ;;  %4014 = vadd.xlane.f32.xlu0 %v4013_v36  ;;  %v3948_v46 = vpop.f32.mrf.mxu1 }
0x108f   : > { %v8523_v23 = vadd.f32 %v3957_v38, %v8415_v31  ;;  %v3949_v55 = vadd.f32 %v8497_v47, %v3948_v46  ;;  %v4016_v59 = vsel %vm1032_vm1, %v8515_v37, 0.0 }
0x1090   : > { %v5914_v26 = vpop.f32.mrf.mxu1 }
0x1091   : > { %v8527_v54 = vadd.f32 %v3949_v55, %v8402_v11  ;;  %v3960_v30 = vadd.f32 %v5914_v26, %v8497_v47  ;;  %v4031_v4 = vsel %vm1032_vm1, %v8523_v23, 0.0 }
0x1092   : > { %4017 = vadd.xlane.f32.xlu1 %v4016_v59  ;;  %4032 = vadd.xlane.f32.xlu0 %v4031_v4  ;;  %v3951_v25 = vpop.f32.mrf.mxu1 }
0x1093   : > { %v8535_v31 = vadd.f32 %v3960_v30, %v8420_v12  ;;  %v3952_v9 = vadd.f32 %v8497_v47, %v3951_v25  ;;  %v4025_v1 = vsel %vm1032_vm1, %v8527_v54, 0.0 }
0x1094   : > { %v5917_v0 = vpop.f32.mrf.mxu1 }
0x1095   : > { %v8539_v11 = vadd.f32 %v3952_v9, %v8407_v45  ;;  %v3973_v19 = vadd.f32 %v5917_v0, %v8497_v47  ;;  %v4034_v56 = vsel %vm1032_vm1, %v8535_v31, 0.0 }
0x1096   : > { %4035 = vadd.xlane.f32.xlu1 %v4034_v56  ;;  %4026 = vadd.xlane.f32.xlu0 %v4025_v1  ;;  %v3964_v53 = vpop.f32.mrf.mxu1 }
0x1097   : > { %v8547_v12 = vadd.f32 %v3973_v19, %v8441_v8  ;;  %v3965_v60 = vadd.f32 %v8497_v47, %v3964_v53  ;;  %v4028_v16 = vsel %vm1032_vm1, %v8539_v11, 0.0 }
0x1098   : > { %v5918_v13 = vpop.f32.mrf.mxu1 }
0x1099   : > { %v8551_v45 = vadd.f32 %v3965_v60, %v8428_v2  ;;  %v3976_v44 = vadd.f32 %v5918_v13, %v8497_v47  ;;  %v4043_v10 = vsel %vm1032_vm1, %v8547_v12, 0.0 }
0x109a   : > { %4029 = vadd.xlane.f32.xlu1 %v4028_v16  ;;  %4044 = vadd.xlane.f32.xlu0 %v4043_v10  ;;  %v3967_v7 = vpop.f32.mrf.mxu1 }
0x109b   : > { %v8559_v8 = vadd.f32 %v3976_v44, %v8445_v40  ;;  %v3968_v49 = vadd.f32 %v8497_v47, %v3967_v7  ;;  %v4037_v18 = vsel %vm1032_vm1, %v8551_v45, 0.0 }
0x109d   : > { %v8563_v58 = vadd.f32 %v3968_v49, %v8433_v29  ;;  %v4046_v2 = vsel %vm1032_vm1, %v8559_v8, 0.0 }
0x109e   : > { %4047 = vadd.xlane.f32.xlu1 %v4046_v2  ;;  %4038 = vadd.xlane.f32.xlu0 %v4037_v18 }
0x109f   : > { %v4040_v33 = vsel %vm1032_vm1, %v8563_v58, 0.0 }
0x10a2   : > { %4041 = vadd.xlane.f32.xlu1 %v4040_v33 }
0x10c2   : > { %v5921_v51 = vpop.f32.mrf.mxu1 }
0x10c3   : > { %v3989_v41 = vadd.f32 %v5921_v51, %v8497_v47 }
0x10c4   : > { %v3980_v40 = vpop.f32.mrf.mxu1 }
0x10c5   : > { %v3981_v42 = vadd.f32 %v8497_v47, %v3980_v40  ;;  %v8577_v24 = vadd.f32 %v3989_v41, %v8467_v43 }
0x10c6   : > { %v5922_v29 = vpop.f32.mrf.mxu1 }
0x10c7   : > { %v8574_v50 = vadd.f32 %v3981_v42, %v8458_v48  ;;  %v3992_v5 = vadd.f32 %v5922_v29, %v8497_v47  ;;  %v4055_v43 = vsel %vm1032_vm1, %v8577_v24, 0.0 }
0x10c8   : > { %v3983_v32 = vpop.f32.mrf.mxu1 }
0x10c9   : > { %v3984_v6 = vadd.f32 %v8497_v47, %v3983_v32  ;;  %v4049_v52 = vsel %vm1032_vm1, %v8574_v50, 0.0  ;;  %v8587_v14 = vadd.f32 %v3992_v5, %v8470_v22 }
0x10ca   : > { %4050 = vadd.xlane.f32.xlu0 %v4049_v52 }
0x10cb   : > { %v8584_v28 = vadd.f32 %v3984_v6, %v8461_v17  ;;  %v4058_v47 = vsel %vm1032_vm1, %v8587_v14, 0.0 }
0x10cd   : > { %v4052_v48 = vsel %vm1032_vm1, %v8584_v28, 0.0 }
0x10ce   : > { %4053 = vadd.xlane.f32.xlu1 %v4052_v48  ;;  %4056 = vadd.xlane.f32.xlu0 %v4055_v43 }
0x10d2   : > { %4059 = vadd.xlane.f32.xlu1 %v4058_v47 }
0x1113   : > { %v4021_v20 = vpop.xlane.xlu0 %4020 }
0x1114   : > { %v4063_v39 = vmul.f32 0.03125, %v4021_v20 }
0x1116   : > { %v8596_v17 = vsub.f32 %v8501_v21, %v4063_v39 }
0x1117   : > { %v4015_v61 = vpop.xlane.xlu0 %4014  ;;  %v4024_v22 = vpop.xlane.xlu1 %4023 }
0x1118   : > { %v4061_v62 = vmul.f32 0.03125, %v4015_v61  ;;  %v4064_v34 = vmul.f32 0.03125, %v4024_v22  ;;  %v4095_v27 = vmul.f32 %v8596_v17, %v8596_v17 }
0x111a   : > { %v8601_v57 = vsub.f32 %v8505_v63, %v4061_v62  ;;  %v8604_v35 = vsub.f32 %v8511_v15, %v4064_v34  ;;  %v4115_v38 = vsel %vm1032_vm1, %v4095_v27, 0.0 }
0x111b   : > { %v4033_v3 = vpop.xlane.xlu0 %4032  ;;  %4116 = vadd.xlane.f32.xlu0 %v4115_v38  ;;  %v4018_v36 = vpop.xlane.xlu1 %4017 }
0x111c   : > { %v4067_v21 = vmul.f32 0.03125, %v4033_v3  ;;  %v4062_v46 = vmul.f32 0.03125, %v4018_v36  ;;  %v4093_v55 = vmul.f32 %v8601_v57, %v8601_v57  ;;  %v4096_v26 = vmul.f32 %v8604_v35, %v8604_v35 }
0x111e   : > { %v8612_v30 = vsub.f32 %v8523_v23, %v4067_v21  ;;  %v8615_v63 = vsub.f32 %v8515_v37, %v4062_v46  ;;  %v4109_v15 = vsel %vm1032_vm1, %v4093_v55, 0.0  ;;  %v4118_v59 = vsel %vm1032_vm1, %v4096_v26, 0.0 }
0x111f   : > { %v4027_v4 = vpop.xlane.xlu0 %4026  ;;  %4110 = vadd.xlane.f32.xlu0 %v4109_v15  ;;  %4119 = vadd.xlane.f32.xlu1 %v4118_v59  ;;  %v4036_v25 = vpop.xlane.xlu1 %4035 }
0x1120   : > { %v4065_v9 = vmul.f32 0.03125, %v4027_v4  ;;  %v4068_v0 = vmul.f32 0.03125, %v4036_v25  ;;  %v4099_v19 = vmul.f32 %v8612_v30, %v8612_v30  ;;  %v4094_v23 = vmul.f32 %v8615_v63, %v8615_v63 }
0x1122   : > { %v8624_v56 = vsub.f32 %v8527_v54, %v4065_v9  ;;  %v8627_v37 = vsub.f32 %v8535_v31, %v4068_v0  ;;  %v4127_v1 = vsel %vm1032_vm1, %v4099_v19, 0.0  ;;  %v4112_v53 = vsel %vm1032_vm1, %v4094_v23, 0.0 }
0x1123   : > { %v4045_v60 = vpop.xlane.xlu0 %4044  ;;  %4128 = vadd.xlane.f32.xlu0 %v4127_v1  ;;  %4113 = vadd.xlane.f32.xlu1 %v4112_v53  ;;  %v4030_v13 = vpop.xlane.xlu1 %4029 }
0x1124   : > { %v4071_v44 = vmul.f32 0.03125, %v4045_v60  ;;  %v4066_v16 = vmul.f32 0.03125, %v4030_v13  ;;  %v4097_v10 = vmul.f32 %v8624_v56, %v8624_v56  ;;  %v4100_v54 = vmul.f32 %v8627_v37, %v8627_v37 }
0x1126   : > { %v8636_v7 = vsub.f32 %v8547_v12, %v4071_v44  ;;  %v8639_v31 = vsub.f32 %v8539_v11, %v4066_v16  ;;  %v4121_v49 = vsel %vm1032_vm1, %v4097_v10, 0.0  ;;  %v4130_v2 = vsel %vm1032_vm1, %v4100_v54, 0.0 }
0x1127   : > { %v4039_v18 = vpop.xlane.xlu0 %4038  ;;  %4122 = vadd.xlane.f32.xlu0 %v4121_v49  ;;  %4131 = vadd.xlane.f32.xlu1 %v4130_v2  ;;  %v4048_v33 = vpop.xlane.xlu1 %4047 }
0x1128   : > { %v4069_v51 = vmul.f32 0.03125, %v4039_v18  ;;  %v4072_v40 = vmul.f32 0.03125, %v4048_v33  ;;  %v4103_v41 = vmul.f32 %v8636_v7, %v8636_v7  ;;  %v4098_v12 = vmul.f32 %v8639_v31, %v8639_v31 }
0x112a   : > { %v8648_v42 = vsub.f32 %v8551_v45, %v4069_v51  ;;  %v8651_v11 = vsub.f32 %v8559_v8, %v4072_v40  ;;  %v4139_v29 = vsel %vm1032_vm1, %v4103_v41, 0.0  ;;  %v4124_v32 = vsel %vm1032_vm1, %v4098_v12, 0.0 }
0x112b   : > { %4140 = vadd.xlane.f32.xlu0 %v4139_v29  ;;  %4125 = vadd.xlane.f32.xlu1 %v4124_v32  ;;  %v4042_v5 = vpop.xlane.xlu1 %4041 }
0x112c   : > { %v4070_v6 = vmul.f32 0.03125, %v4042_v5  ;;  %v4101_v52 = vmul.f32 %v8648_v42, %v8648_v42  ;;  %v4104_v48 = vmul.f32 %v8651_v11, %v8651_v11 }
0x112e   : > { %v8660_v45 = vsub.f32 %v8563_v58, %v4070_v6  ;;  %v4133_v8 = vsel %vm1032_vm1, %v4101_v52, 0.0  ;;  %v4142_v43 = vsel %vm1032_vm1, %v4104_v48, 0.0  ;;  %v8696_v52 = vld [vmem:[%s926_s23] ss:$0 sm:$0xff] }
0x112f   : > { %4134 = vadd.xlane.f32.xlu0 %v4133_v8  ;;  %4143 = vadd.xlane.f32.xlu1 %v4142_v43 }
0x1130   : > { %v4102_v47 = vmul.f32 %v8660_v45, %v8660_v45 }
0x1132   : > { %v4136_v20 = vsel %vm1032_vm1, %v4102_v47, 0.0  ;;  %v8704_v47 = vld [vmem:[%s929_s25] ss:$0 sm:$0xff] }
0x1133   : > { %4137 = vadd.xlane.f32.xlu1 %v4136_v20 }
0x1153   : > { %v4051_v39 = vpop.xlane.xlu0 %4050 }
0x1154   : > { %v4073_v61 = vmul.f32 0.03125, %v4051_v39 }
0x1156   : > { %v8668_v22 = vsub.f32 %v8574_v50, %v4073_v61 }
0x1157   : > { %v4057_v62 = vpop.xlane.xlu0 %4056  ;;  %v4054_v58 = vpop.xlane.xlu1 %4053 }
0x1158   : > { %v4075_v34 = vmul.f32 0.03125, %v4057_v62  ;;  %v4074_v27 = vmul.f32 0.03125, %v4054_v58  ;;  %v4105_v38 = vmul.f32 %v8668_v22, %v8668_v22 }
0x115a   : > { %v8673_v3 = vsub.f32 %v8577_v24, %v4075_v34  ;;  %v8676_v36 = vsub.f32 %v8584_v28, %v4074_v27  ;;  %v4145_v21 = vsel %vm1032_vm1, %v4105_v38, 0.0 }
0x115b   : > { %4146 = vadd.xlane.f32.xlu0 %v4145_v21  ;;  %v4060_v46 = vpop.xlane.xlu1 %4059 }
0x115c   : > { %v4076_v55 = vmul.f32 0.03125, %v4060_v46  ;;  %v4107_v50 = vmul.f32 %v8673_v3, %v8673_v3  ;;  %v4106_v26 = vmul.f32 %v8676_v36, %v8676_v36 }
0x115e   : > { %v8684_v15 = vsub.f32 %v8587_v14, %v4076_v55  ;;  %v4151_v24 = vsel %vm1032_vm1, %v4107_v50, 0.0  ;;  %v4148_v59 = vsel %vm1032_vm1, %v4106_v26, 0.0 }
0x115f   : > { %4152 = vadd.xlane.f32.xlu0 %v4151_v24  ;;  %4149 = vadd.xlane.f32.xlu1 %v4148_v59 }
0x1160   : > { %v4108_v28 = vmul.f32 %v8684_v15, %v8684_v15 }
0x1162   : > { %v4154_v4 = vsel %vm1032_vm1, %v4108_v28, 0.0 }
0x1163   : > { %4155 = vadd.xlane.f32.xlu1 %v4154_v4 }
0x11a4   : > { %v4117_v25 = vpop.xlane.xlu0 %4116 }
0x11a5   : > { %v4159_v9 = vmul.f32 0.03125, %v4117_v25 }
0x11a7   : > { %v4175_v0 = vadd.f32 1e-05, %v4159_v9 }
0x11a8   : > { %v4111_v19 = vpop.xlane.xlu0 %4110  ;;  %v4120_v23 = vpop.xlane.xlu1 %4119 }
0x11a9   : > { %6555 = vrsqrt.f32 %v4175_v0  ;;  %v4157_v14 = vmul.f32 0.03125, %v4111_v19  ;;  %v4160_v1 = vmul.f32 0.03125, %v4120_v23 }
0x11ab   : > { %v4173_v53 = vadd.f32 1e-05, %v4157_v14  ;;  %v4176_v60 = vadd.f32 1e-05, %v4160_v1 }
0x11ac   : > { %v4129_v13 = vpop.xlane.xlu0 %4128  ;;  %v4114_v44 = vpop.xlane.xlu1 %4113 }
0x11ad   : > { %6557 = vrsqrt.f32 %v4173_v53  ;;  %v4163_v16 = vmul.f32 0.03125, %v4129_v13  ;;  %v4158_v10 = vmul.f32 0.03125, %v4114_v44 }
0x11ae   : > { %6559 = vrsqrt.f32 %v4176_v60 }
0x11af   : > { %v4179_v54 = vadd.f32 1e-05, %v4163_v16  ;;  %v4174_v49 = vadd.f32 1e-05, %v4158_v10 }
0x11b0   : > { %v4123_v2 = vpop.xlane.xlu0 %4122  ;;  %v4132_v18 = vpop.xlane.xlu1 %4131 }
0x11b1   : > { %6561 = vrsqrt.f32 %v4179_v54  ;;  %v4161_v33 = vmul.f32 0.03125, %v4123_v2  ;;  %v4164_v51 = vmul.f32 0.03125, %v4132_v18 }
0x11b2   : > { %6563 = vrsqrt.f32 %v4174_v49 }
0x11b3   : > { %v4177_v40 = vadd.f32 1e-05, %v4161_v33  ;;  %v4180_v41 = vadd.f32 1e-05, %v4164_v51 }
0x11b4   : > { %v4141_v12 = vpop.xlane.xlu0 %4140  ;;  %v4126_v29 = vpop.xlane.xlu1 %4125 }
0x11b5   : > { %6565 = vrsqrt.f32 %v4177_v40  ;;  %v4167_v32 = vmul.f32 0.03125, %v4141_v12  ;;  %v4162_v5 = vmul.f32 0.03125, %v4126_v29 }
0x11b6   : > { %v6556_v6 = vpop.eup %6555  ;;  %6567 = vrsqrt.f32 %v4180_v41 }
0x11b7   : > { %v4207_v48 = vmul.f32 %v6556_v6, %v8596_v17  ;;  %v4183_v8 = vadd.f32 1e-05, %v4167_v32  ;;  %v4178_v43 = vadd.f32 1e-05, %v4162_v5 }
0x11b8   : > { %v4135_v20 = vpop.xlane.xlu0 %4134  ;;  %v4144_v39 = vpop.xlane.xlu1 %4143 }
0x11b9   : > { %v4229_v61 = vmul.f32 %v8696_v52, %v4207_v48  ;;  %6569 = vrsqrt.f32 %v4183_v8  ;;  %v4165_v62 = vmul.f32 0.03125, %v4135_v20  ;;  %v4168_v58 = vmul.f32 0.03125, %v4144_v39 }
0x11ba   : > { %v6558_v34 = vpop.eup %6557  ;;  %6571 = vrsqrt.f32 %v4178_v43 }
0x11bb   : > { %v6560_v27 = vpop.eup %6559  ;;  %v8708_v17 = vadd.f32 %v8704_v47, %v4229_v61  ;;  %v4205_v38 = vmul.f32 %v6558_v34, %v8601_v57  ;;  %v4181_v21 = vadd.f32 1e-05, %v4165_v62  ;;  %v4184_v46 = vadd.f32 1e-05, %v4168_v58 }
0x11bc   : > { %v4208_v55 = vmul.f32 %v6560_v27, %v8604_v35  ;;  %v4138_v50 = vpop.xlane.xlu1 %4137 }
0x11bd   : > { %4267 = vst.msk [vmem:[#allocation2 + $0x10] sm:$0xff] %vm1032_vm1, %v8708_v17  ;;  %v4227_v26 = vmul.f32 %v8696_v52, %v4205_v38  ;;  %6573 = vrsqrt.f32 %v4181_v21  ;;  %v4166_v24 = vmul.f32 0.03125, %v4138_v50 }
0x11be   : > { %v6562_v59 = vpop.eup %6561  ;;  %v4230_v28 = vmul.f32 %v8696_v52, %v4208_v55  ;;  %6575 = vrsqrt.f32 %v4184_v46 }
0x11bf   : > { %v6564_v4 = vpop.eup %6563  ;;  %v8717_v25 = vadd.f32 %v8704_v47, %v4227_v26  ;;  %v4211_v57 = vmul.f32 %v6562_v59, %v8612_v30  ;;  %v4182_v9 = vadd.f32 1e-05, %v4166_v24 }
0x11c0   : > { %v8721_v35 = vadd.f32 %v8704_v47, %v4230_v28  ;;  %v4206_v0 = vmul.f32 %v6564_v4, %v8615_v63 }
0x11c1   : > { %4265 = vst.msk [vmem:[#allocation2] sm:$0xff] %vm1032_vm1, %v8717_v25  ;;  %v4233_v19 = vmul.f32 %v8696_v52, %v4211_v57  ;;  %6577 = vrsqrt.f32 %v4182_v9 }
0x11c2   : > { %v6566_v23 = vpop.eup %6565  ;;  %4268 = vst.msk [vmem:[#allocation2 + $0x18] sm:$0xff] %vm1032_vm1, %v8721_v35  ;;  %v4228_v14 = vmul.f32 %v8696_v52, %v4206_v0 }
0x11c3   : > { %v6568_v1 = vpop.eup %6567  ;;  %v8731_v30 = vadd.f32 %v8704_v47, %v4233_v19  ;;  %v4209_v53 = vmul.f32 %v6566_v23, %v8624_v56 }
0x11c4   : > { %v8735_v63 = vadd.f32 %v8704_v47, %v4228_v14  ;;  %v4212_v60 = vmul.f32 %v6568_v1, %v8627_v37 }
0x11c5   : > { %4271 = vst.msk [vmem:[#allocation2 + $0x30] sm:$0xff] %vm1032_vm1, %v8731_v30  ;;  %v4231_v13 = vmul.f32 %v8696_v52, %v4209_v53 }
0x11c6   : > { %v6570_v44 = vpop.eup %6569  ;;  %4266 = vst.msk [vmem:[#allocation2 + $0x8] sm:$0xff] %vm1032_vm1, %v8735_v63  ;;  %v4234_v16 = vmul.f32 %v8696_v52, %v4212_v60 }
0x11c7   : > { %v6572_v10 = vpop.eup %6571  ;;  %v8745_v54 = vadd.f32 %v8704_v47, %v4231_v13  ;;  %v4215_v56 = vmul.f32 %v6570_v44, %v8636_v7 }
0x11c8   : > { %v8749_v49 = vadd.f32 %v8704_v47, %v4234_v16  ;;  %v4210_v37 = vmul.f32 %v6572_v10, %v8639_v31 }
0x11c9   : > { %4269 = vst.msk [vmem:[#allocation2 + $0x20] sm:$0xff] %vm1032_vm1, %v8745_v54  ;;  %v4237_v2 = vmul.f32 %v8696_v52, %v4215_v56 }
0x11ca   : > { %v6574_v18 = vpop.eup %6573  ;;  %4272 = vst.msk [vmem:[#allocation2 + $0x38] sm:$0xff] %vm1032_vm1, %v8749_v49  ;;  %v4232_v33 = vmul.f32 %v8696_v52, %v4210_v37 }
0x11cb   : > { %v6576_v51 = vpop.eup %6575  ;;  %v8759_v40 = vadd.f32 %v8704_v47, %v4237_v2  ;;  %v4213_v7 = vmul.f32 %v6574_v18, %v8648_v42 }
0x11cc   : > { %v8763_v41 = vadd.f32 %v8704_v47, %v4232_v33  ;;  %v4216_v31 = vmul.f32 %v6576_v51, %v8651_v11 }
0x11cd   : > { %4275 = vst.msk [vmem:[#allocation2 + $0x50] sm:$0xff] %vm1032_vm1, %v8759_v40  ;;  %v4235_v12 = vmul.f32 %v8696_v52, %v4213_v7 }
0x11ce   : > { %v6578_v29 = vpop.eup %6577  ;;  %4270 = vst.msk [vmem:[#allocation2 + $0x28] sm:$0xff] %vm1032_vm1, %v8763_v41  ;;  %v4238_v32 = vmul.f32 %v8696_v52, %v4216_v31 }
0x11cf   : > { %v8773_v5 = vadd.f32 %v8704_v47, %v4235_v12  ;;  %v4214_v42 = vmul.f32 %v6578_v29, %v8660_v45 }
0x11d0   : > { %v8777_v6 = vadd.f32 %v8704_v47, %v4238_v32 }
0x11d1   : > { %4273 = vst.msk [vmem:[#allocation2 + $0x40] sm:$0xff] %vm1032_vm1, %v8773_v5  ;;  %v4236_v11 = vmul.f32 %v8696_v52, %v4214_v42 }
0x11d2   : > { %4276 = vst.msk [vmem:[#allocation2 + $0x58] sm:$0xff] %vm1032_vm1, %v8777_v6 }
0x11d3   : > { %v8785_v48 = vadd.f32 %v8704_v47, %v4236_v11 }
0x11d5   : > { %4274 = vst.msk [vmem:[#allocation2 + $0x48] sm:$0xff] %vm1032_vm1, %v8785_v48 }
0x11e4   : > { %v4147_v8 = vpop.xlane.xlu0 %4146 }
0x11e5   : > { %v4169_v43 = vmul.f32 0.03125, %v4147_v8 }
0x11e7   : > { %v4185_v45 = vadd.f32 1e-05, %v4169_v43 }
0x11e8   : > { %v4153_v20 = vpop.xlane.xlu0 %4152  ;;  %v4150_v39 = vpop.xlane.xlu1 %4149 }
0x11e9   : > { %6579 = vrsqrt.f32 %v4185_v45  ;;  %v4171_v61 = vmul.f32 0.03125, %v4153_v20  ;;  %v4170_v62 = vmul.f32 0.03125, %v4150_v39 }
0x11eb   : > { %v4187_v58 = vadd.f32 1e-05, %v4171_v61  ;;  %v4186_v34 = vadd.f32 1e-05, %v4170_v62 }
0x11ec   : > { %v4156_v27 = vpop.xlane.xlu1 %4155 }
0x11ed   : > { %6581 = vrsqrt.f32 %v4187_v58  ;;  %v4172_v38 = vmul.f32 0.03125, %v4156_v27 }
0x11ee   : > { %6583 = vrsqrt.f32 %v4186_v34 }
0x11ef   : > { %v4188_v21 = vadd.f32 1e-05, %v4172_v38 }
0x11f1   : > { %6585 = vrsqrt.f32 %v4188_v21 }
0x11f6   : > { %v6580_v46 = vpop.eup %6579 }
0x11f7   : > { %v4217_v55 = vmul.f32 %v6580_v46, %v8668_v22 }
0x11f9   : > { %v4239_v50 = vmul.f32 %v8696_v52, %v4217_v55 }
0x11fa   : > { %v6582_v26 = vpop.eup %6581 }
0x11fb   : > { %v6584_v24 = vpop.eup %6583  ;;  %v8792_v59 = vadd.f32 %v8704_v47, %v4239_v50  ;;  %v4219_v28 = vmul.f32 %v6582_v26, %v8673_v3 }
0x11fc   : > { %v4218_v4 = vmul.f32 %v6584_v24, %v8676_v36 }
0x11fd   : > { %4277 = vst.msk [vmem:[#allocation2 + $0x60] sm:$0xff] %vm1032_vm1, %v8792_v59  ;;  %v4241_v57 = vmul.f32 %v8696_v52, %v4219_v28 }
0x11fe   : > { %v6586_v9 = vpop.eup %6585  ;;  %v4240_v0 = vmul.f32 %v8696_v52, %v4218_v4 }
0x11ff   : > { %v8801_v22 = vadd.f32 %v8704_v47, %v4241_v57  ;;  %v4220_v19 = vmul.f32 %v6586_v9, %v8684_v15 }
0x1200   : > { %v8805_v23 = vadd.f32 %v8704_v47, %v4240_v0 }
0x1201   : > { %4279 = vst.msk [vmem:[#allocation2 + $0x70] sm:$0xff] %vm1032_vm1, %v8801_v22  ;;  %v4242_v3 = vmul.f32 %v8696_v52, %v4220_v19  ;;  %4284 = sbr.rel (%p5296_p1) target bundleno = 5100 (0x13ec), region = 112 }
0x1202   : > { %4278 = vst.msk [vmem:[#allocation2 + $0x68] sm:$0xff] %vm1032_vm1, %v8805_v23 }
0x1203   : > { %v8813_v36 = vadd.f32 %v8704_v47, %v4242_v3 }
0x1205   : > { %4280 = vst.msk [vmem:[#allocation2 + $0x78] sm:$0xff] %vm1032_vm1, %v8813_v36 }
0x1206   : > { %v6606_v15 = vld [vmem:[%s9207_s19 + $0x8] sm:$0xff]   ;;  %v4285_v52 = vpack.c.bf16 %v8735_v63, %v8717_v25  ;;  %v6607_v47 = vld [vmem:[%s9207_s19] sm:$0xff]   ;;  %vm4645_vm6 = vcmask 7168   ;;  %v4631_v53 = vld [vmem:[%s9208_s21 + $0x10] sm:$0xff]  ;;  %v6768_v60 = vmov 0   ;;  %v4286_v33 = vpack.c.bf16 %v8721_v35, %v8708_v17 }
0x1207   : > { %5923 = vmatprep.subr.bf16.mxu0 %v6606_v15  ;;  %v4629_v14 = vld [vmem:[%s9208_s21] sm:$0xff]  ;;  %v4630_v1 = vld [vmem:[%s9208_s21 + $0x8] sm:$0xff]  ;;  %6604 = vset.pattern.permute.xlu0 %v6768_v60  ;;  %v4649_v13 = vsel %vm4645_vm6, %v4631_v53, 0.0  ;;  %v4632_v44 = vld [vmem:[%s9208_s21 + $0x18] sm:$0xff]  ;;  %v4287_v7 = vpack.c.bf16 %v8763_v41, %v8745_v54  ;;  %v4288_v45 = vpack.c.bf16 %v8749_v49, %v8731_v30  ;;  %v4289_v61 = vpack.c.bf16 %v8785_v48, %v8773_v5 }
0x1208   : > { %5927 = vmatprep.mubr.msk.bf16.mxu0 %vm1032_vm1, %v4285_v52  ;;  %5924 = vmatpush3.bf16.msra.mxu0 %v6606_v15  ;;  %v4646_v25 = vsel %vm4645_vm6, %v4629_v14, 0.0  ;;  %v4647_v63 = vsel %vm4645_vm6, %v4630_v1, 0.0  ;;  %v4633_v10 = vld [vmem:[%s9208_s21 + $0x20] sm:$0xff]  ;;  %v4635_v56 = vld [vmem:[%s9208_s21 + $0x30] sm:$0xff]  ;;  %v4634_v37 = vld [vmem:[%s9208_s21 + $0x28] sm:$0xff]  ;;  %v4651_v2 = vsel %vm4645_vm6, %v4632_v44, 0.0  ;;  %v4290_v46 = vpack.c.bf16 %v8777_v6, %v8759_v40 }
0x1209   : > { %5925 = vmatprep.subr.bf16.mxu0 %v6607_v47  ;;  %4686 = vperm.xlu0 %6604, %v4629_v14   ;;  %v4648_v16 = vadd.f32 %v4647_v63, %v4646_v25  ;;  %v4637_v18 = vld [vmem:[%s9208_s21 + $0x40] sm:$0xff]  ;;  %v4653_v31 = vsel %vm4645_vm6, %v4633_v10, 0.0  ;;  %v4657_v12 = vsel %vm4645_vm6, %v4635_v56, 0.0  ;;  %v4655_v29 = vsel %vm4645_vm6, %v4634_v37, 0.0  ;;  %v4636_v32 = vld [vmem:[%s9208_s21 + $0x38] sm:$0xff]  ;;  %v4638_v54 = vld [vmem:[%s9208_s21 + $0x48] sm:$0xff] }
0x120a   : > { %6605 = vset.pattern.permute.xlu1 %v6768_v60  ;;  %v4661_v11 = vsel %vm4645_vm6, %v4637_v18, 0.0  ;;  %v6608_v17 = vld [vmem:[%s9209_s0 + $0x38] sm:$0xff]   ;;  %v4659_v41 = vsel %vm4645_vm6, %v4636_v32, 0.0  ;;  %v6609_v8 = vld [vmem:[%s9210_s27 + $0x30] sm:$0xff]   ;;  %v4663_v62 = vsel %vm4645_vm6, %v4638_v54, 0.0  ;;  %v6610_v58 = vld [vmem:[%s9210_s27 + $0x28] sm:$0xff]   ;;  %v4291_v26 = vpack.c.bf16 %v8805_v23, %v8792_v59 }
0x120b   : > { %4696 = vperm.xlu1 %6605, %v4631_v53   ;;  %v4650_v51 = vadd.f32 %v4649_v13, %v4648_v16  ;;  %5943 = vmatprep.subr.bf16.mxu1 %v6608_v17  ;;  %v4639_v39 = vld [vmem:[%s9208_s21 + $0x50] sm:$0xff]  ;;  %v4640_v27 = vld [vmem:[%s9208_s21 + $0x58] sm:$0xff]  ;;  %v6611_v5 = vld [vmem:[%s9210_s27 + $0x20] sm:$0xff]   ;;  %v4292_v23 = vpack.c.bf16 %v8813_v36, %v8801_v22  ;;  %s9211_s0 = sld [smem:[#allocation56_spill]]  ;;  %vm6770_vm7 = vmmov 0  }
0x120c   : > { %5926 = vmatpush3.bf16.msra.mxu0 %v6607_v47  ;;  %5944 = vmatpush3.bf16.msra.mxu1 %v6608_v17  ;;  %v4665_v49 = vsel %vm4645_vm6, %v4639_v39, 0.0  ;;  %v4641_v38 = vld [vmem:[%s9208_s21 + $0x60] sm:$0xff]  ;;  %v4667_v21 = vsel %vm4645_vm6, %v4640_v27, 0.0  ;;  %v4642_v50 = vld [vmem:[%s9208_s21 + $0x68] sm:$0xff]  ;;  %v6612_v28 = vld [vmem:[%s9210_s27 + $0x18] sm:$0xff]  }
0x120d   : > { %4691 = vperm.xlu0 %6604, %v4630_v1   ;;  %v4652_v42 = vadd.f32 %v4651_v2, %v4650_v51  ;;  %5945 = vmatprep.subr.bf16.mxu1 %v6609_v8  ;;  %v4669_v24 = vsel %vm4645_vm6, %v4641_v38, 0.0  ;;  %v4643_v57 = vld [vmem:[%s9208_s21 + $0x70] sm:$0xff]  ;;  %v4671_v9 = vsel %vm4645_vm6, %v4642_v50, 0.0  ;;  %v4644_v40 = vld [vmem:[%s9208_s21 + $0x78] sm:$0xff]  ;;  %v6614_v22 = vld [vmem:[%s9210_s27 + $0x8] sm:$0xff]  }
0x120e   : > { %v4673_v59 = vsel %vm4645_vm6, %v4643_v57, 0.0  ;;  %v4675_v19 = vsel %vm4645_vm6, %v4644_v40, 0.0  ;;  %v6613_v63 = vld [vmem:[%s9210_s27 + $0x10] sm:$0xff]   ;;  %v6615_v36 = vld [vmem:[%s9210_s27] sm:$0xff]  }
0x120f   : > { %5928 = vmatmul.mubr.msk.bf16.vlgmr.msra.gmra.mxu0 %vm1032_vm1, %v4286_v33  ;;  %4701 = vperm.xlu1 %6605, %v4632_v44   ;;  %v4654_v35 = vadd.f32 %v4653_v31, %v4652_v42  ;;  %v6769_v44 = vmov 0.0  }
0x1210   : > { %5931 = vmatprep.mubr.msk.bf16.mxu0 %vm1032_vm1, %v4287_v7  ;;  %5946 = vmatpush3.bf16.msra.mxu1 %v6609_v8 }
0x1211   : > { %4706 = vperm.xlu0 %6604, %v4633_v10   ;;  %v4656_v43 = vadd.f32 %v4655_v29, %v4654_v35  ;;  %5947 = vmatprep.subr.bf16.mxu1 %v6610_v58  ;;  %s9212_s18 = smov %s9211_s0  ;;  %v6616_v13 = vld [vmem:[%s9211_s0 + $0x38] sm:$0xff]  }
0x1212   : > { %5975 = vmatprep.subr.bf16.mxu0 %v6769_v44  ;;  %v6617_v16 = vld [vmem:[%s9212_s18 + $0x30] sm:$0xff]   ;;  %v6618_v10 = vld [vmem:[%s9212_s18 + $0x28] sm:$0xff]   ;;  %v6623_v33 = vld [vmem:[%s9212_s18] sm:$0xff]  }
0x1213   : > { %4711 = vperm.xlu1 %6605, %v4634_v37   ;;  %v4658_v20 = vadd.f32 %v4657_v12, %v4656_v43  ;;  %5976 = vmatpush3.bf16.msra.mxu0 %v6616_v13  ;;  %v6620_v37 = vld [vmem:[%s9212_s18 + $0x18] sm:$0xff]   ;;  %v6621_v2 = vld [vmem:[%s9212_s18 + $0x10] sm:$0xff]  }
0x1214   : > { %5948 = vmatpush3.bf16.msra.mxu1 %v6610_v58  ;;  %5977 = vmatprep.subr.bf16.mxu0 %v6769_v44 }
0x1215   : > { %4716 = vperm.xlu0 %6604, %v4635_v56   ;;  %v4660_v34 = vadd.f32 %v4659_v41, %v4658_v20  ;;  %5949 = vmatprep.subr.bf16.mxu1 %v6611_v5  ;;  %v6619_v56 = vld [vmem:[%s9212_s18 + $0x20] sm:$0xff]  }
0x1217   : > { %5932 = vmatmul.mubr.msk.bf16.gmra.mxu0 %vm1032_vm1, %v4288_v45  ;;  %4721 = vperm.xlu1 %6605, %v4636_v32   ;;  %v4662_v30 = vadd.f32 %v4661_v11, %v4660_v34  ;;  %v8931_v11 = vld [vmem:[%s9213_s1] ss:$0 sm:$0xff] }
0x1218   : > { %5935 = vmatprep.mubr.msk.bf16.mxu0 %vm1032_vm1, %v4289_v61  ;;  %5950 = vmatpush3.bf16.msra.mxu1 %v6611_v5 }
0x1219   : > { %4726 = vperm.xlu0 %6604, %v4637_v18   ;;  %v4664_v48 = vadd.f32 %v4663_v62, %v4662_v30  ;;  %5951 = vmatprep.subr.bf16.mxu1 %v6612_v28  ;;  %v6622_v18 = vld [vmem:[%s9212_s18 + $0x8] sm:$0xff]  }
0x121a   : > { %5978 = vmatpush3.bf16.msra.mxu0 %v6617_v16 }
0x121b   : > { %4731 = vperm.xlu1 %6605, %v4638_v54   ;;  %v4666_v55 = vadd.f32 %v4665_v49, %v4664_v48  ;;  %5979 = vmatprep.subr.bf16.mxu0 %v6769_v44 }
0x121c   : > { %5952 = vmatpush3.bf16.msra.mxu1 %v6612_v28 }
0x121d   : > { %4736 = vperm.xlu0 %6604, %v4639_v39   ;;  %v4668_v4 = vadd.f32 %v4667_v21, %v4666_v55  ;;  %5953 = vmatprep.subr.bf16.mxu1 %v6613_v63 }
0x121e   : > { %5980 = vmatpush3.bf16.msra.mxu0 %v6618_v10 }
0x121f   : > { %5936 = vmatmul.mubr.msk.bf16.gmra.mxu0 %vm1032_vm1, %v4290_v46  ;;  %4741 = vperm.xlu1 %6605, %v4640_v27   ;;  %v4670_v6 = vadd.f32 %v4669_v24, %v4668_v4 }
0x1220   : > { %5939 = vmatprep.mubr.msk.bf16.mxu0 %vm1032_vm1, %v4291_v26  ;;  %5954 = vmatpush3.bf16.msra.mxu1 %v6613_v63 }
0x1221   : > { %4746 = vperm.xlu0 %6604, %v4641_v38   ;;  %v4672_v0 = vadd.f32 %v4671_v9, %v4670_v6  ;;  %5955 = vmatprep.subr.bf16.mxu1 %v6614_v22 }
0x1222   : > { %5981 = vmatprep.subr.bf16.mxu0 %v6769_v44 }
0x1223   : > { %4751 = vperm.xlu1 %6605, %v4642_v50   ;;  %v4674_v3 = vadd.f32 %v4673_v59, %v4672_v0  ;;  %5982 = vmatpush3.bf16.msra.mxu0 %v6619_v56 }
0x1224   : > { %5956 = vmatpush3.bf16.msra.mxu1 %v6614_v22  ;;  %5983 = vmatprep.subr.bf16.mxu0 %v6769_v44 }
0x1225   : > { %4756 = vperm.xlu0 %6604, %v4643_v57   ;;  %v4676_v15 = vadd.f32 %v4675_v19, %v4674_v3  ;;  %5957 = vmatprep.subr.bf16.mxu1 %v6615_v36 }
0x1227   : > { %5940 = vmatmul.mubr.msk.bf16.gmra.mxu0 %vm1032_vm1, %v4292_v23  ;;  %v4677_v52 = vrot.slane %v4676_v15, 4  ;;  %4761 = vperm.xlu1 %6605, %v4644_v40  }
0x1228   : > { %5958 = vmatpush3.bf16.msra.mxu1 %v6615_v36  ;;  %5984 = vmatpush3.bf16.msra.mxu0 %v6620_v37 }
0x1229   : > { %v4678_v47 = vadd.f32 %v4677_v52, %v4676_v15  ;;  %5985 = vmatprep.subr.bf16.mxu0 %v6769_v44  ;;  %5991 = vmatprep.mubr.msk.bf16.mxu0 %vm6770_vm7, %v6769_v44 }
0x122b   : > { %v4679_v14 = vrot.slane %v4678_v47, 2 }
0x122c   : > { %5986 = vmatpush3.bf16.msra.mxu0 %v6621_v2 }
0x122d   : > { %v4680_v1 = vadd.f32 %v4679_v14, %v4678_v47  ;;  %5987 = vmatprep.subr.bf16.mxu0 %v6769_v44 }
0x122f   : > { %v4681_v53 = vrot.slane %v4680_v1, 1 }
0x1230   : > { %5988 = vmatpush3.bf16.msra.mxu0 %v6622_v18 }
0x1231   : > { %v4682_v60 = vadd.f32 %v4681_v53, %v4680_v1  ;;  %5989 = vmatprep.subr.bf16.mxu0 %v6769_v44 }
0x1233   : > { %v4683_v25 = vmax.f32 %v4682_v60, 1.0 }
0x1234   : > { %5990 = vmatpush3.bf16.msra.mxu0 %v6623_v33 }
0x1235   : > { %4803 = vperm.xlu0 %6604, %v4683_v25  }
0x1284   : > { %v4687_v51 = vpop.permute.xlu0 %4686 }
0x1286   : > { %v4697_v7 = vpop.permute.xlu1 %4696 }
0x1288   : > { %v4692_v31 = vpop.permute.xlu0 %4691 }
0x128a   : > { %v4702_v12 = vpop.permute.xlu1 %4701 }
0x128c   : > { %v4707_v29 = vpop.permute.xlu0 %4706 }
0x128e   : > { %v4712_v35 = vpop.permute.xlu1 %4711 }
0x1290   : > { %v4717_v41 = vpop.permute.xlu0 %4716 }
0x1292   : > { %v4722_v30 = vpop.permute.xlu1 %4721 }
0x1294   : > { %v4727_v38 = vpop.permute.xlu0 %4726 }
0x1296   : > { %v4732_v40 = vpop.permute.xlu1 %4731 }
0x1298   : > { %v4737_v19 = vpop.permute.xlu0 %4736 }
0x129a   : > { %v4742_v63 = vpop.permute.xlu1 %4741 }
0x129c   : > { %v4747_v16 = vpop.permute.xlu0 %4746 }
0x12cf   : > { %v5929_v32 = vpop.f32.mrf.mxu0 }
0x12d0   : > { %v4383_v45 = vadd.f32 %v5929_v32, %v8931_v11 }
0x12d1   : > { %v4374_v42 = vpop.f32.mrf.mxu0 }
0x12d2   : > { %v4375_v54 = vadd.f32 %v8931_v11, %v4374_v42  ;;  %v4766_v49 = vmul.f32 %v4697_v7, %v4383_v45 }
0x12d3   : > { %v5930_v17 = vpop.f32.mrf.mxu0 }
0x12d4   : > { %v4386_v8 = vadd.f32 %v5930_v17, %v8931_v11  ;;  %v4764_v61 = vmul.f32 %v4687_v51, %v4375_v54  ;;  %v4757_v17 = vpop.permute.xlu0 %4756 }
0x12d5   : > { %v4377_v43 = vpop.f32.mrf.mxu0 }
0x12d6   : > { %v4378_v20 = vadd.f32 %v8931_v11, %v4377_v43  ;;  %v4438_v34 = vpack.c.bf16 %v4386_v8, %v4383_v45  ;;  %v4767_v46 = vmul.f32 %v4702_v12, %v4386_v8 }
0x12d7   : > { %v5933_v39 = vpop.f32.mrf.mxu0 }
0x12d8   : > { %v4765_v62 = vmul.f32 %v4692_v31, %v4378_v20  ;;  %v4437_v58 = vpack.c.bf16 %v4378_v20, %v4375_v54  ;;  %v4399_v24 = vadd.f32 %v5933_v39, %v8931_v11 }
0x12d9   : > { %v4390_v27 = vpop.f32.mrf.mxu0 }
0x12da   : > { %v4780_v5 = vadd.f32 %v4765_v62, %v4764_v61  ;;  %v4391_v48 = vadd.f32 %v8931_v11, %v4390_v27  ;;  %5959 = vmatprep.mubr.bf16.mxu1 %v4437_v58  ;;  %v4770_v15 = vmul.f32 %v4717_v41, %v4399_v24  ;;  %v4804_v27 = vpop.permute.xlu0 %4803 }
0x12db   : > { %v5934_v21 = vpop.f32.mrf.mxu0  ;;  %5960 = vmatmul.mubr.bf16.vlgmr.msra.gmra.mxu1 %v4438_v34  ;;  %6624 = vrcp.f32 %v4804_v27 }
0x12dc   : > { %v4781_v55 = vadd.f32 %v4780_v5, %v4766_v49  ;;  %v4402_v50 = vadd.f32 %v5934_v21, %v8931_v11  ;;  %v4768_v28 = vmul.f32 %v4707_v29, %v4391_v48  ;;  %v4752_v29 = vpop.permute.xlu1 %4751 }
0x12dd   : > { %v4393_v26 = vpop.f32.mrf.mxu0 }
0x12de   : > { %v4782_v4 = vadd.f32 %v4781_v55, %v4767_v46  ;;  %v4394_v57 = vadd.f32 %v8931_v11, %v4393_v26  ;;  %v4440_v23 = vpack.c.bf16 %v4402_v50, %v4399_v24  ;;  %v4771_v1 = vmul.f32 %v4722_v30, %v4402_v50 }
0x12df   : > { %v5937_v9 = vpop.f32.mrf.mxu0 }
0x12e0   : > { %v4783_v6 = vadd.f32 %v4782_v4, %v4768_v28  ;;  %v4439_v59 = vpack.c.bf16 %v4394_v57, %v4391_v48  ;;  %v4769_v0 = vmul.f32 %v4712_v35, %v4394_v57  ;;  %v4415_v22 = vadd.f32 %v5937_v9, %v8931_v11  ;;  %v4762_v30 = vpop.permute.xlu1 %4761  ;;  %v5308_v4 = vld [vmem:[%s9214_s20] ss:$0 sm:$0xff] }
0x12e1   : > { %v4406_v3 = vpop.f32.mrf.mxu0 }
0x12e2   : > { %v4784_v52 = vadd.f32 %v4783_v6, %v4769_v0  ;;  %v4407_v47 = vadd.f32 %v8931_v11, %v4406_v3  ;;  %5963 = vmatprep.mubr.bf16.mxu1 %v4439_v59  ;;  %v4774_v51 = vmul.f32 %v4737_v19, %v4415_v22 }
0x12e3   : > { %v5938_v14 = vpop.f32.mrf.mxu0  ;;  %5964 = vmatmul.mubr.bf16.gmra.mxu1 %v4440_v23 }
0x12e4   : > { %v4785_v53 = vadd.f32 %v4784_v52, %v4770_v15  ;;  %v4418_v60 = vadd.f32 %v5938_v14, %v8931_v11  ;;  %v4772_v36 = vmul.f32 %v4727_v38, %v4407_v47 }
0x12e5   : > { %v4409_v25 = vpop.f32.mrf.mxu0 }
0x12e6   : > { %v4786_v13 = vadd.f32 %v4785_v53, %v4771_v1  ;;  %v4410_v44 = vadd.f32 %v8931_v11, %v4409_v25  ;;  %v4442_v18 = vpack.c.bf16 %v4418_v60, %v4415_v22  ;;  %v4775_v32 = vmul.f32 %v4742_v63, %v4418_v60 }
0x12e7   : > { %v5941_v10 = vpop.f32.mrf.mxu0 }
0x12e8   : > { %v4787_v56 = vadd.f32 %v4786_v13, %v4772_v36  ;;  %v4441_v37 = vpack.c.bf16 %v4410_v44, %v4407_v47  ;;  %v4773_v2 = vmul.f32 %v4732_v40, %v4410_v44  ;;  %v4431_v41 = vadd.f32 %v5941_v10, %v8931_v11  ;;  %v6625_v26 = vpop.eup %6624 }
0x12e9   : > { %v4422_v33 = vpop.f32.mrf.mxu0 }
0x12ea   : > { %v4788_v7 = vadd.f32 %v4787_v56, %v4773_v2  ;;  %v4423_v31 = vadd.f32 %v8931_v11, %v4422_v33  ;;  %5967 = vmatprep.mubr.bf16.mxu1 %v4441_v37  ;;  %v4778_v58 = vmul.f32 %v4757_v17, %v4431_v41 }
0x12eb   : > { %v5942_v12 = vpop.f32.mrf.mxu0  ;;  %5968 = vmatmul.mubr.bf16.gmra.mxu1 %v4442_v18 }
0x12ec   : > { %v4789_v42 = vadd.f32 %v4788_v7, %v4774_v51  ;;  %v4434_v35 = vadd.f32 %v5942_v12, %v8931_v11  ;;  %v4776_v8 = vmul.f32 %v4747_v16, %v4423_v31  ;;  %v4825_v12 = vld [vmem:[%s9215_s17] sm:$0x1] }
0x12ed   : > { %v4425_v54 = vpop.f32.mrf.mxu0 }
0x12ee   : > { %v4790_v43 = vadd.f32 %v4789_v42, %v4775_v32  ;;  %v4426_v45 = vadd.f32 %v8931_v11, %v4425_v54  ;;  %v4444_v62 = vpack.c.bf16 %v4434_v35, %v4431_v41  ;;  %v4779_v49 = vmul.f32 %v4762_v30, %v4434_v35 }
0x12f0   : > { %v4791_v20 = vadd.f32 %v4790_v43, %v4776_v8  ;;  %v4443_v39 = vpack.c.bf16 %v4426_v45, %v4423_v31  ;;  %v4777_v61 = vmul.f32 %v4752_v29, %v4426_v45 }
0x12f2   : > { %v4792_v34 = vadd.f32 %v4791_v20, %v4777_v61  ;;  %5971 = vmatprep.mubr.bf16.mxu1 %v4443_v39 }
0x12f3   : > { %5972 = vmatmul.mubr.bf16.gmra.mxu1 %v4444_v62 }
0x12f4   : > { %v4793_v5 = vadd.f32 %v4792_v34, %v4778_v58 }
0x12f6   : > { %v4794_v48 = vadd.f32 %v4793_v5, %v4779_v49 }
0x12f8   : > { %v4795_v38 = vrot.slane %v4794_v48, 4 }
0x12fa   : > { %v4796_v21 = vadd.f32 %v4795_v38, %v4794_v48 }
0x12fc   : > { %v4797_v46 = vrot.slane %v4796_v21, 2 }
0x12fe   : > { %v4798_v11 = vadd.f32 %v4797_v46, %v4796_v21 }
0x1300   : > { %v4799_v55 = vrot.slane %v4798_v11, 1 }
0x1302   : > { %v4800_v50 = vadd.f32 %v4799_v55, %v4798_v11 }
0x1304   : > { %v4807_v24 = vmul.f32 %v6625_v26, %v4800_v50 }
0x1306   : > { %v4808_v28 = vpack.c.bf16 %v4807_v24, %v4807_v24 }
0x1308   : > { %5992 = vmatmul.mubr.bf16.vlgmr.msra.gmra.mxu0 %v4808_v28 }
0x139b   : > { %v5961_v57 = vpop.f32.mrf.mxu1 }
0x139c   : > { %v4559_v9 = vadd.f32 %v5961_v57, %v5308_v4 }
0x139d   : > { %v4550_v40 = vpop.f32.mrf.mxu1 }
0x139e   : > { %4615 = vst [vmem:[%s7037_s28 + $0x10] sm:$0xff] %v4559_v9  ;;  %v4551_v6 = vadd.f32 %v5308_v4, %v4550_v40 }
0x139f   : > { %v5962_v59 = vpop.f32.mrf.mxu1 }
0x13a0   : > { %4613 = vst [vmem:[%s7037_s28] sm:$0xff] %v4551_v6  ;;  %v4562_v0 = vadd.f32 %v5962_v59, %v5308_v4 }
0x13a1   : > { %v4553_v19 = vpop.f32.mrf.mxu1 }
0x13a2   : > { %4616 = vst [vmem:[%s7037_s28 + $0x18] sm:$0xff] %v4562_v0  ;;  %v4554_v23 = vadd.f32 %v5308_v4, %v4553_v19 }
0x13a3   : > { %v5965_v3 = vpop.f32.mrf.mxu1 }
0x13a4   : > { %4614 = vst [vmem:[%s7037_s28 + $0x8] sm:$0xff] %v4554_v23  ;;  %v4575_v15 = vadd.f32 %v5965_v3, %v5308_v4 }
0x13a5   : > { %v4566_v52 = vpop.f32.mrf.mxu1 }
0x13a6   : > { %4619 = vst [vmem:[%s7037_s28 + $0x30] sm:$0xff] %v4575_v15  ;;  %v4567_v47 = vadd.f32 %v5308_v4, %v4566_v52 }
0x13a7   : > { %v5966_v14 = vpop.f32.mrf.mxu1 }
0x13a8   : > { %4617 = vst [vmem:[%s7037_s28 + $0x20] sm:$0xff] %v4567_v47  ;;  %v4578_v1 = vadd.f32 %v5966_v14, %v5308_v4 }
0x13a9   : > { %v4569_v53 = vpop.f32.mrf.mxu1 }
0x13aa   : > { %4620 = vst [vmem:[%s7037_s28 + $0x38] sm:$0xff] %v4578_v1  ;;  %v4570_v60 = vadd.f32 %v5308_v4, %v4569_v53 }
0x13ab   : > { %v5969_v25 = vpop.f32.mrf.mxu1 }
0x13ac   : > { %4618 = vst [vmem:[%s7037_s28 + $0x28] sm:$0xff] %v4570_v60  ;;  %v4591_v63 = vadd.f32 %v5969_v25, %v5308_v4 }
0x13ad   : > { %v4582_v22 = vpop.f32.mrf.mxu1 }
0x13ae   : > { %4623 = vst [vmem:[%s7037_s28 + $0x50] sm:$0xff] %v4591_v63  ;;  %v4583_v36 = vadd.f32 %v5308_v4, %v4582_v22 }
0x13af   : > { %v5970_v13 = vpop.f32.mrf.mxu1 }
0x13b0   : > { %4621 = vst [vmem:[%s7037_s28 + $0x40] sm:$0xff] %v4583_v36  ;;  %v4594_v44 = vadd.f32 %v5970_v13, %v5308_v4 }
0x13b1   : > { %v4585_v16 = vpop.f32.mrf.mxu1 }
0x13b2   : > { %4624 = vst [vmem:[%s7037_s28 + $0x58] sm:$0xff] %v4594_v44  ;;  %v4586_v10 = vadd.f32 %v5308_v4, %v4585_v16 }
0x13b3   : > { %v5973_v56 = vpop.f32.mrf.mxu1 }
0x13b4   : > { %4622 = vst [vmem:[%s7037_s28 + $0x48] sm:$0xff] %v4586_v10  ;;  %v4607_v37 = vadd.f32 %v5973_v56, %v5308_v4 }
0x13b5   : > { %v4598_v2 = vpop.f32.mrf.mxu1 }
0x13b6   : > { %4627 = vst [vmem:[%s7037_s28 + $0x70] sm:$0xff] %v4607_v37  ;;  %v4599_v18 = vadd.f32 %v5308_v4, %v4598_v2 }
0x13b7   : > { %v5974_v33 = vpop.f32.mrf.mxu1 }
0x13b8   : > { %4625 = vst [vmem:[%s7037_s28 + $0x60] sm:$0xff] %v4599_v18  ;;  %v4610_v51 = vadd.f32 %v5974_v33, %v5308_v4 }
0x13b9   : > { %v4601_v7 = vpop.f32.mrf.mxu1 }
0x13ba   : > { %4628 = vst [vmem:[%s7037_s28 + $0x78] sm:$0xff] %v4610_v51  ;;  %v4602_v31 = vadd.f32 %v5308_v4, %v4601_v7 }
0x13bc   : > { %4626 = vst [vmem:[%s7037_s28 + $0x68] sm:$0xff] %v4602_v31 }
0x13c8   : > { %v4908_v29 = vpop.f32.mrf.mxu0 }
0x13c9   : > { %v4909_v32 = vadd.f32 %v4908_v29, %v4825_v12 }
0x13ca   : > { %v5993_v42 = vpop.f32.mrf.mxu0 }
0x13cb   : > { %v5325_v17 = vmul.f32 -1.442695, %v4909_v32 }
0x13cc   : > { %v4911_v35 = vpop.f32.mrf.mxu0 }
0x13cd   : > { %6626 = vpow2.f32 %v5325_v17 }
0x13ce   : > { %v5994_v54 = vpop.f32.mrf.mxu0 }
0x13da   : > { %v6627_v41 = vpop.eup %6626 }
0x13db   : > { %v4917_v8 = vadd.f32 1.0, %v6627_v41 }
0x13dd   : > { %6628 = vrcp.f32 %v4917_v8 }
0x13ea   : > { %v6629_v43 = vpop.eup %6628 }
0x13eb   : > { %4920 = vst [vmem:[%s872_s6] sm:$0x1] %v6629_v43 }
0x13ec PF: > { %s9216_s2 = sld [smem:[#allocation13_spill]]  ;;  %s4939_s22 = sshll.u32 %s7037_s28, 4  ;;  %s8980_s22 = int_to_ptr.vmem [resolvable:$true] %s4939_s22 }
0x13ed   : > { %s9218_s16 = sld [smem:[#allocation58_spill]]  ;;  %s4922_s0 = scalar_lea.sflag [#allocation4], %s6959_s24 }
0x13ee   : > { %s6630_s1 = scalar_lea.vmem %s8980_s22, 2048  ;;  %s6771_s4 = smov [#allocation3]  }
0x13ef   : > { %p6631_p2 = scmp.ne.s32.totalorder %s8980_s22, %s6630_s1  ;;  %s6634_s30 = sshll.u32 %s6771_s4, 4  ;;  %s6635_s30 = int_to_ptr.vmem [resolvable:$false] %s6634_s30 }
0x13f0   : > { %s6636_s20 = scalar_lea.vmem %s6635_s30, 4096  ;;  %p6637_p6 = scmp.lt.s32.totalorder %s8980_s22, %s6635_s30 }
0x13f1   : > { %p6632_p4 = pnand %p6631_p2, %p6938_p3  ;;  %p6638_p7 = scmp.lt.s32.totalorder %s6636_s20, %s6630_s1 }
0x13f2   : > { %s5338_s23 = sshll.u32 %s9216_s2, 11 }
0x13f3   : > { %s8977_s15 = scalar_lea.hbm %s9218_s16, %s5338_s23  ;;  %p6633_p5 = pneg %p6632_p4 }
0x13f4   : > { %p6639_p8 = por %p6638_p7, %p6637_p6 }
0x13f6   : > { %p6640_p10 = pnand %p6639_p8, %p6633_p5 }
0x13f8   : > { %6643 = shalt.err (!%p6640_p10)
}
0x13f9   : > { %s6644_s28 = scalar_lea.hbm %s8977_s15, 2048  ;;  %s6648_s17 = scalar_lea.hbm %s9218_s16, 4096 }
0x13fa   : > { %p6645_p11 = scmp.ne.s32.totalorder %s8977_s15, %s6644_s28  ;;  %p6649_p0 = scmp.lt.s32.totalorder %s8977_s15, %s9218_s16 }
0x13fb   : > { %p6650_p1 = scmp.lt.s32.totalorder %s6648_s17, %s6644_s28 }
0x13fc   : > { %p6646_p12 = pnand %p6645_p11, %p6938_p3 }
0x13fd   : > { %p6651_p2 = por %p6650_p1, %p6649_p0 }
0x13fe   : > { %p6647_p13 = pneg %p6646_p12 }
0x1400   : > { %p6652_p4 = pnand %p6651_p2, %p6647_p13 }
0x1402   : > { %6655 = shalt.err (!%p6652_p4)
}
0x1403   : > { %s6772_s5 = smov 128   ;;  %s5329_s1 = sshll.u32 %s9216_s2, 4 }
0x1404   : > { %6043 = dma.vmem_to_hbm [thread:$0]  (%p6938_p3), %s8980_s22, 2048, %s8977_s15, %s4922_s0, %s6772_s5, %s6772_s5, %s6765_s29  }
0x1405   : > { %s9219_s20 = sld [smem:[#allocation59_spill]]  ;;  %s4955_s26 = sshll.u32 %s872_s6, 4  ;;  %s4956_s26 = int_to_ptr.vmem [resolvable:$true] %s4955_s26 }
0x1406   : > { %s4927_s3 = scalar_lea.sflag [#allocation6], %s6959_s24  ;;  %s6656_s17 = scalar_lea.vmem %s4956_s26, 16 }
0x1407   : > { %p6657_p5 = scmp.ne.s32.totalorder %s4956_s26, %s6656_s17  ;;  %s6773_s23 = smov [#allocation5]  }
0x1408   : > { %s6660_s21 = sshll.u32 %s6773_s23, 4  ;;  %s6661_s21 = int_to_ptr.vmem [resolvable:$false] %s6660_s21 }
0x1409   : > { %p6658_p6 = pnand %p6657_p5, %p6938_p3  ;;  %s6662_s7 = scalar_lea.vmem %s6661_s21, 32 }
0x140a   : > { %p6663_p8 = scmp.lt.s32.totalorder %s4956_s26, %s6661_s21  ;;  %p6664_p10 = scmp.lt.s32.totalorder %s6662_s7, %s6656_s17 }
0x140b   : > { %s4953_s28 = scalar_lea.hbm %s9219_s20, %s5329_s1  ;;  %p6659_p7 = pneg %p6658_p6 }
0x140c   : > { %p6665_p11 = por %p6664_p10, %p6663_p8 }
0x140e   : > { %p6666_p12 = pnand %p6665_p11, %p6659_p7 }
0x1410   : > { %6669 = shalt.err (!%p6666_p12)
}
0x1411   : > { %s6670_s29 = scalar_lea.hbm %s4953_s28, 16  ;;  %s6674_s2 = scalar_lea.hbm %s9219_s20, 32 }
0x1412   : > { %p6671_p13 = scmp.ne.s32.totalorder %s4953_s28, %s6670_s29  ;;  %p6675_p2 = scmp.lt.s32.totalorder %s4953_s28, %s9219_s20 }
0x1413   : > { %p6676_p4 = scmp.lt.s32.totalorder %s6674_s2, %s6670_s29 }
0x1414   : > { %p6672_p0 = pnand %p6671_p13, %p6938_p3 }
0x1415   : > { %p6677_p5 = por %p6676_p4, %p6675_p2 }
0x1416   : > { %p6673_p1 = pneg %p6672_p0 }
0x1418   : > { %p6678_p6 = pnand %p6677_p5, %p6673_p1 }
0x141a   : > { %6681 = shalt.err (!%p6678_p6)
}
0x141b   : > { %6044 = dma.vmem_to_hbm [thread:$0]  (%p6938_p3), %s4956_s26, 16, %s4953_s28, %s4927_s3  }
0x141c PF: > { %s9220_s7 = sld [smem:[#allocation16_spill]] }
0x141d   : > { %s9221_s0 = sld [smem:[#allocation9_spill]] }
0x1422   : > { %p6054_p7 = scmp.ge.s32.totalorder %s9220_s7, 2 }
0x1423   : > { %s4967_s1 = sand.u32 1, %s9221_s0  }
0x1424   : > { %p6048_p8 = pnand %p6054_p7, %p6948_p9  ;;  %s4968_s4 = scalar_lea.sflag [#allocation4], %s4967_s1 }
0x1426   : > { %p6049_p10 = pneg %p6048_p8 }
0x1428   : > { %6715 = dma.done.wait (%p6049_p10), %s4968_s4, 2048  }
0x1429   : > { %6717 = vsyncadd (%p6049_p10), %s4968_s4, 4294965248  ;;  %s4977_s30 = scalar_lea.sflag [#allocation6], %s4967_s1 }
0x142a   : > { %6719 = dma.done.wait (%p6049_p10), %s4977_s30, 16  }
0x142b   : > { %6721 = vsyncadd (%p6049_p10), %s4977_s30, 4294967280  ;;  %s39_s1 = sadd.s32 1, %s9220_s7   ;;  %s9223_s3 = sld [smem:[#allocation10_spill]] }
0x142c   : > { %p36_p11 = scmp.ge.s32.totalorder %s39_s1, 6   ;;  %s9224_s28 = sld [smem:[#allocation11_spill]] }
0x142d   : > { %s9225_s29 = sld [smem:[#allocation21_spill]] }
0x142e   : > { %s9226_s30 = sld [smem:[#allocation14_spill]]  ;;  %38 = sbr.rel (!%p36_p11) target bundleno = 24 (0x18), region = 206 }
0x142f   : > { %s9227_s4 = sld [smem:[#allocation15_spill]] }
0x1430   : > { %s9228_s0 = sld [smem:[#allocation17_spill]] }
0x1431   : > { %s9229_s23 = sld [smem:[#allocation19_spill]] }
0x1433   :  { %4981 = vsyncpa [#allocation4], 1 }
0x1434   :  { %4983 = vsyncpa [#allocation4 + $0x1], 1 }
0x1435   :  { %4984 = vsyncpa [#allocation6], 1 }
0x1436   :  { %4986 = vsyncpa [#allocation6 + $0x1], 1 }

</bundles_post_ra>
